<compile_context>
chip_gen: v7x
topology: tpu7x:2x2x1
jax: 0.10.0
libtpu: 0.0.40
codegen_flags: <defaults>
</compile_context>

<pallas_src>
import math
import jax
import jax.numpy as jnp
import numpy as np
from jax import lax
from jax.experimental import pallas as pl
from jax.experimental.pallas import tpu as pltpu

# ---------------- model hyper-parameters (small, consistent with the module) ----------------
B = 2
DIM = 64
HEADS = 4
DIM_HEAD = 16
INNER = HEADS * DIM_HEAD       # 64
DEPTH = 2
NTOK = 4                       # 1 text + 1 time + 1 image + 1 learned query
NKV = NTOK + 1                 # + null kv token
FF_INNER = 4 * DIM             # FeedForward mult=4
THID = 2 * DIM                 # time MLP hidden (expansion_factor=2)
ROT_DIM = min(32, DIM_HEAD)    # = 16 -> whole head is rotated
COS_SCALE = 16.0               # cosine_sim_scale
NUM_BUCKETS = 32
MAX_DIST = 128
EPS = 1e-5                     # LayerNorm eps (float32 path)
NEG = -1e30                    # finite mask sentinel (exp -> 0)


# ---------------- small in-kernel helpers ----------------
def _layernorm(x, g):
    mean = jnp.mean(x, axis=-1, keepdims=True)
    var = jnp.mean((x - mean) ** 2, axis=-1, keepdims=True)      # unbiased=False
    return (x - mean) * lax.rsqrt(var + EPS) * g


def _dot(a, b):
    return jnp.dot(a, b, preferred_element_type=jnp.float32)


# ---------------- the Pallas kernel: full causal transformer for the whole batch ----------------
def prior_kernel(tok_ref, qcos_ref, qsin_ref, kcos_ref, ksin_ref,
                 seg_ref, segj_ref, tile_ref, lsel_ref, hmask_ref, bias_ref,
                 kbi_ref, vbi_ref,
                 g_attn_ref, wq_ref, wqr_ref, wk_ref, wkr_ref, wv_ref,
                 wout_ref, g_out_ref, g_ff_ref, w1a_ref, w1b_ref, w2_ref,
                 g_fin_ref, wproj_ref, o_ref):
    x = tok_ref[...]                      # (B*NTOK, DIM)
    qcos = qcos_ref[...]                  # (B*NTOK, INNER)
    qsin = qsin_ref[...]
    kcos = kcos_ref[...]                  # (B*NTOK, DIM_HEAD)
    ksin = ksin_ref[...]
    seg = seg_ref[...]                    # (INNER, INNER)   per-head block-ones (q l2norm)
    segj = segj_ref[...]                  # (NCOL, NCOL)     per-(b,h) block-ones (softmax denom)
    tile_h = tile_ref[...]                # (DIM_HEAD, INNER) [I I I I]  lane-replication
    lsel = lsel_ref[...]                  # (NCOL, B*NTOK)   token-row gather (null rows all-zero)
    hmask = hmask_ref[...]                # (NCOL, INNER)    keep only the owning head's lanes
    bias = bias_ref[...]                  # (B*NTOK, NCOL)   rel-pos + causal + cross-batch mask
    sqrt_scale = math.sqrt(COS_SCALE)

    for l in range(DEPTH):
        # ---------------- causal cosine-sim attention (all batches + heads fused) ----------------
        xn = _layernorm(x, g_attn_ref[l])
        # fused-head projections; rotate_half folded into precomputed wqr = wq @ R, wkr = wk @ R
        q = _dot(xn, wq_ref[l]) * qcos + _dot(xn, wqr_ref[l]) * qsin      # (R, INNER)
        k = _dot(xn, wk_ref[l]) * kcos + _dot(xn, wkr_ref[l]) * ksin      # (R, DIM_HEAD)
        v = _dot(xn, wv_ref[l])                                           # (R, DIM_HEAD)
        # cosine-sim l2norm (+ sqrt(scale)); per-head sumsq for q via block-ones matmul
        qss = _dot(q * q, seg)
        qn = q * lax.rsqrt(jnp.maximum(qss, 1e-24)) * sqrt_scale
        kss = jnp.sum(k * k, axis=-1, keepdims=True)
        kn = k * lax.rsqrt(jnp.maximum(kss, 1e-24)) * sqrt_scale
        # block-diagonal K / V over (batch, head, kv) rows; null-kv rows precomputed in kbi/vbi
        kbig = kbi_ref[l] + _dot(_dot(lsel, kn), tile_h) * hmask          # (NCOL, INNER)
        vbig = vbi_ref[l] + _dot(_dot(lsel, v), tile_h) * hmask
        # one matmul gives sim for every (batch, head): (R, NCOL)
        sim = lax.dot_general(qn, kbig, (((1,), (1,)), ((), ())),
                              preferred_element_type=jnp.float32) + bias
        sim = sim - jnp.max(sim, axis=-1, keepdims=True)                  # per-row shift (cancels)
        p = jnp.exp(sim)
        denom = _dot(p, segj)                                             # per-(b,h) softmax sums
        p = p * pl.reciprocal(denom + 1e-30, approx=True)
        attn = _dot(_dot(p, vbig), wout_ref[l])                           # heads re-fused -> (R, DIM)
        x = x + _layernorm(attn, g_out_ref[l])                            # to_out = Linear -> LayerNorm
        # ---------------- SwiGLU feed-forward ----------------
        xn = _layernorm(x, g_ff_ref[l])
        a = _dot(xn, w1a_ref[l])
        gate = _dot(xn, w1b_ref[l])
        x = x + _dot(a * (gate * jax.nn.sigmoid(gate)), w2_ref[l])
        # TODO(synk): attn/ff dropout omitted (p=0.0 => identity in this forward).

    # ---------------- final norm + project_out on all tokens (last token taken in wrapper) ----------------
    o_ref[...] = _dot(_layernorm(x, g_fin_ref[...]), wproj_ref[...])


# ---------------- deterministic parameter init ----------------
def init_params(key):
    keys = iter(jax.random.split(key, 64))
    rnd = lambda shape, s=0.05: jax.random.normal(next(keys), shape, jnp.float32) * s
    p = {}
    # time MLP: Linear(DIM,THID)+SiLU, Linear(THID,THID)+SiLU, Linear(THID,DIM)
    p['tw1'], p['tb1'] = rnd((DIM, THID)), rnd((1, THID))
    p['tw2'], p['tb2'] = rnd((THID, THID)), rnd((1, THID))
    p['tw3'], p['tb3'] = rnd((THID, DIM)), rnd((1, DIM))
    p['learned_query'] = rnd((1, DIM), 1.0)
    p['null_text'] = rnd((1, 1, DIM), 1.0)
    p['null_image'] = rnd((1, DIM), 1.0)
    p['rel_emb'] = rnd((NUM_BUCKETS, HEADS), 0.02)
    # transformer layers (heads fused in the weight layout)
    p['g_attn'] = jnp.ones((DEPTH, 1, DIM), jnp.float32)
    p['wq'] = rnd((DEPTH, DIM, INNER))
    p['wk'] = rnd((DEPTH, DIM, DIM_HEAD))
    p['wv'] = rnd((DEPTH, DIM, DIM_HEAD))
    p['null_kv'] = rnd((DEPTH, 2, DIM_HEAD), 1.0)
    p['wout'] = rnd((DEPTH, INNER, DIM))
    p['g_out'] = jnp.ones((DEPTH, 1, DIM), jnp.float32)
    p['g_ff'] = jnp.ones((DEPTH, 1, DIM), jnp.float32)
    p['w1a'] = rnd((DEPTH, DIM, FF_INNER))
    p['w1b'] = rnd((DEPTH, DIM, FF_INNER))
    p['w2ff'] = rnd((DEPTH, FF_INNER, DIM))
    p['g_fin'] = jnp.ones((1, DIM), jnp.float32)
    p['wproj'] = rnd((DIM, DIM))
    return p


# ---------------- wrapper-side setup (plain numpy / XLA) ----------------
def sinusoidal_pos_emb(t):
    half = DIM // 2
    freqs = jnp.exp(jnp.arange(half, dtype=jnp.float32) * (-math.log(10000.0) / (half - 1)))
    ang = t.astype(jnp.float32)[:, None] * freqs[None, :]
    return jnp.concatenate([jnp.sin(ang), jnp.cos(ang)], axis=-1)


def rotary_tables():
    inv_freq = 1.0 / (10000.0 ** (np.arange(0, ROT_DIM, 2, dtype=np.float32) / ROT_DIM))
    pos = np.arange(NTOK, dtype=np.float32)
    ang = np.repeat(pos[:, None] * inv_freq[None, :], 2, axis=-1)        # interleaved (f0,f0,f1,f1,...)
    cos = np.concatenate([np.cos(ang), np.ones((NTOK, DIM_HEAD - ROT_DIM), np.float32)], -1)
    sin = np.concatenate([np.sin(ang), np.zeros((NTOK, DIM_HEAD - ROT_DIM), np.float32)], -1)
    pmat = np.zeros((DIM_HEAD, DIM_HEAD), np.float32)                    # rotate_half as a right-matmul
    for kk in range(ROT_DIM):
        if kk % 2 == 0:
            pmat[kk + 1, kk] = -1.0
        else:
            pmat[kk - 1, kk] = 1.0
    return cos.astype(np.float32), sin.astype(np.float32), pmat


def rel_pos_bias(rel_emb_weight):
    # matches the reference: k_pos runs over NKV (null column gets a learned bucket value)
    q_pos = np.arange(NTOK)
    k_pos = np.arange(NKV)
    rel = k_pos[None, :] - q_pos[:, None]
    neg = np.maximum(-rel, 0)
    max_exact = NUM_BUCKETS // 2
    is_small = neg < max_exact
    val_large = max_exact + (np.log(np.maximum(neg, 1) / max_exact)
                             / math.log(MAX_DIST / max_exact) * (NUM_BUCKETS - max_exact)).astype(np.int64)
    val_large = np.minimum(val_large, NUM_BUCKETS - 1)
    bucket = np.where(is_small, neg, val_large)
    values = rel_emb_weight[jnp.asarray(bucket)]                         # (NTOK, NKV, HEADS)
    return jnp.transpose(values, (2, 0, 1))                              # (HEADS, NTOK, NKV)


def _build_constants(b):
    cos_t, sin_t, pmat = rotary_tables()
    qcos = np.tile(np.tile(cos_t, (1, HEADS)), (b, 1)).astype(np.float32)    # (b*NTOK, INNER)
    qsin = np.tile(np.tile(sin_t, (1, HEADS)), (b, 1)).astype(np.float32)
    kcos = np.tile(cos_t, (b, 1)).astype(np.float32)                         # (b*NTOK, DIM_HEAD)
    ksin = np.tile(sin_t, (b, 1)).astype(np.float32)
    rot64 = np.kron(np.eye(HEADS, dtype=np.float32), pmat).astype(np.float32)     # fused-q rotate_half
    seg = np.kron(np.eye(HEADS, dtype=np.float32),
                  np.ones((DIM_HEAD, DIM_HEAD), np.float32))                 # (INNER, INNER)
    segj = np.kron(np.eye(b * HEADS, dtype=np.float32),
                   np.ones((NKV, NKV), np.float32))                          # (NCOL, NCOL)
    tile_h = np.tile(np.eye(DIM_HEAD, dtype=np.float32), (1, HEADS))         # (DIM_HEAD, INNER)
    ncol = b * HEADS * NKV
    col_b = np.arange(ncol) // (HEADS * NKV)
    col_h = (np.arange(ncol) // NKV) % HEADS
    col_j = np.arange(ncol) % NKV
    lsel = np.zeros((ncol, b * NTOK), np.float32)
    hmask = np.zeros((ncol, INNER), np.float32)
    for r in range(ncol):
        if col_j[r] >= 1:
            lsel[r, col_b[r] * NTOK + col_j[r] - 1] = 1.0
        hmask[r, col_h[r] * DIM_HEAD:(col_h[r] + 1) * DIM_HEAD] = 1.0
    row_b = np.arange(b * NTOK) // NTOK
    row_i = np.arange(b * NTOK) % NTOK
    valid = (row_b[:, None] == col_b[None, :]) & (col_j[None, :] <= row_i[:, None] + 1)
    return dict(qcos=qcos, qsin=qsin, kcos=kcos, ksin=ksin, rot64=rot64, pmat=pmat,
                seg=seg, segj=segj, tile=tile_h, lsel=lsel, hmask=hmask, valid=valid,
                col_h=col_h, col_j=col_j, row_i=row_i)


# ---------------- wrapper: DiffusionPriorNetwork.forward ----------------
def diffusion_prior_forward(params, image_embed, diffusion_timesteps, text_embed,
                            text_cond_drop_prob=0.0, image_cond_drop_prob=0.0):
    b = image_embed.shape[0]
    nrow = b * NTOK
    ncol = b * HEADS * NKV

    # classifier-free-guidance keep masks (prob_mask_like with prob in {0,1} is deterministic)
    text_keep = jnp.full((b, 1, 1), text_cond_drop_prob == 0.0)
    image_keep = jnp.full((b, 1, 1), image_cond_drop_prob == 0.0)
    text_e = jnp.where(text_keep, text_embed[:, None, :], params['null_text']).reshape(b, DIM)
    image_e = jnp.where(image_keep, image_embed[:, None, :], params['null_image'][None]).reshape(b, DIM)

    # time-embedding MLP + token assembly moved out of the kernel (batched XLA)
    tsin = sinusoidal_pos_emb(diffusion_timesteps)
    h = jax.nn.silu(tsin @ params['tw1'] + params['tb1'])
    h = jax.nn.silu(h @ params['tw2'] + params['tb2'])
    time_e = h @ params['tw3'] + params['tb3']
    lq = jnp.broadcast_to(params['learned_query'], (b, DIM))
    tokens = jnp.stack([text_e, time_e, image_e, lq], axis=1).reshape(nrow, DIM)
    # TODO(synk): self_cond=False and the text_encodings branch (commented out in the source)
    #             are not exercised, so they are not implemented here.

    c = _build_constants(b)

    # rel-pos bias + causal + cross-batch mask precombined into one additive bias
    rel = rel_pos_bias(params['rel_emb'])                                 # (HEADS, NTOK, NKV)
    bias_vals = rel[c['col_h'][None, :], c['row_i'][:, None], c['col_j'][None, :]]
    attn_bias = jnp.where(jnp.asarray(c['valid']), bias_vals, NEG).astype(jnp.float32)

    # rotate_half folded into the projection weights (precomputed once per call, in XLA)
    rot64 = jnp.asarray(c['rot64'])
    pmat = jnp.asarray(c['pmat'])
    wq, wk = params['wq'], params['wk']
    wqr = wq @ rot64                                                      # (DEPTH, DIM, INNER)
    wkr = wk @ pmat                                                       # (DEPTH, DIM, DIM_HEAD)

    # per-layer block-diagonal K/V "init": normalized+scaled null-k and raw null-v rows, zeros elsewhere
    nullk = params['null_kv'][:, 0, :]
    nullv = params['null_kv'][:, 1, :]
    nk = nullk * lax.rsqrt(jnp.maximum(jnp.sum(nullk * nullk, -1, keepdims=True), 1e-24)) \
        * math.sqrt(COS_SCALE)
    kbi = jnp.zeros((DEPTH, ncol, INNER), jnp.float32)
    vbi = jnp.zeros((DEPTH, ncol, INNER), jnp.float32)
    for bb in range(b):
        for hh in range(HEADS):
            r = bb * HEADS * NKV + hh * NKV
            sl = slice(hh * DIM_HEAD, (hh + 1) * DIM_HEAD)
            kbi = kbi.at[:, r, sl].set(nk)
            vbi = vbi.at[:, r, sl].set(nullv)

    args = (tokens,
            jnp.asarray(c['qcos']), jnp.asarray(c['qsin']),
            jnp.asarray(c['kcos']), jnp.asarray(c['ksin']),
            jnp.asarray(c['seg']), jnp.asarray(c['segj']), jnp.asarray(c['tile']),
            jnp.asarray(c['lsel']), jnp.asarray(c['hmask']), attn_bias,
            kbi, vbi,
            params['g_attn'], wq, wqr, wk, wkr, params['wv'],
            params['wout'], params['g_out'],
            params['g_ff'], params['w1a'], params['w1b'], params['w2ff'],
            params['g_fin'], params['wproj'])

    vmem = lambda: pl.BlockSpec(memory_space=pltpu.MemorySpace.VMEM)
    out = pl.pallas_call(
        prior_kernel,
        out_shape=jax.ShapeDtypeStruct((nrow, DIM), jnp.float32),
        in_specs=[vmem() for _ in args],
        out_specs=vmem(),
    )(*args)

    # pred_image_embed = last token (learned query position) per batch element
    return out.reshape(b, NTOK, DIM)[:, -1, :]


if __name__ == "__main__":
    key = jax.random.PRNGKey(0)
    kp, k1, k2, k3 = jax.random.split(key, 4)
    params = init_params(kp)
    image_embed = jax.random.normal(k1, (B, DIM), jnp.float32)
    text_embed = jax.random.normal(k2, (B, DIM), jnp.float32)
    timesteps = jax.random.randint(k3, (B,), 0, 1000).astype(jnp.float32)

    out = diffusion_prior_forward(params, image_embed, timesteps, text_embed)
    out = jax.block_until_ready(out)
    assert out.shape == (B, DIM), out.shape
    assert bool(jnp.all(jnp.isfinite(out)))
    print("KERNEL_OK")
</pallas_src>

<mosaic_0001>
module attributes {stable_mosaic.version = 11 : i64} {
  func.func @prior_kernel(%arg0: memref<8x64xf32, #tpu.memory_space<vmem>>, %arg1: memref<8x64xf32, #tpu.memory_space<vmem>>, %arg2: memref<8x64xf32, #tpu.memory_space<vmem>>, %arg3: memref<8x16xf32, #tpu.memory_space<vmem>>, %arg4: memref<8x16xf32, #tpu.memory_space<vmem>>, %arg5: memref<64x64xf32, #tpu.memory_space<vmem>>, %arg6: memref<40x40xf32, #tpu.memory_space<vmem>>, %arg7: memref<16x64xf32, #tpu.memory_space<vmem>>, %arg8: memref<40x8xf32, #tpu.memory_space<vmem>>, %arg9: memref<40x64xf32, #tpu.memory_space<vmem>>, %arg10: memref<8x40xf32, #tpu.memory_space<vmem>>, %arg11: memref<2x40x64xf32, #tpu.memory_space<vmem>>, %arg12: memref<2x40x64xf32, #tpu.memory_space<vmem>>, %arg13: memref<2x1x64xf32, #tpu.memory_space<vmem>>, %arg14: memref<2x64x64xf32, #tpu.memory_space<vmem>>, %arg15: memref<2x64x64xf32, #tpu.memory_space<vmem>>, %arg16: memref<2x64x16xf32, #tpu.memory_space<vmem>>, %arg17: memref<2x64x16xf32, #tpu.memory_space<vmem>>, %arg18: memref<2x64x16xf32, #tpu.memory_space<vmem>>, %arg19: memref<2x64x64xf32, #tpu.memory_space<vmem>>, %arg20: memref<2x1x64xf32, #tpu.memory_space<vmem>>, %arg21: memref<2x1x64xf32, #tpu.memory_space<vmem>>, %arg22: memref<2x64x256xf32, #tpu.memory_space<vmem>>, %arg23: memref<2x64x256xf32, #tpu.memory_space<vmem>>, %arg24: memref<2x256x64xf32, #tpu.memory_space<vmem>>, %arg25: memref<1x64xf32, #tpu.memory_space<vmem>>, %arg26: memref<64x64xf32, #tpu.memory_space<vmem>>, %arg27: memref<8x64xf32, #tpu.memory_space<vmem>>) attributes {dimension_semantics = [], scalar_prefetch = 0 : i64, scratch_operands = 0 : i64, tpu.core_type = #tpu.core_type<tc>} {
    %c0 = arith.constant 0 : index
    %c0_0 = arith.constant 0 : index
    %0 = vector.load %arg0[%c0, %c0_0] : memref<8x64xf32, #tpu.memory_space<vmem>>, vector<8x64xf32>
    %c0_1 = arith.constant 0 : index
    %c0_2 = arith.constant 0 : index
    %1 = vector.load %arg1[%c0_1, %c0_2] : memref<8x64xf32, #tpu.memory_space<vmem>>, vector<8x64xf32>
    %c0_3 = arith.constant 0 : index
    %c0_4 = arith.constant 0 : index
    %2 = vector.load %arg2[%c0_3, %c0_4] : memref<8x64xf32, #tpu.memory_space<vmem>>, vector<8x64xf32>
    %c0_5 = arith.constant 0 : index
    %c0_6 = arith.constant 0 : index
    %3 = vector.load %arg3[%c0_5, %c0_6] : memref<8x16xf32, #tpu.memory_space<vmem>>, vector<8x16xf32>
    %c0_7 = arith.constant 0 : index
    %c0_8 = arith.constant 0 : index
    %4 = vector.load %arg4[%c0_7, %c0_8] : memref<8x16xf32, #tpu.memory_space<vmem>>, vector<8x16xf32>
    %c0_9 = arith.constant 0 : index
    %c0_10 = arith.constant 0 : index
    %5 = vector.load %arg5[%c0_9, %c0_10] : memref<64x64xf32, #tpu.memory_space<vmem>>, vector<64x64xf32>
    %c0_11 = arith.constant 0 : index
    %c0_12 = arith.constant 0 : index
    %6 = vector.load %arg6[%c0_11, %c0_12] : memref<40x40xf32, #tpu.memory_space<vmem>>, vector<40x40xf32>
    %c0_13 = arith.constant 0 : index
    %c0_14 = arith.constant 0 : index
    %7 = vector.load %arg7[%c0_13, %c0_14] : memref<16x64xf32, #tpu.memory_space<vmem>>, vector<16x64xf32>
    %c0_15 = arith.constant 0 : index
    %c0_16 = arith.constant 0 : index
    %8 = vector.load %arg8[%c0_15, %c0_16] : memref<40x8xf32, #tpu.memory_space<vmem>>, vector<40x8xf32>
    %c0_17 = arith.constant 0 : index
    %c0_18 = arith.constant 0 : index
    %9 = vector.load %arg9[%c0_17, %c0_18] : memref<40x64xf32, #tpu.memory_space<vmem>>, vector<40x64xf32>
    %c0_19 = arith.constant 0 : index
    %c0_20 = arith.constant 0 : index
    %10 = vector.load %arg10[%c0_19, %c0_20] : memref<8x40xf32, #tpu.memory_space<vmem>>, vector<8x40xf32>
    %c0_21 = arith.constant 0 : index
    %c0_22 = arith.constant 0 : index
    %c0_23 = arith.constant 0 : index
    %11 = vector.load %arg13[%c0_21, %c0_22, %c0_23] : memref<2x1x64xf32, #tpu.memory_space<vmem>>, vector<1x1x64xf32>
    %12 = vector.shape_cast %11 : vector<1x1x64xf32> to vector<1x64xf32>
    %cst = arith.constant dense<0.000000e+00> : vector<8xf32>
    %13 = vector.multi_reduction <add>, %0, %cst [1] : vector<8x64xf32> to vector<8xf32>
    %14 = vector.shape_cast %13 : vector<8xf32> to vector<8x1xf32>
    %cst_24 = arith.constant 6.400000e+01 : f32
    %15 = vector.broadcast %cst_24 : f32 to vector<8x1xf32>
    %16 = arith.divf %14, %15 : vector<8x1xf32>
    %17 = vector.broadcast %16 : vector<8x1xf32> to vector<8x64xf32>
    %18 = arith.subf %0, %17 : vector<8x64xf32>
    %19 = arith.mulf %18, %18 : vector<8x64xf32>
    %cst_25 = arith.constant dense<0.000000e+00> : vector<8xf32>
    %20 = vector.multi_reduction <add>, %19, %cst_25 [1] : vector<8x64xf32> to vector<8xf32>
    %21 = vector.shape_cast %20 : vector<8xf32> to vector<8x1xf32>
    %cst_26 = arith.constant 6.400000e+01 : f32
    %22 = vector.broadcast %cst_26 : f32 to vector<8x1xf32>
    %23 = arith.divf %21, %22 : vector<8x1xf32>
    %24 = vector.broadcast %16 : vector<8x1xf32> to vector<8x64xf32>
    %25 = arith.subf %0, %24 : vector<8x64xf32>
    %cst_27 = arith.constant 9.99999974E-6 : f32
    %26 = vector.broadcast %cst_27 : f32 to vector<8x1xf32>
    %27 = arith.addf %23, %26 : vector<8x1xf32>
    %28 = math.rsqrt %27 : vector<8x1xf32>
    %29 = vector.broadcast %28 : vector<8x1xf32> to vector<8x64xf32>
    %30 = arith.mulf %25, %29 : vector<8x64xf32>
    %31 = vector.broadcast %12 : vector<1x64xf32> to vector<8x64xf32>
    %32 = arith.mulf %30, %31 : vector<8x64xf32>
    %c0_28 = arith.constant 0 : index
    %c0_29 = arith.constant 0 : index
    %c0_30 = arith.constant 0 : index
    %33 = vector.load %arg14[%c0_28, %c0_29, %c0_30] : memref<2x64x64xf32, #tpu.memory_space<vmem>>, vector<1x64x64xf32>
    %34 = vector.shape_cast %33 : vector<1x64x64xf32> to vector<64x64xf32>
    %cst_31 = arith.constant dense<0.000000e+00> : vector<8x64xf32>
    %35 = tpu.matmul %32, %34, %cst_31 {dimension_numbers = #tpu.dot_dimension_numbers<[1], [0], [0], [1], [0, 0, 1, 1], [], []>} : vector<8x64xf32>, vector<64x64xf32>, vector<8x64xf32> -> vector<8x64xf32>
    %36 = arith.mulf %35, %1 : vector<8x64xf32>
    %c0_32 = arith.constant 0 : index
    %c0_33 = arith.constant 0 : index
    %c0_34 = arith.constant 0 : index
    %37 = vector.load %arg15[%c0_32, %c0_33, %c0_34] : memref<2x64x64xf32, #tpu.memory_space<vmem>>, vector<1x64x64xf32>
    %38 = vector.shape_cast %37 : vector<1x64x64xf32> to vector<64x64xf32>
    %cst_35 = arith.constant dense<0.000000e+00> : vector<8x64xf32>
    %39 = tpu.matmul %32, %38, %cst_35 {dimension_numbers = #tpu.dot_dimension_numbers<[1], [0], [0], [1], [0, 0, 1, 1], [], []>} : vector<8x64xf32>, vector<64x64xf32>, vector<8x64xf32> -> vector<8x64xf32>
    %40 = arith.mulf %39, %2 : vector<8x64xf32>
    %41 = arith.addf %36, %40 : vector<8x64xf32>
    %c0_36 = arith.constant 0 : index
    %c0_37 = arith.constant 0 : index
    %c0_38 = arith.constant 0 : index
    %42 = vector.load %arg16[%c0_36, %c0_37, %c0_38] : memref<2x64x16xf32, #tpu.memory_space<vmem>>, vector<1x64x16xf32>
    %43 = vector.shape_cast %42 : vector<1x64x16xf32> to vector<64x16xf32>
    %cst_39 = arith.constant dense<0.000000e+00> : vector<8x16xf32>
    %44 = tpu.matmul %32, %43, %cst_39 {dimension_numbers = #tpu.dot_dimension_numbers<[1], [0], [0], [1], [0, 0, 1, 1], [], []>} : vector<8x64xf32>, vector<64x16xf32>, vector<8x16xf32> -> vector<8x16xf32>
    %45 = arith.mulf %44, %3 : vector<8x16xf32>
    %c0_40 = arith.constant 0 : index
    %c0_41 = arith.constant 0 : index
    %c0_42 = arith.constant 0 : index
    %46 = vector.load %arg17[%c0_40, %c0_41, %c0_42] : memref<2x64x16xf32, #tpu.memory_space<vmem>>, vector<1x64x16xf32>
    %47 = vector.shape_cast %46 : vector<1x64x16xf32> to vector<64x16xf32>
    %cst_43 = arith.constant dense<0.000000e+00> : vector<8x16xf32>
    %48 = tpu.matmul %32, %47, %cst_43 {dimension_numbers = #tpu.dot_dimension_numbers<[1], [0], [0], [1], [0, 0, 1, 1], [], []>} : vector<8x64xf32>, vector<64x16xf32>, vector<8x16xf32> -> vector<8x16xf32>
    %49 = arith.mulf %48, %4 : vector<8x16xf32>
    %50 = arith.addf %45, %49 : vector<8x16xf32>
    %c0_44 = arith.constant 0 : index
    %c0_45 = arith.constant 0 : index
    %c0_46 = arith.constant 0 : index
    %51 = vector.load %arg18[%c0_44, %c0_45, %c0_46] : memref<2x64x16xf32, #tpu.memory_space<vmem>>, vector<1x64x16xf32>
    %52 = vector.shape_cast %51 : vector<1x64x16xf32> to vector<64x16xf32>
    %cst_47 = arith.constant dense<0.000000e+00> : vector<8x16xf32>
    %53 = tpu.matmul %32, %52, %cst_47 {dimension_numbers = #tpu.dot_dimension_numbers<[1], [0], [0], [1], [0, 0, 1, 1], [], []>} : vector<8x64xf32>, vector<64x16xf32>, vector<8x16xf32> -> vector<8x16xf32>
    %54 = arith.mulf %41, %41 : vector<8x64xf32>
    %cst_48 = arith.constant dense<0.000000e+00> : vector<8x64xf32>
    %55 = tpu.matmul %54, %5, %cst_48 {dimension_numbers = #tpu.dot_dimension_numbers<[1], [0], [0], [1], [0, 0, 1, 1], [], []>} : vector<8x64xf32>, vector<64x64xf32>, vector<8x64xf32> -> vector<8x64xf32>
    %cst_49 = arith.constant 1.000000e-24 : f32
    %56 = vector.broadcast %cst_49 : f32 to vector<8x64xf32>
    %57 = arith.maximumf %55, %56 : vector<8x64xf32>
    %58 = math.rsqrt %57 : vector<8x64xf32>
    %59 = arith.mulf %41, %58 : vector<8x64xf32>
    %cst_50 = arith.constant 4.000000e+00 : f32
    %60 = vector.broadcast %cst_50 : f32 to vector<8x64xf32>
    %61 = arith.mulf %59, %60 : vector<8x64xf32>
    %62 = arith.mulf %50, %50 : vector<8x16xf32>
    %cst_51 = arith.constant dense<0.000000e+00> : vector<8xf32>
    %63 = vector.multi_reduction <add>, %62, %cst_51 [1] : vector<8x16xf32> to vector<8xf32>
    %64 = vector.shape_cast %63 : vector<8xf32> to vector<8x1xf32>
    %cst_52 = arith.constant 1.000000e-24 : f32
    %65 = vector.broadcast %cst_52 : f32 to vector<8x1xf32>
    %66 = arith.maximumf %64, %65 : vector<8x1xf32>
    %67 = math.rsqrt %66 : vector<8x1xf32>
    %68 = vector.broadcast %67 : vector<8x1xf32> to vector<8x16xf32>
    %69 = arith.mulf %50, %68 : vector<8x16xf32>
    %cst_53 = arith.constant 4.000000e+00 : f32
    %70 = vector.broadcast %cst_53 : f32 to vector<8x16xf32>
    %71 = arith.mulf %69, %70 : vector<8x16xf32>
    %c0_54 = arith.constant 0 : index
    %c0_55 = arith.constant 0 : index
    %c0_56 = arith.constant 0 : index
    %72 = vector.load %arg11[%c0_54, %c0_55, %c0_56] : memref<2x40x64xf32, #tpu.memory_space<vmem>>, vector<1x40x64xf32>
    %73 = vector.shape_cast %72 : vector<1x40x64xf32> to vector<40x64xf32>
    %cst_57 = arith.constant dense<0.000000e+00> : vector<40x16xf32>
    %74 = tpu.matmul %8, %71, %cst_57 {dimension_numbers = #tpu.dot_dimension_numbers<[1], [0], [0], [1], [0, 0, 1, 1], [], []>} : vector<40x8xf32>, vector<8x16xf32>, vector<40x16xf32> -> vector<40x16xf32>
    %cst_58 = arith.constant dense<0.000000e+00> : vector<40x64xf32>
    %75 = tpu.matmul %74, %7, %cst_58 {dimension_numbers = #tpu.dot_dimension_numbers<[1], [0], [0], [1], [0, 0, 1, 1], [], []>} : vector<40x16xf32>, vector<16x64xf32>, vector<40x64xf32> -> vector<40x64xf32>
    %76 = arith.mulf %75, %9 : vector<40x64xf32>
    %77 = arith.addf %73, %76 : vector<40x64xf32>
    %c0_59 = arith.constant 0 : index
    %c0_60 = arith.constant 0 : index
    %c0_61 = arith.constant 0 : index
    %78 = vector.load %arg12[%c0_59, %c0_60, %c0_61] : memref<2x40x64xf32, #tpu.memory_space<vmem>>, vector<1x40x64xf32>
    %79 = vector.shape_cast %78 : vector<1x40x64xf32> to vector<40x64xf32>
    %cst_62 = arith.constant dense<0.000000e+00> : vector<40x16xf32>
    %80 = tpu.matmul %8, %53, %cst_62 {dimension_numbers = #tpu.dot_dimension_numbers<[1], [0], [0], [1], [0, 0, 1, 1], [], []>} : vector<40x8xf32>, vector<8x16xf32>, vector<40x16xf32> -> vector<40x16xf32>
    %cst_63 = arith.constant dense<0.000000e+00> : vector<40x64xf32>
    %81 = tpu.matmul %80, %7, %cst_63 {dimension_numbers = #tpu.dot_dimension_numbers<[1], [0], [0], [1], [0, 0, 1, 1], [], []>} : vector<40x16xf32>, vector<16x64xf32>, vector<40x64xf32> -> vector<40x64xf32>
    %82 = arith.mulf %81, %9 : vector<40x64xf32>
    %83 = arith.addf %79, %82 : vector<40x64xf32>
    %cst_64 = arith.constant dense<0.000000e+00> : vector<8x40xf32>
    %84 = tpu.matmul %61, %77, %cst_64 {dimension_numbers = #tpu.dot_dimension_numbers<[1], [1], [0], [0], [0, 0, 1, 0], [], []>} : vector<8x64xf32>, vector<40x64xf32>, vector<8x40xf32> -> vector<8x40xf32>
    %85 = arith.addf %84, %10 : vector<8x40xf32>
    %cst_65 = arith.constant dense<0xFF800000> : vector<8xf32>
    %86 = vector.multi_reduction <maximumf>, %85, %cst_65 [1] : vector<8x40xf32> to vector<8xf32>
    %87 = vector.shape_cast %86 : vector<8xf32> to vector<8x1xf32>
    %88 = vector.broadcast %87 : vector<8x1xf32> to vector<8x40xf32>
    %89 = arith.subf %85, %88 : vector<8x40xf32>
    %90 = math.exp %89 : vector<8x40xf32>
    %cst_66 = arith.constant dense<0.000000e+00> : vector<8x40xf32>
    %91 = tpu.matmul %90, %6, %cst_66 {dimension_numbers = #tpu.dot_dimension_numbers<[1], [0], [0], [1], [0, 0, 1, 1], [], []>} : vector<8x40xf32>, vector<40x40xf32>, vector<8x40xf32> -> vector<8x40xf32>
    %cst_67 = arith.constant 1.000000e-30 : f32
    %92 = vector.broadcast %cst_67 : f32 to vector<8x40xf32>
    %93 = arith.addf %91, %92 : vector<8x40xf32>
    %94 = tpu.reciprocal %93 {approx = true} : vector<8x40xf32> -> vector<8x40xf32>
    %95 = arith.mulf %90, %94 : vector<8x40xf32>
    %cst_68 = arith.constant dense<0.000000e+00> : vector<8x64xf32>
    %96 = tpu.matmul %95, %83, %cst_68 {dimension_numbers = #tpu.dot_dimension_numbers<[1], [0], [0], [1], [0, 0, 1, 1], [], []>} : vector<8x40xf32>, vector<40x64xf32>, vector<8x64xf32> -> vector<8x64xf32>
    %c0_69 = arith.constant 0 : index
    %c0_70 = arith.constant 0 : index
    %c0_71 = arith.constant 0 : index
    %97 = vector.load %arg19[%c0_69, %c0_70, %c0_71] : memref<2x64x64xf32, #tpu.memory_space<vmem>>, vector<1x64x64xf32>
    %98 = vector.shape_cast %97 : vector<1x64x64xf32> to vector<64x64xf32>
    %cst_72 = arith.constant dense<0.000000e+00> : vector<8x64xf32>
    %99 = tpu.matmul %96, %98, %cst_72 {dimension_numbers = #tpu.dot_dimension_numbers<[1], [0], [0], [1], [0, 0, 1, 1], [], []>} : vector<8x64xf32>, vector<64x64xf32>, vector<8x64xf32> -> vector<8x64xf32>
    %c0_73 = arith.constant 0 : index
    %c0_74 = arith.constant 0 : index
    %c0_75 = arith.constant 0 : index
    %100 = vector.load %arg20[%c0_73, %c0_74, %c0_75] : memref<2x1x64xf32, #tpu.memory_space<vmem>>, vector<1x1x64xf32>
    %101 = vector.shape_cast %100 : vector<1x1x64xf32> to vector<1x64xf32>
    %cst_76 = arith.constant dense<0.000000e+00> : vector<8xf32>
    %102 = vector.multi_reduction <add>, %99, %cst_76 [1] : vector<8x64xf32> to vector<8xf32>
    %103 = vector.shape_cast %102 : vector<8xf32> to vector<8x1xf32>
    %cst_77 = arith.constant 6.400000e+01 : f32
    %104 = vector.broadcast %cst_77 : f32 to vector<8x1xf32>
    %105 = arith.divf %103, %104 : vector<8x1xf32>
    %106 = vector.broadcast %105 : vector<8x1xf32> to vector<8x64xf32>
    %107 = arith.subf %99, %106 : vector<8x64xf32>
    %108 = arith.mulf %107, %107 : vector<8x64xf32>
    %cst_78 = arith.constant dense<0.000000e+00> : vector<8xf32>
    %109 = vector.multi_reduction <add>, %108, %cst_78 [1] : vector<8x64xf32> to vector<8xf32>
    %110 = vector.shape_cast %109 : vector<8xf32> to vector<8x1xf32>
    %cst_79 = arith.constant 6.400000e+01 : f32
    %111 = vector.broadcast %cst_79 : f32 to vector<8x1xf32>
    %112 = arith.divf %110, %111 : vector<8x1xf32>
    %113 = vector.broadcast %105 : vector<8x1xf32> to vector<8x64xf32>
    %114 = arith.subf %99, %113 : vector<8x64xf32>
    %cst_80 = arith.constant 9.99999974E-6 : f32
    %115 = vector.broadcast %cst_80 : f32 to vector<8x1xf32>
    %116 = arith.addf %112, %115 : vector<8x1xf32>
    %117 = math.rsqrt %116 : vector<8x1xf32>
    %118 = vector.broadcast %117 : vector<8x1xf32> to vector<8x64xf32>
    %119 = arith.mulf %114, %118 : vector<8x64xf32>
    %120 = vector.broadcast %101 : vector<1x64xf32> to vector<8x64xf32>
    %121 = arith.mulf %119, %120 : vector<8x64xf32>
    %122 = arith.addf %0, %121 : vector<8x64xf32>
    %c0_81 = arith.constant 0 : index
    %c0_82 = arith.constant 0 : index
    %c0_83 = arith.constant 0 : index
    %123 = vector.load %arg21[%c0_81, %c0_82, %c0_83] : memref<2x1x64xf32, #tpu.memory_space<vmem>>, vector<1x1x64xf32>
    %124 = vector.shape_cast %123 : vector<1x1x64xf32> to vector<1x64xf32>
    %cst_84 = arith.constant dense<0.000000e+00> : vector<8xf32>
    %125 = vector.multi_reduction <add>, %122, %cst_84 [1] : vector<8x64xf32> to vector<8xf32>
    %126 = vector.shape_cast %125 : vector<8xf32> to vector<8x1xf32>
    %cst_85 = arith.constant 6.400000e+01 : f32
    %127 = vector.broadcast %cst_85 : f32 to vector<8x1xf32>
    %128 = arith.divf %126, %127 : vector<8x1xf32>
    %129 = vector.broadcast %128 : vector<8x1xf32> to vector<8x64xf32>
    %130 = arith.subf %122, %129 : vector<8x64xf32>
    %131 = arith.mulf %130, %130 : vector<8x64xf32>
    %cst_86 = arith.constant dense<0.000000e+00> : vector<8xf32>
    %132 = vector.multi_reduction <add>, %131, %cst_86 [1] : vector<8x64xf32> to vector<8xf32>
    %133 = vector.shape_cast %132 : vector<8xf32> to vector<8x1xf32>
    %cst_87 = arith.constant 6.400000e+01 : f32
    %134 = vector.broadcast %cst_87 : f32 to vector<8x1xf32>
    %135 = arith.divf %133, %134 : vector<8x1xf32>
    %136 = vector.broadcast %128 : vector<8x1xf32> to vector<8x64xf32>
    %137 = arith.subf %122, %136 : vector<8x64xf32>
    %cst_88 = arith.constant 9.99999974E-6 : f32
    %138 = vector.broadcast %cst_88 : f32 to vector<8x1xf32>
    %139 = arith.addf %135, %138 : vector<8x1xf32>
    %140 = math.rsqrt %139 : vector<8x1xf32>
    %141 = vector.broadcast %140 : vector<8x1xf32> to vector<8x64xf32>
    %142 = arith.mulf %137, %141 : vector<8x64xf32>
    %143 = vector.broadcast %124 : vector<1x64xf32> to vector<8x64xf32>
    %144 = arith.mulf %142, %143 : vector<8x64xf32>
    %c0_89 = arith.constant 0 : index
    %c0_90 = arith.constant 0 : index
    %c0_91 = arith.constant 0 : index
    %145 = vector.load %arg22[%c0_89, %c0_90, %c0_91] : memref<2x64x256xf32, #tpu.memory_space<vmem>>, vector<1x64x256xf32>
    %146 = vector.shape_cast %145 : vector<1x64x256xf32> to vector<64x256xf32>
    %cst_92 = arith.constant dense<0.000000e+00> : vector<8x256xf32>
    %147 = tpu.matmul %144, %146, %cst_92 {dimension_numbers = #tpu.dot_dimension_numbers<[1], [0], [0], [1], [0, 0, 1, 1], [], []>} : vector<8x64xf32>, vector<64x256xf32>, vector<8x256xf32> -> vector<8x256xf32>
    %c0_93 = arith.constant 0 : index
    %c0_94 = arith.constant 0 : index
    %c0_95 = arith.constant 0 : index
    %148 = vector.load %arg23[%c0_93, %c0_94, %c0_95] : memref<2x64x256xf32, #tpu.memory_space<vmem>>, vector<1x64x256xf32>
    %149 = vector.shape_cast %148 : vector<1x64x256xf32> to vector<64x256xf32>
    %cst_96 = arith.constant dense<0.000000e+00> : vector<8x256xf32>
    %150 = tpu.matmul %144, %149, %cst_96 {dimension_numbers = #tpu.dot_dimension_numbers<[1], [0], [0], [1], [0, 0, 1, 1], [], []>} : vector<8x64xf32>, vector<64x256xf32>, vector<8x256xf32> -> vector<8x256xf32>
    %151 = arith.negf %150 : vector<8x256xf32>
    %152 = math.exp %151 : vector<8x256xf32>
    %cst_97 = arith.constant 1.000000e+00 : f32
    %153 = vector.broadcast %cst_97 : f32 to vector<8x256xf32>
    %154 = arith.addf %153, %152 : vector<8x256xf32>
    %155 = arith.divf %153, %154 : vector<8x256xf32>
    %156 = arith.mulf %150, %155 : vector<8x256xf32>
    %157 = arith.mulf %147, %156 : vector<8x256xf32>
    %c0_98 = arith.constant 0 : index
    %c0_99 = arith.constant 0 : index
    %c0_100 = arith.constant 0 : index
    %158 = vector.load %arg24[%c0_98, %c0_99, %c0_100] : memref<2x256x64xf32, #tpu.memory_space<vmem>>, vector<1x256x64xf32>
    %159 = vector.shape_cast %158 : vector<1x256x64xf32> to vector<256x64xf32>
    %cst_101 = arith.constant dense<0.000000e+00> : vector<8x64xf32>
    %160 = tpu.matmul %157, %159, %cst_101 {dimension_numbers = #tpu.dot_dimension_numbers<[1], [0], [0], [1], [0, 0, 1, 1], [], []>} : vector<8x256xf32>, vector<256x64xf32>, vector<8x64xf32> -> vector<8x64xf32>
    %161 = arith.addf %122, %160 : vector<8x64xf32>
    %c1 = arith.constant 1 : index
    %c0_102 = arith.constant 0 : index
    %c0_103 = arith.constant 0 : index
    %162 = vector.load %arg13[%c1, %c0_102, %c0_103] : memref<2x1x64xf32, #tpu.memory_space<vmem>>, vector<1x1x64xf32>
    %163 = vector.shape_cast %162 : vector<1x1x64xf32> to vector<1x64xf32>
    %cst_104 = arith.constant dense<0.000000e+00> : vector<8xf32>
    %164 = vector.multi_reduction <add>, %161, %cst_104 [1] : vector<8x64xf32> to vector<8xf32>
    %165 = vector.shape_cast %164 : vector<8xf32> to vector<8x1xf32>
    %cst_105 = arith.constant 6.400000e+01 : f32
    %166 = vector.broadcast %cst_105 : f32 to vector<8x1xf32>
    %167 = arith.divf %165, %166 : vector<8x1xf32>
    %168 = vector.broadcast %167 : vector<8x1xf32> to vector<8x64xf32>
    %169 = arith.subf %161, %168 : vector<8x64xf32>
    %170 = arith.mulf %169, %169 : vector<8x64xf32>
    %cst_106 = arith.constant dense<0.000000e+00> : vector<8xf32>
    %171 = vector.multi_reduction <add>, %170, %cst_106 [1] : vector<8x64xf32> to vector<8xf32>
    %172 = vector.shape_cast %171 : vector<8xf32> to vector<8x1xf32>
    %cst_107 = arith.constant 6.400000e+01 : f32
    %173 = vector.broadcast %cst_107 : f32 to vector<8x1xf32>
    %174 = arith.divf %172, %173 : vector<8x1xf32>
    %175 = vector.broadcast %167 : vector<8x1xf32> to vector<8x64xf32>
    %176 = arith.subf %161, %175 : vector<8x64xf32>
    %cst_108 = arith.constant 9.99999974E-6 : f32
    %177 = vector.broadcast %cst_108 : f32 to vector<8x1xf32>
    %178 = arith.addf %174, %177 : vector<8x1xf32>
    %179 = math.rsqrt %178 : vector<8x1xf32>
    %180 = vector.broadcast %179 : vector<8x1xf32> to vector<8x64xf32>
    %181 = arith.mulf %176, %180 : vector<8x64xf32>
    %182 = vector.broadcast %163 : vector<1x64xf32> to vector<8x64xf32>
    %183 = arith.mulf %181, %182 : vector<8x64xf32>
    %c1_109 = arith.constant 1 : index
    %c0_110 = arith.constant 0 : index
    %c0_111 = arith.constant 0 : index
    %184 = vector.load %arg14[%c1_109, %c0_110, %c0_111] : memref<2x64x64xf32, #tpu.memory_space<vmem>>, vector<1x64x64xf32>
    %185 = vector.shape_cast %184 : vector<1x64x64xf32> to vector<64x64xf32>
    %cst_112 = arith.constant dense<0.000000e+00> : vector<8x64xf32>
    %186 = tpu.matmul %183, %185, %cst_112 {dimension_numbers = #tpu.dot_dimension_numbers<[1], [0], [0], [1], [0, 0, 1, 1], [], []>} : vector<8x64xf32>, vector<64x64xf32>, vector<8x64xf32> -> vector<8x64xf32>
    %187 = arith.mulf %186, %1 : vector<8x64xf32>
    %c1_113 = arith.constant 1 : index
    %c0_114 = arith.constant 0 : index
    %c0_115 = arith.constant 0 : index
    %188 = vector.load %arg15[%c1_113, %c0_114, %c0_115] : memref<2x64x64xf32, #tpu.memory_space<vmem>>, vector<1x64x64xf32>
    %189 = vector.shape_cast %188 : vector<1x64x64xf32> to vector<64x64xf32>
    %cst_116 = arith.constant dense<0.000000e+00> : vector<8x64xf32>
    %190 = tpu.matmul %183, %189, %cst_116 {dimension_numbers = #tpu.dot_dimension_numbers<[1], [0], [0], [1], [0, 0, 1, 1], [], []>} : vector<8x64xf32>, vector<64x64xf32>, vector<8x64xf32> -> vector<8x64xf32>
    %191 = arith.mulf %190, %2 : vector<8x64xf32>
    %192 = arith.addf %187, %191 : vector<8x64xf32>
    %c1_117 = arith.constant 1 : index
    %c0_118 = arith.constant 0 : index
    %c0_119 = arith.constant 0 : index
    %193 = vector.load %arg16[%c1_117, %c0_118, %c0_119] : memref<2x64x16xf32, #tpu.memory_space<vmem>>, vector<1x64x16xf32>
    %194 = vector.shape_cast %193 : vector<1x64x16xf32> to vector<64x16xf32>
    %cst_120 = arith.constant dense<0.000000e+00> : vector<8x16xf32>
    %195 = tpu.matmul %183, %194, %cst_120 {dimension_numbers = #tpu.dot_dimension_numbers<[1], [0], [0], [1], [0, 0, 1, 1], [], []>} : vector<8x64xf32>, vector<64x16xf32>, vector<8x16xf32> -> vector<8x16xf32>
    %196 = arith.mulf %195, %3 : vector<8x16xf32>
    %c1_121 = arith.constant 1 : index
    %c0_122 = arith.constant 0 : index
    %c0_123 = arith.constant 0 : index
    %197 = vector.load %arg17[%c1_121, %c0_122, %c0_123] : memref<2x64x16xf32, #tpu.memory_space<vmem>>, vector<1x64x16xf32>
    %198 = vector.shape_cast %197 : vector<1x64x16xf32> to vector<64x16xf32>
    %cst_124 = arith.constant dense<0.000000e+00> : vector<8x16xf32>
    %199 = tpu.matmul %183, %198, %cst_124 {dimension_numbers = #tpu.dot_dimension_numbers<[1], [0], [0], [1], [0, 0, 1, 1], [], []>} : vector<8x64xf32>, vector<64x16xf32>, vector<8x16xf32> -> vector<8x16xf32>
    %200 = arith.mulf %199, %4 : vector<8x16xf32>
    %201 = arith.addf %196, %200 : vector<8x16xf32>
    %c1_125 = arith.constant 1 : index
    %c0_126 = arith.constant 0 : index
    %c0_127 = arith.constant 0 : index
    %202 = vector.load %arg18[%c1_125, %c0_126, %c0_127] : memref<2x64x16xf32, #tpu.memory_space<vmem>>, vector<1x64x16xf32>
    %203 = vector.shape_cast %202 : vector<1x64x16xf32> to vector<64x16xf32>
    %cst_128 = arith.constant dense<0.000000e+00> : vector<8x16xf32>
    %204 = tpu.matmul %183, %203, %cst_128 {dimension_numbers = #tpu.dot_dimension_numbers<[1], [0], [0], [1], [0, 0, 1, 1], [], []>} : vector<8x64xf32>, vector<64x16xf32>, vector<8x16xf32> -> vector<8x16xf32>
    %205 = arith.mulf %192, %192 : vector<8x64xf32>
    %cst_129 = arith.constant dense<0.000000e+00> : vector<8x64xf32>
    %206 = tpu.matmul %205, %5, %cst_129 {dimension_numbers = #tpu.dot_dimension_numbers<[1], [0], [0], [1], [0, 0, 1, 1], [], []>} : vector<8x64xf32>, vector<64x64xf32>, vector<8x64xf32> -> vector<8x64xf32>
    %cst_130 = arith.constant 1.000000e-24 : f32
    %207 = vector.broadcast %cst_130 : f32 to vector<8x64xf32>
    %208 = arith.maximumf %206, %207 : vector<8x64xf32>
    %209 = math.rsqrt %208 : vector<8x64xf32>
    %210 = arith.mulf %192, %209 : vector<8x64xf32>
    %cst_131 = arith.constant 4.000000e+00 : f32
    %211 = vector.broadcast %cst_131 : f32 to vector<8x64xf32>
    %212 = arith.mulf %210, %211 : vector<8x64xf32>
    %213 = arith.mulf %201, %201 : vector<8x16xf32>
    %cst_132 = arith.constant dense<0.000000e+00> : vector<8xf32>
    %214 = vector.multi_reduction <add>, %213, %cst_132 [1] : vector<8x16xf32> to vector<8xf32>
    %215 = vector.shape_cast %214 : vector<8xf32> to vector<8x1xf32>
    %cst_133 = arith.constant 1.000000e-24 : f32
    %216 = vector.broadcast %cst_133 : f32 to vector<8x1xf32>
    %217 = arith.maximumf %215, %216 : vector<8x1xf32>
    %218 = math.rsqrt %217 : vector<8x1xf32>
    %219 = vector.broadcast %218 : vector<8x1xf32> to vector<8x16xf32>
    %220 = arith.mulf %201, %219 : vector<8x16xf32>
    %cst_134 = arith.constant 4.000000e+00 : f32
    %221 = vector.broadcast %cst_134 : f32 to vector<8x16xf32>
    %222 = arith.mulf %220, %221 : vector<8x16xf32>
    %c1_135 = arith.constant 1 : index
    %c0_136 = arith.constant 0 : index
    %c0_137 = arith.constant 0 : index
    %223 = vector.load %arg11[%c1_135, %c0_136, %c0_137] : memref<2x40x64xf32, #tpu.memory_space<vmem>>, vector<1x40x64xf32>
    %224 = vector.shape_cast %223 : vector<1x40x64xf32> to vector<40x64xf32>
    %cst_138 = arith.constant dense<0.000000e+00> : vector<40x16xf32>
    %225 = tpu.matmul %8, %222, %cst_138 {dimension_numbers = #tpu.dot_dimension_numbers<[1], [0], [0], [1], [0, 0, 1, 1], [], []>} : vector<40x8xf32>, vector<8x16xf32>, vector<40x16xf32> -> vector<40x16xf32>
    %cst_139 = arith.constant dense<0.000000e+00> : vector<40x64xf32>
    %226 = tpu.matmul %225, %7, %cst_139 {dimension_numbers = #tpu.dot_dimension_numbers<[1], [0], [0], [1], [0, 0, 1, 1], [], []>} : vector<40x16xf32>, vector<16x64xf32>, vector<40x64xf32> -> vector<40x64xf32>
    %227 = arith.mulf %226, %9 : vector<40x64xf32>
    %228 = arith.addf %224, %227 : vector<40x64xf32>
    %c1_140 = arith.constant 1 : index
    %c0_141 = arith.constant 0 : index
    %c0_142 = arith.constant 0 : index
    %229 = vector.load %arg12[%c1_140, %c0_141, %c0_142] : memref<2x40x64xf32, #tpu.memory_space<vmem>>, vector<1x40x64xf32>
    %230 = vector.shape_cast %229 : vector<1x40x64xf32> to vector<40x64xf32>
    %cst_143 = arith.constant dense<0.000000e+00> : vector<40x16xf32>
    %231 = tpu.matmul %8, %204, %cst_143 {dimension_numbers = #tpu.dot_dimension_numbers<[1], [0], [0], [1], [0, 0, 1, 1], [], []>} : vector<40x8xf32>, vector<8x16xf32>, vector<40x16xf32> -> vector<40x16xf32>
    %cst_144 = arith.constant dense<0.000000e+00> : vector<40x64xf32>
    %232 = tpu.matmul %231, %7, %cst_144 {dimension_numbers = #tpu.dot_dimension_numbers<[1], [0], [0], [1], [0, 0, 1, 1], [], []>} : vector<40x16xf32>, vector<16x64xf32>, vector<40x64xf32> -> vector<40x64xf32>
    %233 = arith.mulf %232, %9 : vector<40x64xf32>
    %234 = arith.addf %230, %233 : vector<40x64xf32>
    %cst_145 = arith.constant dense<0.000000e+00> : vector<8x40xf32>
    %235 = tpu.matmul %212, %228, %cst_145 {dimension_numbers = #tpu.dot_dimension_numbers<[1], [1], [0], [0], [0, 0, 1, 0], [], []>} : vector<8x64xf32>, vector<40x64xf32>, vector<8x40xf32> -> vector<8x40xf32>
    %236 = arith.addf %235, %10 : vector<8x40xf32>
    %cst_146 = arith.constant dense<0xFF800000> : vector<8xf32>
    %237 = vector.multi_reduction <maximumf>, %236, %cst_146 [1] : vector<8x40xf32> to vector<8xf32>
    %238 = vector.shape_cast %237 : vector<8xf32> to vector<8x1xf32>
    %239 = vector.broadcast %238 : vector<8x1xf32> to vector<8x40xf32>
    %240 = arith.subf %236, %239 : vector<8x40xf32>
    %241 = math.exp %240 : vector<8x40xf32>
    %cst_147 = arith.constant dense<0.000000e+00> : vector<8x40xf32>
    %242 = tpu.matmul %241, %6, %cst_147 {dimension_numbers = #tpu.dot_dimension_numbers<[1], [0], [0], [1], [0, 0, 1, 1], [], []>} : vector<8x40xf32>, vector<40x40xf32>, vector<8x40xf32> -> vector<8x40xf32>
    %cst_148 = arith.constant 1.000000e-30 : f32
    %243 = vector.broadcast %cst_148 : f32 to vector<8x40xf32>
    %244 = arith.addf %242, %243 : vector<8x40xf32>
    %245 = tpu.reciprocal %244 {approx = true} : vector<8x40xf32> -> vector<8x40xf32>
    %246 = arith.mulf %241, %245 : vector<8x40xf32>
    %cst_149 = arith.constant dense<0.000000e+00> : vector<8x64xf32>
    %247 = tpu.matmul %246, %234, %cst_149 {dimension_numbers = #tpu.dot_dimension_numbers<[1], [0], [0], [1], [0, 0, 1, 1], [], []>} : vector<8x40xf32>, vector<40x64xf32>, vector<8x64xf32> -> vector<8x64xf32>
    %c1_150 = arith.constant 1 : index
    %c0_151 = arith.constant 0 : index
    %c0_152 = arith.constant 0 : index
    %248 = vector.load %arg19[%c1_150, %c0_151, %c0_152] : memref<2x64x64xf32, #tpu.memory_space<vmem>>, vector<1x64x64xf32>
    %249 = vector.shape_cast %248 : vector<1x64x64xf32> to vector<64x64xf32>
    %cst_153 = arith.constant dense<0.000000e+00> : vector<8x64xf32>
    %250 = tpu.matmul %247, %249, %cst_153 {dimension_numbers = #tpu.dot_dimension_numbers<[1], [0], [0], [1], [0, 0, 1, 1], [], []>} : vector<8x64xf32>, vector<64x64xf32>, vector<8x64xf32> -> vector<8x64xf32>
    %c1_154 = arith.constant 1 : index
    %c0_155 = arith.constant 0 : index
    %c0_156 = arith.constant 0 : index
    %251 = vector.load %arg20[%c1_154, %c0_155, %c0_156] : memref<2x1x64xf32, #tpu.memory_space<vmem>>, vector<1x1x64xf32>
    %252 = vector.shape_cast %251 : vector<1x1x64xf32> to vector<1x64xf32>
    %cst_157 = arith.constant dense<0.000000e+00> : vector<8xf32>
    %253 = vector.multi_reduction <add>, %250, %cst_157 [1] : vector<8x64xf32> to vector<8xf32>
    %254 = vector.shape_cast %253 : vector<8xf32> to vector<8x1xf32>
    %cst_158 = arith.constant 6.400000e+01 : f32
    %255 = vector.broadcast %cst_158 : f32 to vector<8x1xf32>
    %256 = arith.divf %254, %255 : vector<8x1xf32>
    %257 = vector.broadcast %256 : vector<8x1xf32> to vector<8x64xf32>
    %258 = arith.subf %250, %257 : vector<8x64xf32>
    %259 = arith.mulf %258, %258 : vector<8x64xf32>
    %cst_159 = arith.constant dense<0.000000e+00> : vector<8xf32>
    %260 = vector.multi_reduction <add>, %259, %cst_159 [1] : vector<8x64xf32> to vector<8xf32>
    %261 = vector.shape_cast %260 : vector<8xf32> to vector<8x1xf32>
    %cst_160 = arith.constant 6.400000e+01 : f32
    %262 = vector.broadcast %cst_160 : f32 to vector<8x1xf32>
    %263 = arith.divf %261, %262 : vector<8x1xf32>
    %264 = vector.broadcast %256 : vector<8x1xf32> to vector<8x64xf32>
    %265 = arith.subf %250, %264 : vector<8x64xf32>
    %cst_161 = arith.constant 9.99999974E-6 : f32
    %266 = vector.broadcast %cst_161 : f32 to vector<8x1xf32>
    %267 = arith.addf %263, %266 : vector<8x1xf32>
    %268 = math.rsqrt %267 : vector<8x1xf32>
    %269 = vector.broadcast %268 : vector<8x1xf32> to vector<8x64xf32>
    %270 = arith.mulf %265, %269 : vector<8x64xf32>
    %271 = vector.broadcast %252 : vector<1x64xf32> to vector<8x64xf32>
    %272 = arith.mulf %270, %271 : vector<8x64xf32>
    %273 = arith.addf %161, %272 : vector<8x64xf32>
    %c1_162 = arith.constant 1 : index
    %c0_163 = arith.constant 0 : index
    %c0_164 = arith.constant 0 : index
    %274 = vector.load %arg21[%c1_162, %c0_163, %c0_164] : memref<2x1x64xf32, #tpu.memory_space<vmem>>, vector<1x1x64xf32>
    %275 = vector.shape_cast %274 : vector<1x1x64xf32> to vector<1x64xf32>
    %cst_165 = arith.constant dense<0.000000e+00> : vector<8xf32>
    %276 = vector.multi_reduction <add>, %273, %cst_165 [1] : vector<8x64xf32> to vector<8xf32>
    %277 = vector.shape_cast %276 : vector<8xf32> to vector<8x1xf32>
    %cst_166 = arith.constant 6.400000e+01 : f32
    %278 = vector.broadcast %cst_166 : f32 to vector<8x1xf32>
    %279 = arith.divf %277, %278 : vector<8x1xf32>
    %280 = vector.broadcast %279 : vector<8x1xf32> to vector<8x64xf32>
    %281 = arith.subf %273, %280 : vector<8x64xf32>
    %282 = arith.mulf %281, %281 : vector<8x64xf32>
    %cst_167 = arith.constant dense<0.000000e+00> : vector<8xf32>
    %283 = vector.multi_reduction <add>, %282, %cst_167 [1] : vector<8x64xf32> to vector<8xf32>
    %284 = vector.shape_cast %283 : vector<8xf32> to vector<8x1xf32>
    %cst_168 = arith.constant 6.400000e+01 : f32
    %285 = vector.broadcast %cst_168 : f32 to vector<8x1xf32>
    %286 = arith.divf %284, %285 : vector<8x1xf32>
    %287 = vector.broadcast %279 : vector<8x1xf32> to vector<8x64xf32>
    %288 = arith.subf %273, %287 : vector<8x64xf32>
    %cst_169 = arith.constant 9.99999974E-6 : f32
    %289 = vector.broadcast %cst_169 : f32 to vector<8x1xf32>
    %290 = arith.addf %286, %289 : vector<8x1xf32>
    %291 = math.rsqrt %290 : vector<8x1xf32>
    %292 = vector.broadcast %291 : vector<8x1xf32> to vector<8x64xf32>
    %293 = arith.mulf %288, %292 : vector<8x64xf32>
    %294 = vector.broadcast %275 : vector<1x64xf32> to vector<8x64xf32>
    %295 = arith.mulf %293, %294 : vector<8x64xf32>
    %c1_170 = arith.constant 1 : index
    %c0_171 = arith.constant 0 : index
    %c0_172 = arith.constant 0 : index
    %296 = vector.load %arg22[%c1_170, %c0_171, %c0_172] : memref<2x64x256xf32, #tpu.memory_space<vmem>>, vector<1x64x256xf32>
    %297 = vector.shape_cast %296 : vector<1x64x256xf32> to vector<64x256xf32>
    %cst_173 = arith.constant dense<0.000000e+00> : vector<8x256xf32>
    %298 = tpu.matmul %295, %297, %cst_173 {dimension_numbers = #tpu.dot_dimension_numbers<[1], [0], [0], [1], [0, 0, 1, 1], [], []>} : vector<8x64xf32>, vector<64x256xf32>, vector<8x256xf32> -> vector<8x256xf32>
    %c1_174 = arith.constant 1 : index
    %c0_175 = arith.constant 0 : index
    %c0_176 = arith.constant 0 : index
    %299 = vector.load %arg23[%c1_174, %c0_175, %c0_176] : memref<2x64x256xf32, #tpu.memory_space<vmem>>, vector<1x64x256xf32>
    %300 = vector.shape_cast %299 : vector<1x64x256xf32> to vector<64x256xf32>
    %cst_177 = arith.constant dense<0.000000e+00> : vector<8x256xf32>
    %301 = tpu.matmul %295, %300, %cst_177 {dimension_numbers = #tpu.dot_dimension_numbers<[1], [0], [0], [1], [0, 0, 1, 1], [], []>} : vector<8x64xf32>, vector<64x256xf32>, vector<8x256xf32> -> vector<8x256xf32>
    %302 = arith.negf %301 : vector<8x256xf32>
    %303 = math.exp %302 : vector<8x256xf32>
    %cst_178 = arith.constant 1.000000e+00 : f32
    %304 = vector.broadcast %cst_178 : f32 to vector<8x256xf32>
    %305 = arith.addf %304, %303 : vector<8x256xf32>
    %306 = arith.divf %304, %305 : vector<8x256xf32>
    %307 = arith.mulf %301, %306 : vector<8x256xf32>
    %308 = arith.mulf %298, %307 : vector<8x256xf32>
    %c1_179 = arith.constant 1 : index
    %c0_180 = arith.constant 0 : index
    %c0_181 = arith.constant 0 : index
    %309 = vector.load %arg24[%c1_179, %c0_180, %c0_181] : memref<2x256x64xf32, #tpu.memory_space<vmem>>, vector<1x256x64xf32>
    %310 = vector.shape_cast %309 : vector<1x256x64xf32> to vector<256x64xf32>
    %cst_182 = arith.constant dense<0.000000e+00> : vector<8x64xf32>
    %311 = tpu.matmul %308, %310, %cst_182 {dimension_numbers = #tpu.dot_dimension_numbers<[1], [0], [0], [1], [0, 0, 1, 1], [], []>} : vector<8x256xf32>, vector<256x64xf32>, vector<8x64xf32> -> vector<8x64xf32>
    %312 = arith.addf %273, %311 : vector<8x64xf32>
    %c0_183 = arith.constant 0 : index
    %c0_184 = arith.constant 0 : index
    %313 = vector.load %arg25[%c0_183, %c0_184] : memref<1x64xf32, #tpu.memory_space<vmem>>, vector<1x64xf32>
    %cst_185 = arith.constant dense<0.000000e+00> : vector<8xf32>
    %314 = vector.multi_reduction <add>, %312, %cst_185 [1] : vector<8x64xf32> to vector<8xf32>
    %315 = vector.shape_cast %314 : vector<8xf32> to vector<8x1xf32>
    %cst_186 = arith.constant 6.400000e+01 : f32
    %316 = vector.broadcast %cst_186 : f32 to vector<8x1xf32>
    %317 = arith.divf %315, %316 : vector<8x1xf32>
    %318 = vector.broadcast %317 : vector<8x1xf32> to vector<8x64xf32>
    %319 = arith.subf %312, %318 : vector<8x64xf32>
    %320 = arith.mulf %319, %319 : vector<8x64xf32>
    %cst_187 = arith.constant dense<0.000000e+00> : vector<8xf32>
    %321 = vector.multi_reduction <add>, %320, %cst_187 [1] : vector<8x64xf32> to vector<8xf32>
    %322 = vector.shape_cast %321 : vector<8xf32> to vector<8x1xf32>
    %cst_188 = arith.constant 6.400000e+01 : f32
    %323 = vector.broadcast %cst_188 : f32 to vector<8x1xf32>
    %324 = arith.divf %322, %323 : vector<8x1xf32>
    %325 = vector.broadcast %317 : vector<8x1xf32> to vector<8x64xf32>
    %326 = arith.subf %312, %325 : vector<8x64xf32>
    %cst_189 = arith.constant 9.99999974E-6 : f32
    %327 = vector.broadcast %cst_189 : f32 to vector<8x1xf32>
    %328 = arith.addf %324, %327 : vector<8x1xf32>
    %329 = math.rsqrt %328 : vector<8x1xf32>
    %330 = vector.broadcast %329 : vector<8x1xf32> to vector<8x64xf32>
    %331 = arith.mulf %326, %330 : vector<8x64xf32>
    %332 = vector.broadcast %313 : vector<1x64xf32> to vector<8x64xf32>
    %333 = arith.mulf %331, %332 : vector<8x64xf32>
    %c0_190 = arith.constant 0 : index
    %c0_191 = arith.constant 0 : index
    %334 = vector.load %arg26[%c0_190, %c0_191] : memref<64x64xf32, #tpu.memory_space<vmem>>, vector<64x64xf32>
    %cst_192 = arith.constant dense<0.000000e+00> : vector<8x64xf32>
    %335 = tpu.matmul %333, %334, %cst_192 {dimension_numbers = #tpu.dot_dimension_numbers<[1], [0], [0], [1], [0, 0, 1, 1], [], []>} : vector<8x64xf32>, vector<64x64xf32>, vector<8x64xf32> -> vector<8x64xf32>
    %c0_193 = arith.constant 0 : index
    %c0_194 = arith.constant 0 : index
    %336 = vector.load %arg27[%c0_193, %c0_194] : memref<8x64xf32, #tpu.memory_space<vmem>>, vector<8x64xf32>
    tpu.vector_store %arg27[%c0_193, %c0_194], %335 {strides = array<i32>} : memref<8x64xf32, #tpu.memory_space<vmem>>, vector<8x64xf32>,
    return
  }
}

</mosaic_0001>

<bundles_post_ra>
// kernel: tpu_custom_call.1
= control target key start
LH: loop header
LB: loop body
LE: loop exit
PB: predicated region body
PF: predicated region fallthrough
CT: control target
= control target key end

     0   :  { %s6906_s0 = inlined_call_operand.vmem [shape: f32[8,64], index: 0, kind: input, shape index: {}]   ;;  %s6907_s1 = inlined_call_operand.hbm [shape: f32[8,64], index: 1, kind: input, shape index: {}]   ;;  %s6908_s2 = inlined_call_operand.hbm [shape: f32[8,64], index: 2, kind: input, shape index: {}]   ;;  %s6909_s3 = inlined_call_operand.hbm [shape: f32[8,16], index: 3, kind: input, shape index: {}]   ;;  %s6910_s4 = inlined_call_operand.hbm [shape: f32[8,16], index: 4, kind: input, shape index: {}]   ;;  %s6911_s5 = inlined_call_operand.hbm [shape: f32[64,64], index: 5, kind: input, shape index: {}]   ;;  %s6912_s6 = inlined_call_operand.hbm [shape: f32[40,40], index: 6, kind: input, shape index: {}]   ;;  %s6913_s7 = inlined_call_operand.hbm [shape: f32[16,64], index: 7, kind: input, shape index: {}]   ;;  %s6914_s8 = inlined_call_operand.vmem [shape: f32[40,8], index: 8, kind: input, shape index: {}]   ;;  %s6915_s9 = inlined_call_operand.hbm [shape: f32[40,64], index: 9, kind: input, shape index: {}]   ;;  %s6916_s10 = inlined_call_operand.hbm [shape: f32[8,40], index: 10, kind: input, shape index: {}]   ;;  %s6917_s11 = inlined_call_operand.vmem [shape: f32[2,40,64], index: 11, kind: input, shape index: {}]   ;;  %s6918_s12 = inlined_call_operand.vmem [shape: f32[2,40,64], index: 12, kind: input, shape index: {}]   ;;  %s6919_s13 = inlined_call_operand.vmem [shape: f32[2,1,64], index: 13, kind: input, shape index: {}]   ;;  %s6920_s14 = inlined_call_operand.vmem [shape: f32[2,64,64], index: 14, kind: input, shape index: {}]   ;;  %s6921_s15 = inlined_call_operand.vmem [shape: f32[2,64,64], index: 15, kind: input, shape index: {}]   ;;  %s6922_s16 = inlined_call_operand.vmem [shape: f32[2,64,16], index: 16, kind: input, shape index: {}]   ;;  %s6923_s17 = inlined_call_operand.vmem [shape: f32[2,64,16], index: 17, kind: input, shape index: {}]   ;;  %s6924_s18 = inlined_call_operand.vmem [shape: f32[2,64,16], index: 18, kind: input, shape index: {}]   ;;  %s6925_s19 = inlined_call_operand.vmem [shape: f32[2,64,64], index: 19, kind: input, shape index: {}]   ;;  %s6926_s20 = inlined_call_operand.hbm [shape: f32[2,1,64], index: 20, kind: input, shape index: {}]   ;;  %s6927_s21 = inlined_call_operand.hbm [shape: f32[2,1,64], index: 21, kind: input, shape index: {}]   ;;  %s6928_s22 = inlined_call_operand.vmem [shape: f32[2,64,256], index: 22, kind: input, shape index: {}]   ;;  %s6929_s23 = inlined_call_operand.vmem [shape: f32[2,64,256], index: 23, kind: input, shape index: {}]   ;;  %s6930_s24 = inlined_call_operand.vmem [shape: f32[2,256,64], index: 24, kind: input, shape index: {}]   ;;  %s6931_s25 = inlined_call_operand.hbm [shape: f32[1,64], index: 25, kind: input, shape index: {}]   ;;  %s6932_s26 = inlined_call_operand.vmem [shape: f32[64,64], index: 26, kind: input, shape index: {}]   ;;  %s6933_s27 = inlined_call_operand.hbm [shape: f32[8,64], index: 27, kind: output, shape index: {}]  }
   0x1   :  { %6953 = sst [smem:[#allocation31_spill]] %s6906_s0 }
   0x2   :  { %6954 = sst [smem:[#allocation32_spill]] %s6907_s1 }
   0x3   :  { %6955 = sst [smem:[#allocation33_spill]] %s6908_s2 }
   0x4   :  { %6956 = sst [smem:[#allocation34_spill]] %s6909_s3 }
   0x5   :  { %6957 = sst [smem:[#allocation35_spill]] %s6910_s4 }
   0x6   :  { %6958 = sst [smem:[#allocation36_spill]] %s6911_s5 }
   0x7   :  { %6959 = sst [smem:[#allocation37_spill]] %s6912_s6 }
   0x8   :  { %6960 = sst [smem:[#allocation38_spill]] %s6913_s7 }
   0x9   :  { %6961 = sst [smem:[#allocation39_spill]] %s6914_s8 }
   0xa   :  { %6962 = sst [smem:[#allocation40_spill]] %s6915_s9 }
   0xb   :  { %6963 = sst [smem:[#allocation41_spill]] %s6916_s10 }
   0xc   :  { %6964 = sst [smem:[#allocation42_spill]] %s6917_s11 }
   0xd   :  { %6965 = sst [smem:[#allocation43_spill]] %s6932_s26 }
   0xe   :  { %6966 = sst [smem:[#allocation44_spill]] %s6933_s27 }
   0xf   :  { %32 = vsyncpa [#allocation3], 0 }
  0x10   :  { %33 = vsyncpa [#allocation6], 0 }
  0x11   :  { %34 = vsyncpa [#allocation9], 0 }
  0x12   :  { %35 = vsyncpa [#allocation12], 0 }
  0x13   :  { %36 = vsyncpa [#allocation15], 0 }
  0x14   :  { %37 = vsyncpa [#allocation18], 0 }
  0x15   :  { %38 = vsyncpa [#allocation21], 0 }
  0x16   :  { %39 = vsyncpa [#allocation4], 0  ;;  %s5355_s7 = smov [#allocation5]   ;;  %s5356_s8 = smov [#allocation8]  }
  0x17   :  { %s58_s4 = sshll.u32 %s5355_s7, 4  ;;  %s78_s30 = sshll.u32 %s5356_s8, 4  ;;  %s59_s4 = int_to_ptr.vmem [resolvable:$true] %s58_s4  ;;  %s79_s30 = int_to_ptr.vmem [resolvable:$true] %s78_s30 }
  0x18   :  { %s6967_s28 = sld [smem:[#allocation33_spill]] }
  0x1e   :  { %s5053_s0 = scalar_lea.hbm %s6967_s28, 128 }
  0x1f   :  { %p5054_p0 = scmp.ne.s32.totalorder %s6967_s28, %s5053_s0  ;;  %p5057_p1 = scmp.lt.u32.totalorder %s5053_s0, %s6967_s28 }
  0x21   :  { %p5059_p2 = pnand %p5057_p1, %p5054_p0 }
  0x23   :  { %5062 = shalt.err (!%p5059_p2)
}
  0x24   :  { %s5063_s11 = scalar_lea.vmem %s59_s4, 128  ;;  %p5068_p4 = scmp.lt.s32.totalorder %s59_s4, %s59_s4 }
  0x25   :  { %p5064_p3 = scmp.ne.s32.totalorder %s59_s4, %s5063_s11  ;;  %p5069_p5 = scmp.lt.s32.totalorder %s5063_s11, %s5063_s11 }
  0x27   :  { %p5070_p6 = por %p5069_p5, %p5068_p4 }
  0x29   :  { %p5071_p7 = pnand %p5070_p6, %p5064_p3 }
  0x2b   :  { %5074 = shalt.err (!%p5071_p7)
}
  0x2c   :  { %61 = dma.hbm_to_vmem [thread:$0]  %s6967_s28, 128, %s59_s4, [#allocation6]  }
  0x2d   :  { %s6968_s9 = sld [smem:[#allocation35_spill]] }
  0x33   :  { %s5075_s5 = scalar_lea.hbm %s6968_s9, 128 }
  0x34   :  { %p5076_p8 = scmp.ne.s32.totalorder %s6968_s9, %s5075_s5  ;;  %p5079_p9 = scmp.lt.u32.totalorder %s5075_s5, %s6968_s9 }
  0x36   :  { %p5081_p10 = pnand %p5079_p9, %p5076_p8 }
  0x38   :  { %5084 = shalt.err (!%p5081_p10)
}
  0x39   :  { %s5085_s6 = scalar_lea.vmem %s79_s30, 128  ;;  %p5090_p12 = scmp.lt.s32.totalorder %s79_s30, %s79_s30 }
  0x3a   :  { %p5086_p11 = scmp.ne.s32.totalorder %s79_s30, %s5085_s6  ;;  %p5091_p13 = scmp.lt.s32.totalorder %s5085_s6, %s5085_s6 }
  0x3c   :  { %p5092_p0 = por %p5091_p13, %p5090_p12 }
  0x3e   :  { %p5093_p1 = pnand %p5092_p0, %p5086_p11 }
  0x40   :  { %5096 = shalt.err (!%p5093_p1)
}
  0x41   :  { %81 = dma.hbm_to_vmem [thread:$0]  %s6968_s9, 128, %s79_s30, [#allocation9]  }
  0x42   :  { %s5357_s11 = smov [#allocation11]   ;;  %s5358_s3 = smov [#allocation14]  }
  0x43   :  { %s99_s2 = sshll.u32 %s5357_s11, 4  ;;  %s125_s7 = sshll.u32 %s5358_s3, 4  ;;  %s100_s2 = int_to_ptr.vmem [resolvable:$true] %s99_s2  ;;  %s5539_s7 = int_to_ptr.vmem [resolvable:$true] %s125_s7 }
  0x44   :  { %s6969_s10 = sld [smem:[#allocation37_spill]] }
  0x4a   :  { %s5097_s29 = scalar_lea.hbm %s6969_s10, 640 }
  0x4b   :  { %p5098_p2 = scmp.ne.s32.totalorder %s6969_s10, %s5097_s29  ;;  %p5101_p3 = scmp.lt.u32.totalorder %s5097_s29, %s6969_s10 }
  0x4d   :  { %p5103_p4 = pnand %p5101_p3, %p5098_p2 }
  0x4f   :  { %5106 = shalt.err (!%p5103_p4)
}
  0x50   :  { %s5107_s30 = scalar_lea.vmem %s100_s2, 640  ;;  %p5112_p6 = scmp.lt.s32.totalorder %s100_s2, %s100_s2 }
  0x51   :  { %p5108_p5 = scmp.ne.s32.totalorder %s100_s2, %s5107_s30  ;;  %p5113_p7 = scmp.lt.s32.totalorder %s5107_s30, %s5107_s30 }
  0x53   :  { %p5114_p8 = por %p5113_p7, %p5112_p6 }
  0x55   :  { %p5115_p9 = pnand %p5114_p8, %p5108_p5 }
  0x57   :  { %5118 = shalt.err (!%p5115_p9)
}
  0x58   :  { %s6946_s9 = smov 128   ;;  %s6948_s4 = smov 8  }
  0x59   :  { %105 = dma.hbm_to_vmem [thread:$0]  %s6969_s10, 640, %s100_s2, [#allocation12], %s6946_s9, %s6946_s9, %s6948_s4  }
  0x5a   :  { %s6970_s8 = sld [smem:[#allocation40_spill]] }
  0x60   :  { %s5119_s5 = scalar_lea.hbm %s6970_s8, 640 }
  0x61   :  { %p5120_p10 = scmp.ne.s32.totalorder %s6970_s8, %s5119_s5  ;;  %p5123_p11 = scmp.lt.u32.totalorder %s5119_s5, %s6970_s8 }
  0x63   :  { %p5125_p12 = pnand %p5123_p11, %p5120_p10 }
  0x65   :  { %5128 = shalt.err (!%p5125_p12)
}
  0x66   :  { %s5129_s30 = scalar_lea.vmem %s5539_s7, 640  ;;  %p5134_p0 = scmp.lt.s32.totalorder %s5539_s7, %s5539_s7 }
  0x67   :  { %p5130_p13 = scmp.ne.s32.totalorder %s5539_s7, %s5129_s30  ;;  %p5135_p1 = scmp.lt.s32.totalorder %s5129_s30, %s5129_s30 }
  0x69   :  { %p5136_p2 = por %p5135_p1, %p5134_p0 }
  0x6b   :  { %p5137_p3 = pnand %p5136_p2, %p5130_p13 }
  0x6d   :  { %5140 = shalt.err (!%p5137_p3)
}
  0x6e   :  { %131 = dma.hbm_to_vmem [thread:$0]  %s6970_s8, 640, %s5539_s7, [#allocation15], %s6946_s9, %s6946_s9, %s6948_s4  }
  0x6f   :  { %s5361_s28 = smov [#allocation17]   ;;  %s5141_s5 = scalar_lea.hbm %s6926_s20, 32 }
  0x70   :  { %s165_s11 = sshll.u32 %s5361_s28, 4  ;;  %p5142_p4 = scmp.ne.s32.totalorder %s6926_s20, %s5141_s5  ;;  %s166_s11 = int_to_ptr.vmem [resolvable:$true] %s165_s11 }
  0x71   :  { %p5145_p5 = scmp.lt.u32.totalorder %s5141_s5, %s6926_s20 }
  0x73   :  { %p5147_p6 = pnand %p5145_p5, %p5142_p4 }
  0x75   :  { %5150 = shalt.err (!%p5147_p6)
}
  0x76   :  { %s5151_s30 = scalar_lea.vmem %s166_s11, 32  ;;  %p5156_p8 = scmp.lt.s32.totalorder %s166_s11, %s166_s11 }
  0x77   :  { %p5152_p7 = scmp.ne.s32.totalorder %s166_s11, %s5151_s30  ;;  %p5157_p9 = scmp.lt.s32.totalorder %s5151_s30, %s5151_s30 }
  0x79   :  { %p5158_p10 = por %p5157_p9, %p5156_p8 }
  0x7b   :  { %p5159_p11 = pnand %p5158_p10, %p5152_p7 }
  0x7d   :  { %5162 = shalt.err (!%p5159_p11)
}
  0x7e   :  { %s6951_s7 = smov 16   ;;  %s6952_s8 = smov 1  }
  0x7f   :  { %171 = dma.hbm_to_vmem [thread:$0]  %s6926_s20, 32, %s166_s11, [#allocation18], %s6951_s7, %s6951_s7, %s6952_s8  }
  0x80   :  { %s5364_s28 = smov [#allocation2]   ;;  %s5365_s3 = smov [#allocation7]  }
  0x81   :  { %s48_s27 = sshll.u32 %s5364_s28, 4  ;;  %s68_s5 = sshll.u32 %s5365_s3, 4  ;;  %s49_s27 = int_to_ptr.vmem [resolvable:$true] %s48_s27  ;;  %s69_s5 = int_to_ptr.vmem [resolvable:$true] %s68_s5 }
  0x82   :  { %s6971_s1 = sld [smem:[#allocation32_spill]] }
  0x88   :  { %s5163_s6 = scalar_lea.hbm %s6971_s1, 128 }
  0x89   :  { %p5164_p12 = scmp.ne.s32.totalorder %s6971_s1, %s5163_s6  ;;  %p5167_p13 = scmp.lt.u32.totalorder %s5163_s6, %s6971_s1 }
  0x8b   :  { %p5169_p0 = pnand %p5167_p13, %p5164_p12 }
  0x8d   :  { %5172 = shalt.err (!%p5169_p0)
}
  0x8e   :  { %s5173_s20 = scalar_lea.vmem %s49_s27, 128  ;;  %p5178_p2 = scmp.lt.s32.totalorder %s49_s27, %s49_s27 }
  0x8f   :  { %p5174_p1 = scmp.ne.s32.totalorder %s49_s27, %s5173_s20  ;;  %p5179_p3 = scmp.lt.s32.totalorder %s5173_s20, %s5173_s20 }
  0x91   :  { %p5180_p4 = por %p5179_p3, %p5178_p2 }
  0x93   :  { %p5181_p5 = pnand %p5180_p4, %p5174_p1 }
  0x95   :  { %5184 = shalt.err (!%p5181_p5)
}
  0x96   :  { %51 = dma.hbm_to_vmem [thread:$0]  %s6971_s1, 128, %s49_s27, [#allocation3]  }
  0x97   :  { %s6972_s28 = sld [smem:[#allocation34_spill]] }
  0x9d   :  { %s5185_s3 = scalar_lea.hbm %s6972_s28, 128 }
  0x9e   :  { %p5186_p6 = scmp.ne.s32.totalorder %s6972_s28, %s5185_s3  ;;  %p5189_p7 = scmp.lt.u32.totalorder %s5185_s3, %s6972_s28 }
  0xa0   :  { %p5191_p8 = pnand %p5189_p7, %p5186_p6 }
  0xa2   :  { %5194 = shalt.err (!%p5191_p8)
}
  0xa3   :  { %s5195_s6 = scalar_lea.vmem %s69_s5, 128  ;;  %p5200_p10 = scmp.lt.s32.totalorder %s69_s5, %s69_s5 }
  0xa4   :  { %p5196_p9 = scmp.ne.s32.totalorder %s69_s5, %s5195_s6  ;;  %p5201_p11 = scmp.lt.s32.totalorder %s5195_s6, %s5195_s6 }
  0xa6   :  { %p5202_p12 = por %p5201_p11, %p5200_p10 }
  0xa8   :  { %p5203_p13 = pnand %p5202_p12, %p5196_p9 }
  0xaa   :  { %5206 = shalt.err (!%p5203_p13)
}
  0xab   :  { %71 = dma.hbm_to_vmem [thread:$0]  %s6972_s28, 128, %s69_s5, [#allocation6]  }
  0xac   :  { %s5366_s30 = smov [#allocation10]   ;;  %s5367_s11 = smov [#allocation13]  }
  0xad   :  { %s87_s20 = sshll.u32 %s5366_s30, 4  ;;  %s111_s2 = sshll.u32 %s5367_s11, 4  ;;  %s88_s20 = int_to_ptr.vmem [resolvable:$true] %s87_s20  ;;  %s112_s2 = int_to_ptr.vmem [resolvable:$true] %s111_s2 }
  0xae   :  { %s6973_s3 = sld [smem:[#allocation36_spill]] }
  0xb4   :  { %s5207_s26 = scalar_lea.hbm %s6973_s3, 1024 }
  0xb5   :  { %p5208_p0 = scmp.ne.s32.totalorder %s6973_s3, %s5207_s26  ;;  %p5211_p1 = scmp.lt.u32.totalorder %s5207_s26, %s6973_s3 }
  0xb7   :  { %p5213_p2 = pnand %p5211_p1, %p5208_p0 }
  0xb9   :  { %5216 = shalt.err (!%p5213_p2)
}
  0xba   :  { %s5217_s5 = scalar_lea.vmem %s88_s20, 1024  ;;  %p5222_p4 = scmp.lt.s32.totalorder %s88_s20, %s88_s20 }
  0xbb   :  { %p5218_p3 = scmp.ne.s32.totalorder %s88_s20, %s5217_s5  ;;  %p5223_p5 = scmp.lt.s32.totalorder %s5217_s5, %s5217_s5 }
  0xbd   :  { %p5224_p6 = por %p5223_p5, %p5222_p4 }
  0xbf   :  { %p5225_p7 = pnand %p5224_p6, %p5218_p3 }
  0xc1   :  { %5228 = shalt.err (!%p5225_p7)
}
  0xc2   :  { %s6974_s28 = smov 8   ;;  %s6975_s27 = smov 128  }
  0xc3   :  { %93 = dma.hbm_to_vmem [thread:$0]  %s6973_s3, 1024, %s88_s20, [#allocation9], %s6975_s27, %s6975_s27, %s6974_s28  }
  0xc4   :  { %s6976_s10 = sld [smem:[#allocation38_spill]] }
  0xca   :  { %s5229_s26 = scalar_lea.hbm %s6976_s10, 256 }
  0xcb   :  { %p5230_p8 = scmp.ne.s32.totalorder %s6976_s10, %s5229_s26  ;;  %p5233_p9 = scmp.lt.u32.totalorder %s5229_s26, %s6976_s10 }
  0xcd   :  { %p5235_p10 = pnand %p5233_p9, %p5230_p8 }
  0xcf   :  { %5238 = shalt.err (!%p5235_p10)
}
  0xd0   :  { %s5239_s5 = scalar_lea.vmem %s112_s2, 256  ;;  %p5244_p12 = scmp.lt.s32.totalorder %s112_s2, %s112_s2 }
  0xd1   :  { %p5240_p11 = scmp.ne.s32.totalorder %s112_s2, %s5239_s5  ;;  %p5245_p13 = scmp.lt.s32.totalorder %s5239_s5, %s5239_s5 }
  0xd3   :  { %p5246_p0 = por %p5245_p13, %p5244_p12 }
  0xd5   :  { %p5247_p1 = pnand %p5246_p0, %p5240_p11 }
  0xd7   :  { %5250 = shalt.err (!%p5247_p1)
}
  0xd8   :  { %117 = dma.hbm_to_vmem [thread:$0]  %s6976_s10, 256, %s112_s2, [#allocation12], %s6975_s27, %s6975_s27, %s6974_s28  }
  0xd9   :  { %s5368_s1 = smov [#allocation16]   ;;  %s5369_s11 = smov [#allocation19]  }
  0xda   :  { %s138_s30 = sshll.u32 %s5368_s1, 4  ;;  %s177_s9 = sshll.u32 %s5369_s11, 4  ;;  %s139_s30 = int_to_ptr.vmem [resolvable:$true] %s138_s30  ;;  %s178_s9 = int_to_ptr.vmem [resolvable:$true] %s177_s9 }
  0xdb   :  { %s6977_s29 = sld [smem:[#allocation41_spill]] }
  0xe1   :  { %s5251_s0 = scalar_lea.hbm %s6977_s29, 128 }
  0xe2   :  { %p5252_p2 = scmp.ne.s32.totalorder %s6977_s29, %s5251_s0  ;;  %p5255_p3 = scmp.lt.u32.totalorder %s5251_s0, %s6977_s29 }
  0xe4   :  { %p5257_p4 = pnand %p5255_p3, %p5252_p2 }
  0xe6   :  { %5260 = shalt.err (!%p5257_p4)
}
  0xe7   :  { %s5261_s2 = scalar_lea.vmem %s139_s30, 128  ;;  %p5266_p6 = scmp.lt.s32.totalorder %s139_s30, %s139_s30 }
  0xe8   :  { %p5262_p5 = scmp.ne.s32.totalorder %s139_s30, %s5261_s2  ;;  %p5267_p7 = scmp.lt.s32.totalorder %s5261_s2, %s5261_s2 }
  0xea   :  { %p5268_p8 = por %p5267_p7, %p5266_p6 }
  0xec   :  { %p5269_p9 = pnand %p5268_p8, %p5262_p5 }
  0xee   :  { %5272 = shalt.err (!%p5269_p9)
}
  0xef   :  { %141 = dma.hbm_to_vmem [thread:$0]  %s6977_s29, 128, %s139_s30, [#allocation15]  }
  0xf0   :  { %s5273_s3 = scalar_lea.hbm %s6927_s21, 32 }
  0xf1   :  { %p5274_p10 = scmp.ne.s32.totalorder %s6927_s21, %s5273_s3  ;;  %p5277_p11 = scmp.lt.u32.totalorder %s5273_s3, %s6927_s21 }
  0xf3   :  { %p5279_p12 = pnand %p5277_p11, %p5274_p10 }
  0xf5   :  { %5282 = shalt.err (!%p5279_p12)
}
  0xf6   :  { %s5283_s26 = scalar_lea.vmem %s178_s9, 32  ;;  %p5288_p0 = scmp.lt.s32.totalorder %s178_s9, %s178_s9 }
  0xf7   :  { %p5284_p13 = scmp.ne.s32.totalorder %s178_s9, %s5283_s26  ;;  %p5289_p1 = scmp.lt.s32.totalorder %s5283_s26, %s5283_s26 }
  0xf9   :  { %p5290_p2 = por %p5289_p1, %p5288_p0 }
  0xfb   :  { %p5291_p3 = pnand %p5290_p2, %p5284_p13 }
  0xfd   :  { %5294 = shalt.err (!%p5291_p3)
}
  0xfe   :  { %s6978_s30 = smov 1   ;;  %s6979_s4 = smov 16  }
  0xff   :  { %183 = dma.hbm_to_vmem [thread:$0]  %s6927_s21, 32, %s178_s9, [#allocation18], %s6979_s4, %s6979_s4, %s6978_s30  }
 0x100   :  { %s5370_s6 = smov [#allocation20]   ;;  %s5295_s27 = scalar_lea.hbm %s6931_s25, 16 }
 0x101   :  { %s196_s5 = sshll.u32 %s5370_s6, 4  ;;  %p5296_p4 = scmp.ne.s32.totalorder %s6931_s25, %s5295_s27  ;;  %s197_s5 = int_to_ptr.vmem [resolvable:$true] %s196_s5 }
 0x102   :  { %p5299_p5 = scmp.lt.u32.totalorder %s5295_s27, %s6931_s25 }
 0x104   :  { %p5301_p6 = pnand %p5299_p5, %p5296_p4 }
 0x106   :  { %5304 = shalt.err (!%p5301_p6)
}
 0x107   :  { %s5305_s8 = scalar_lea.vmem %s197_s5, 16  ;;  %s5309_s21 = scalar_lea.vmem %s197_s5, 32 }
 0x108   :  { %p5306_p7 = scmp.ne.s32.totalorder %s197_s5, %s5305_s8  ;;  %p5310_p8 = scmp.lt.s32.totalorder %s197_s5, %s197_s5 }
 0x109   :  { %p5311_p9 = scmp.lt.s32.totalorder %s5309_s21, %s5305_s8 }
 0x10b   :  { %p5312_p10 = por %p5311_p9, %p5310_p8 }
 0x10d   :  { %p5313_p11 = pnand %p5312_p10, %p5306_p7 }
 0x10f   :  { %5316 = shalt.err (!%p5313_p11)
}
 0x110   :  { %199 = dma.hbm_to_vmem [thread:$0]  %s6931_s25, 16, %s197_s5, [#allocation21]  }
 0x111   :  { %5339 = dma.done.wait [#allocation3], 128  }
 0x112   :  { %5340 = vsyncadd [#allocation3], 4294967168 }
 0x113   :  { %5341 = dma.done.wait [#allocation6], 256  }
 0x114   :  { %5342 = vsyncadd [#allocation6], 4294967040 }
 0x115   :  { %5343 = dma.done.wait [#allocation9], 1152  }
 0x116   :  { %5344 = vsyncadd [#allocation9], 4294966144 }
 0x117   :  { %5345 = dma.done.wait [#allocation12], 896  }
 0x118   :  { %5346 = vsyncadd [#allocation12], 4294966400 }
 0x119   :  { %5347 = dma.done.wait [#allocation15], 768  }
 0x11a   :  { %5348 = vsyncadd [#allocation15], 4294966528 }
 0x11b   :  { %5349 = dma.done.wait [#allocation18], 64  }
 0x11c   :  { %5350 = vsyncadd [#allocation18], 4294967232 }
 0x11d   :  { %5351 = dma.done.wait [#allocation21], 16  }
 0x11e   :  { %5352 = vsyncadd [#allocation21], 4294967280  ;;  %vm270_vm0 = vcmask 523264   ;;  %s6980_s30 = sld [smem:[#allocation31_spill]]  ;;  %v292_v7 = vld [vmem:[%s6920_s14] sm:$0xff]  ;;  %v293_v8 = vld [vmem:[%s6920_s14 + $0x8] sm:$0xff] }
 0x11f   :  { %v374_v9 = vld [vmem:[%s6921_s15] sm:$0xff]  ;;  %v4613_v10 = vpack.c.bf16 %v293_v8, %v292_v7  ;;  %v375_v11 = vld [vmem:[%s6921_s15 + $0x8] sm:$0xff]  ;;  %v5371_v12 = vmov 0.0|0.0   ;;  %v294_v14 = vld [vmem:[%s6920_s14 + $0x10] sm:$0xff]  ;;  %vm5372_vm1 = vmmov 0   ;;  %v5373_v32 = vmov 0.0  }
 0x120   :  { %4612 = vmatprep.subr.bf16.mxu0 %v5371_v12  ;;  %4624 = vmatprep.subr.bf16.mxu1 %v5371_v12  ;;  %v4625_v13 = vpack.c.bf16 %v375_v11, %v374_v9  ;;  %v295_v15 = vld [vmem:[%s6920_s14 + $0x18] sm:$0xff]  ;;  %v376_v16 = vld [vmem:[%s6921_s15 + $0x10] sm:$0xff]  ;;  %v296_v20 = vld [vmem:[%s6920_s14 + $0x20] sm:$0xff]  ;;  %vm770_vm2 = vcmask 130048   ;;  %s6981_s6 = sld [smem:[#allocation39_spill]]  ;;  %vm783_vm3 = vcmask 64512  }
 0x121   :  { %4614 = vmatpush3.bf16.msra.mxu0 %v4613_v10  ;;  %v4616_v17 = vpack.c.bf16 %v295_v15, %v294_v14  ;;  %v377_v18 = vld [vmem:[%s6921_s15 + $0x18] sm:$0xff]  ;;  %v297_v21 = vld [vmem:[%s6920_s14 + $0x28] sm:$0xff]  ;;  %v378_v22 = vld [vmem:[%s6921_s15 + $0x20] sm:$0xff]  ;;  %4121 = vmatprep.mubr.msk.f32.mxu0 %vm5372_vm1, %v5373_v32  ;;  %s6982_s9 = sld [smem:[#allocation42_spill]]  ;;  %vm1302_vm5 = vcmask 326656   ;;  %s6985_s26 = sld [smem:[#allocation43_spill]] }
 0x122   :  { %4626 = vmatpush3.bf16.msra.mxu1 %v4625_v13  ;;  %4615 = vmatprep.subr.bf16.mxu0 %v5371_v12  ;;  %v4628_v19 = vpack.c.bf16 %v377_v18, %v376_v16  ;;  %v4619_v23 = vpack.c.bf16 %v297_v21, %v296_v20  ;;  %v379_v24 = vld [vmem:[%s6921_s15 + $0x28] sm:$0xff]  ;;  %v298_v26 = vld [vmem:[%s6920_s14 + $0x30] sm:$0xff]  ;;  %v299_v27 = vld [vmem:[%s6920_s14 + $0x38] sm:$0xff]  ;;  %s5374_s10 = smov [#allocation22]  }
 0x123   :  { %4627 = vmatprep.subr.bf16.mxu1 %v5371_v12  ;;  %v4631_v25 = vpack.c.bf16 %v379_v24, %v378_v22  ;;  %v380_v28 = vld [vmem:[%s6921_s15 + $0x30] sm:$0xff]  ;;  %v4622_v29 = vpack.c.bf16 %v299_v27, %v298_v26  ;;  %v381_v30 = vld [vmem:[%s6921_s15 + $0x38] sm:$0xff]  ;;  %4140 = vmatprep.mubr.msk.f32.mxu1 %vm5372_vm1, %v5373_v32  ;;  %v454_v36 = vld [vmem:[%s6922_s16] sm:$0xff]  ;;  %s3588_s20 = sshll.u32 %s5374_s10, 4  ;;  %s3589_s20 = int_to_ptr.vmem [resolvable:$true] %s3588_s20 }
 0x124   :  { %v5687_v0 = vld [vmem:[%s6980_s30] sm:$0xff]  ;;  %v4634_v31 = vpack.c.bf16 %v381_v30, %v380_v28  ;;  %v455_v37 = vld [vmem:[%s6922_s16 + $0x8] sm:$0xff]  ;;  %v456_v45 = vld [vmem:[%s6922_s16 + $0x10] sm:$0xff]  ;;  %p5322_p13 = scmp.lt.s32.totalorder %s3589_s20, %s3589_s20 }
 0x125   :  { %v271_v1 = vsel %vm270_vm0, %v5687_v0, 0.0  ;;  %4617 = vmatpush3.bf16.msra.mxu0 %v4616_v17  ;;  %v533_v38 = vld [vmem:[%s6923_s17] sm:$0xff]  ;;  %v534_v39 = vld [vmem:[%s6923_s17 + $0x8] sm:$0xff]  ;;  %v4637_v43 = vpack.c.bf16 %v455_v37, %v454_v36  ;;  %v457_v47 = vld [vmem:[%s6922_s16 + $0x18] sm:$0xff] }
 0x126   :  { %272 = vadd.xlane.f32.xlu0 %v271_v1  ;;  %4629 = vmatpush3.bf16.msra.mxu1 %v4628_v19  ;;  %v3603_v41 = vld [vmem:[%s6919_s13] ss:$0 sm:$0xff]  ;;  %v4649_v44 = vpack.c.bf16 %v534_v39, %v533_v38  ;;  %v535_v48 = vld [vmem:[%s6923_s17 + $0x10] sm:$0xff]  ;;  %v536_v49 = vld [vmem:[%s6923_s17 + $0x18] sm:$0xff]  ;;  %v4640_v50 = vpack.c.bf16 %v457_v47, %v456_v45 }
 0x127   :  { %4618 = vmatprep.subr.bf16.mxu0 %v5371_v12  ;;  %4630 = vmatprep.subr.bf16.mxu1 %v5371_v12  ;;  %v4652_v51 = vpack.c.bf16 %v536_v49, %v535_v48  ;;  %v458_v52 = vld [vmem:[%s6922_s16 + $0x20] sm:$0xff]  ;;  %v459_v53 = vld [vmem:[%s6922_s16 + $0x28] sm:$0xff]  ;;  %v460_v58 = vld [vmem:[%s6922_s16 + $0x30] sm:$0xff] }
 0x128   :  { %v537_v54 = vld [vmem:[%s6923_s17 + $0x20] sm:$0xff]  ;;  %v538_v55 = vld [vmem:[%s6923_s17 + $0x28] sm:$0xff]  ;;  %v4643_v56 = vpack.c.bf16 %v459_v53, %v458_v52  ;;  %v461_v59 = vld [vmem:[%s6922_s16 + $0x38] sm:$0xff] }
 0x129   :  { %4620 = vmatpush3.bf16.msra.mxu0 %v4619_v23  ;;  %v4655_v57 = vpack.c.bf16 %v538_v55, %v537_v54  ;;  %v539_v60 = vld [vmem:[%s6923_s17 + $0x30] sm:$0xff]  ;;  %v540_v61 = vld [vmem:[%s6923_s17 + $0x38] sm:$0xff]  ;;  %v4646_v62 = vpack.c.bf16 %v461_v59, %v460_v58  ;;  %v613_v1 = vld [vmem:[%s6924_s18] sm:$0xff] }
 0x12a   :  { %4632 = vmatpush3.bf16.msra.mxu1 %v4631_v25  ;;  %4621 = vmatprep.subr.bf16.mxu0 %v5371_v12  ;;  %v4658_v63 = vpack.c.bf16 %v540_v61, %v539_v60  ;;  %v616_v7 = vld [vmem:[%s6924_s18 + $0x18] sm:$0xff]  ;;  %v245_v9 = vld [vmem:[#allocation10 + $0x10] sm:$0xff]  ;;  %v617_v13 = vld [vmem:[%s6924_s18 + $0x20] sm:$0xff] }
 0x12b   :  { %4633 = vmatprep.subr.bf16.mxu1 %v5371_v12  ;;  %v246_v10 = vld [vmem:[#allocation10 + $0x18] sm:$0xff]  ;;  %v618_v14 = vld [vmem:[%s6924_s18 + $0x28] sm:$0xff]  ;;  %v619_v17 = vld [vmem:[%s6924_s18 + $0x30] sm:$0xff] }
 0x12c   :  { %v5852_v15 = vpack.c.bf16 %v246_v10, %v245_v9  ;;  %v4667_v16 = vpack.c.bf16 %v618_v14, %v617_v13  ;;  %v620_v18 = vld [vmem:[%s6924_s18 + $0x38] sm:$0xff]  ;;  %v247_v20 = vld [vmem:[#allocation10 + $0x20] sm:$0xff]  ;;  %v248_v21 = vld [vmem:[#allocation10 + $0x28] sm:$0xff] }
 0x12d   :  { %4623 = vmatpush3.bf16.msra.mxu0 %v4622_v29  ;;  %v4670_v19 = vpack.c.bf16 %v620_v18, %v619_v17  ;;  %v5872_v22 = vpack.c.bf16 %v248_v21, %v247_v20  ;;  %v249_v23 = vld [vmem:[#allocation10 + $0x30] sm:$0xff]  ;;  %v250_v24 = vld [vmem:[#allocation10 + $0x38] sm:$0xff]  ;;  %v239_v26 = vld [vmem:[#allocation2] sm:$0xff] }
 0x12e   :  { %4635 = vmatpush3.bf16.msra.mxu1 %v4634_v31  ;;  %4636 = vmatprep.subr.bf16.mxu0 %v5371_v12  ;;  %v5876_v25 = vpack.c.bf16 %v250_v24, %v249_v23  ;;  %v240_v27 = vld [vmem:[#allocation5] sm:$0xff]  ;;  %v241_v37 = vld [vmem:[#allocation7] sm:$0xff]  ;;  %v242_v38 = vld [vmem:[#allocation8] sm:$0xff] }
 0x12f   :  { %4648 = vmatprep.subr.bf16.mxu1 %v5371_v12  ;;  %v258_v58 = vld [vmem:[%s6981_s6] sm:$0xff]  ;;  %v259_v59 = vld [vmem:[%s6981_s6 + $0x8] sm:$0xff]  ;;  %v260_v60 = vld [vmem:[%s6981_s6 + $0x10] sm:$0xff] }
 0x130   :  { %v261_v61 = vld [vmem:[%s6981_s6 + $0x18] sm:$0xff]  ;;  %vm5990_vm4 = vmpackc.low %vm270_vm0, %vm270_vm0 }
 0x1b3   :  { %v273_v2 = vpop.xlane.xlu0 %272 }
 0x1b4   :  { %v275_v3 = vmul.f32 0.015625, %v273_v2  ;;  %v614_v2 = vld [vmem:[%s6924_s18 + $0x8] sm:$0xff] }
 0x1b6   :  { %v276_v4 = vsub.f32 %v5687_v0, %v275_v3  ;;  %v243_v3 = vld [vmem:[#allocation10] sm:$0xff] }
 0x1b8   :  { %v277_v5 = vmul.f32 %v276_v4, %v276_v4 }
 0x1ba   :  { %v278_v6 = vsel %vm270_vm0, %v277_v5, 0.0  ;;  %v4661_v5 = vpack.c.bf16 %v614_v2, %v613_v1 }
 0x1bb   :  { %279 = vadd.xlane.f32.xlu0 %v278_v6  ;;  %v615_v6 = vld [vmem:[%s6924_s18 + $0x10] sm:$0xff] }
 0x1bc   :  { %v4664_v11 = vpack.c.bf16 %v616_v7, %v615_v6 }
 0x248   :  { %v280_v33 = vpop.xlane.xlu0 %279 }
 0x249   :  { %v281_v34 = vmul.f32 0.015625, %v280_v33 }
 0x24b   :  { %v282_v35 = vadd.f32 1e-05, %v281_v34 }
 0x24d   :  { %4992 = vrsqrt.f32 %v282_v35 }
 0x257   :  { %v4993_v40 = vpop.eup %4992 }
 0x258   :  { %v284_v42 = vmul.f32 %v4993_v40, %v276_v4  ;;  %v244_v4 = vld [vmem:[#allocation10 + $0x8] sm:$0xff] }
 0x259   :  { %v5836_v8 = vpack.c.bf16 %v244_v4, %v243_v3 }
 0x25a   :  { %v5773_v46 = vmul.f32 %v3603_v41, %v284_v42 }
 0x25c   :  { %4122 = vmatmul.mubr.msk.f32.vlgmr.msra.gmra.mrb[0].mxu0 %vm270_vm0, %v5773_v46  ;;  %4141 = vmatmul.mubr.msk.f32.vlgmr.msra.gmra.mrb[0].mxu1 %vm270_vm0, %v5773_v46 }
 0x25d   :  { %4638 = vmatpush3.bf16.msra.mxu0 %v4637_v43  ;;  %4650 = vmatpush3.bf16.msra.mxu1 %v4649_v44 }
 0x25e   :  { %4639 = vmatprep.subr.bf16.mxu0 %v5371_v12  ;;  %4651 = vmatprep.subr.bf16.mxu1 %v5371_v12 }
 0x25f   :  { %4159 = vmatprep.mubr.msk.f32.mxu0 %vm5372_vm1, %v5373_v32  ;;  %4178 = vmatprep.mubr.msk.f32.mxu1 %vm5372_vm1, %v5373_v32 }
 0x261   :  { %4641 = vmatpush3.bf16.msra.mxu0 %v4640_v50  ;;  %4653 = vmatpush3.bf16.msra.mxu1 %v4652_v51  ;;  %v256_v50 = vld [vmem:[#allocation13] sm:$0xff]  ;;  %v257_v51 = vld [vmem:[#allocation13 + $0x8] sm:$0xff] }
 0x262   :  { %4642 = vmatprep.subr.bf16.mxu0 %v5371_v12  ;;  %4654 = vmatprep.subr.bf16.mxu1 %v5371_v12  ;;  %v5888_v52 = vpack.c.bf16 %v257_v51, %v256_v50  ;;  %v781_v50 = vld [vmem:[%s6982_s9 + $0x18] sm:$0xff] }
 0x265   :  { %4644 = vmatpush3.bf16.msra.mxu0 %v4643_v56  ;;  %4656 = vmatpush3.bf16.msra.mxu1 %v4655_v57 }
 0x266   :  { %4645 = vmatprep.subr.bf16.mxu0 %v5371_v12  ;;  %4657 = vmatprep.subr.bf16.mxu1 %v5371_v12 }
 0x269   :  { %4647 = vmatpush3.bf16.msra.mxu0 %v4646_v62  ;;  %4659 = vmatpush3.bf16.msra.mxu1 %v4658_v63  ;;  %v262_v62 = vld [vmem:[%s6981_s6 + $0x20] sm:$0xff] }
 0x26a   :  { %4660 = vmatprep.subr.bf16.mxu0 %v5371_v12  ;;  %4672 = vmatprep.subr.bf16.mxu1 %v5371_v12 }
 0x26c   :  { %4160 = vmatmul.mubr.msk.f32.vlgmr.msra.gmra.mrb[2].mxu0 %vm270_vm0, %v5773_v46  ;;  %4179 = vmatmul.mubr.msk.f32.vlgmr.msra.gmra.mrb[2].mxu1 %vm270_vm0, %v5773_v46 }
 0x26d   :  { %4662 = vmatpush3.bf16.msra.mxu0 %v4661_v5  ;;  %4197 = vmatprep.mubr.msk.f32.mxu0 %vm5372_vm1, %v5373_v32 }
 0x26e   :  { %4663 = vmatprep.subr.bf16.mxu0 %v5371_v12  ;;  %4674 = vmatpush3.bf16.msra.mxu1 %v5836_v8 }
 0x26f   :  { %4675 = vmatprep.subr.bf16.mxu1 %v5371_v12  ;;  %4216 = vmatprep.mubr.msk.f32.mxu1 %vm5372_vm1, %v5373_v32 }
 0x271   :  { %4665 = vmatpush3.bf16.msra.mxu0 %v4664_v11 }
 0x272   :  { %4666 = vmatprep.subr.bf16.mxu0 %v5371_v12  ;;  %4677 = vmatpush3.bf16.msra.mxu1 %v5852_v15 }
 0x273   :  { %4678 = vmatprep.subr.bf16.mxu1 %v5371_v12 }
 0x275   :  { %4668 = vmatpush3.bf16.msra.mxu0 %v4667_v16 }
 0x276   :  { %4669 = vmatprep.subr.bf16.mxu0 %v5371_v12  ;;  %4680 = vmatpush3.bf16.msra.mxu1 %v5872_v22 }
 0x277   :  { %4681 = vmatprep.subr.bf16.mxu1 %v5371_v12 }
 0x279   :  { %4671 = vmatpush3.bf16.msra.mxu0 %v4670_v19 }
 0x27a   :  { %4219 = vmatprep.subr.mxu0 %v5373_v32  ;;  %4683 = vmatpush3.bf16.msra.mxu1 %v5876_v25 }
 0x27b   :  { %4684 = vmatprep.subr.bf16.mxu1 %v5371_v12 }
 0x27c   :  { %4198 = vmatmul.mubr.msk.f32.vlgmr.msra.gmra.mrb[4].mxu0 %vm270_vm0, %v5773_v46 }
 0x27d   :  { %4221 = vmatprep.mubr.msk.f32.mxu0 %vm5372_vm1, %v5373_v32 }
 0x32f   :  { %v369_v28 = vpop.f32.mrb[0].mxu0  ;;  %v448_v29 = vpop.f32.mrb[0].mxu1 }
 0x330   :  { %v373_v30 = vmul.f32 %v369_v28, %v239_v26  ;;  %v452_v31 = vmul.f32 %v448_v29, %v240_v27  ;;  %v4123_v33 = vpop.f32.mrb[1].mxu0  ;;  %v4142_v34 = vpop.f32.mrb[1].mxu1  ;;  %v5973_v27 = vld [vmem:[#allocation14] sm:$0xff] }
 0x331   :  { %v778_v33 = vld [vmem:[%s6982_s9] sm:$0xff]  ;;  %v779_v34 = vld [vmem:[%s6982_s9 + $0x8] sm:$0xff] }
 0x332   :  { %v5880_v35 = vadd.f32 %v452_v31, %v373_v30  ;;  %v5975_v30 = vld [vmem:[#allocation14 + $0x8] sm:$0xff] }
 0x334   :  { %v691_v36 = vmul.f32 %v5880_v35, %v5880_v35 }
 0x336   :  { %4217 = vmatmul.mubr.msk.f32.vlgmr.msra.gmra.mrb[4].mxu1 %vm270_vm0, %v691_v36 }
 0x337   :  { %4240 = vmatprep.mubr.msk.f32.mxu1 %vm5372_vm1, %v5373_v32  ;;  %4686 = vmatpush3.bf16.msra.mxu1 %v5888_v52 }
 0x338   :  { %4687 = vmatprep.subr.bf16.mxu1 %v5371_v12 }
 0x33f   :  { %v528_v39 = vpop.f32.mrb[2].mxu0  ;;  %v607_v40 = vpop.f32.mrb[2].mxu1 }
 0x340   :  { %v532_v41 = vmul.f32 %v528_v39, %v241_v37  ;;  %v611_v42 = vmul.f32 %v607_v40, %v242_v38  ;;  %v4161_v43 = vpop.f32.mrb[3].mxu0  ;;  %v4180_v44 = vpop.f32.mrb[3].mxu1 }
 0x342   :  { %v612_v45 = vadd.f32 %v611_v42, %v532_v41  ;;  %v5986_v42 = vld [vmem:[#allocation14 + $0x10] sm:$0xff] }
 0x344   :  { %v769_v46 = vmul.f32 %v612_v45, %v612_v45 }
 0x346   :  { %v771_v47 = vsel %vm770_vm2, %v769_v46, 0.0 }
 0x347   :  { %772 = vadd.xlane.f32.xlu1 %v771_v47  ;;  %v5994_v47 = vld [vmem:[#allocation14 + $0x18] sm:$0xff] }
 0x34f   :  { %v687_v48 = vpop.f32.mrb[4].mxu0 }
 0x350   :  { %v4199_v49 = vpop.f32.mrb[5].mxu0 }
 0x351   :  { %v780_v49 = vld [vmem:[%s6982_s9 + $0x10] sm:$0xff] }
 0x3d4   :  { %v773_v53 = vpop.xlane.xlu1 %772 }
 0x3d5   :  { %v774_v54 = vmax.f32 %v773_v53, 1e-24 }
 0x3d7   :  { %4994 = vrsqrt.f32 %v774_v54 }
 0x3e1   :  { %v4995_v55 = vpop.eup %4994 }
 0x3e2   :  { %v776_v56 = vmul.f32 %v4995_v55, %v612_v45 }
 0x3e4   :  { %v777_v57 = vmul.f32 4.0, %v776_v56 }
 0x3e6   :  { %4220 = vmatpush3.msra.mxu0 %v777_v57  ;;  %v267_v57 = vld [vmem:[#allocation14 + $0x20] sm:$0xff] }
 0x3e7   :  { %4222 = vmatmul.mubr.msk.f32.vlgmr.msra.gmra.mrb[6].mxu0 %vm783_vm3, %v258_v58  ;;  %4255 = vmatprep.subr.mxu0 %v5373_v32 }
 0x3e8   :  { %4256 = vmatpush3.msra.mxu0 %v687_v48  ;;  %4224 = vmatprep.mubr.msk.f32.mxu0 %vm5372_vm1, %v5373_v32 }
 0x3e9   :  { %4690 = vmatprep.subr.bf16.mxu0 %v5371_v12 }
 0x3eb   :  { %4225 = vmatmul.mubr.msk.f32.gmra.mrb[8].mxu0 %vm783_vm3, %v259_v59 }
 0x3ec   :  { %4227 = vmatprep.mubr.msk.f32.mxu0 %vm5372_vm1, %v5373_v32 }
 0x3ef   :  { %4228 = vmatmul.mubr.msk.f32.gmra.mrb[10].mxu0 %vm783_vm3, %v260_v60 }
 0x3f0   :  { %4230 = vmatprep.mubr.msk.f32.mxu0 %vm5372_vm1, %v5373_v32 }
 0x3f3   :  { %4231 = vmatmul.mubr.msk.f32.gmra.mrb[12].mxu0 %vm783_vm3, %v261_v61 }
 0x3f4   :  { %4233 = vmatprep.mubr.msk.f32.mxu0 %vm5372_vm1, %v5373_v32 }
 0x3f7   :  { %4234 = vmatmul.mubr.msk.f32.gmra.mrb[14].mxu0 %vm783_vm3, %v262_v62 }
 0x3f8   :  { %4257 = vmatprep.mubr.msk.f32.mxu0 %vm5372_vm1, %v5373_v32 }
 0x3fb   :  { %4258 = vmatmul.mubr.msk.f32.vlgmr.msra.gmra.mrb[16].mxu0 %vm783_vm3, %v258_v58 }
 0x3fc   :  { %4260 = vmatprep.mubr.msk.f32.mxu0 %vm5372_vm1, %v5373_v32 }
 0x3ff   :  { %4261 = vmatmul.mubr.msk.f32.gmra.mrb[18].mxu0 %vm783_vm3, %v259_v59 }
 0x400   :  { %4263 = vmatprep.mubr.msk.f32.mxu0 %vm5372_vm1, %v5373_v32 }
 0x403   :  { %4264 = vmatmul.mubr.msk.f32.gmra.mrb[20].mxu0 %vm783_vm3, %v260_v60 }
 0x404   :  { %4266 = vmatprep.mubr.msk.f32.mxu0 %vm5372_vm1, %v5373_v32 }
 0x407   :  { %4267 = vmatmul.mubr.msk.f32.gmra.mrb[22].mxu0 %vm783_vm3, %v261_v61 }
 0x408   :  { %4269 = vmatprep.mubr.msk.f32.mxu0 %vm5372_vm1, %v5373_v32 }
 0x409   :  { %v5936_v63 = vpop.f32.mrb[4].mxu1 }
 0x40a   :  { %v4218_v1 = vpop.f32.mrb[5].mxu1  ;;  %v765_v39 = vmax.f32 %v5936_v63, 1e-24 }
 0x40b   :  { %4270 = vmatmul.mubr.msk.f32.gmra.mrb[24].mxu0 %vm783_vm3, %v262_v62  ;;  %v782_v62 = vld [vmem:[%s6982_s9 + $0x20] sm:$0xff] }
 0x40c   :  { %4301 = vmatprep.mubr.msk.f32.mxu0 %vm5372_vm1, %v5373_v32  ;;  %4996 = vrsqrt.f32 %v765_v39 }
 0x416   :  { %v4997_v63 = vpop.eup %4996 }
 0x4ba   :  { %v865_v2 = vpop.f32.mrb[6].mxu0 }
 0x4bb   :  { %v4223_v3 = vpop.f32.mrb[7].mxu0  ;;  %4241 = vmatmul.mubr.msk.f32.vlgmr.msra.gmra.mrb[6].mxu1 %vm770_vm2, %v865_v2  ;;  %v767_v2 = vmul.f32 %v4997_v63, %v5880_v35 }
 0x4bc   :  { %4243 = vmatprep.mubr.msk.f32.mxu1 %vm5372_vm1, %v5373_v32  ;;  %4689 = vmatpush3.bf16.msra.mxu1 %v5888_v52 }
 0x4bd   :  { %4698 = vmatprep.subr.bf16.mxu1 %v5371_v12  ;;  %v768_v3 = vmul.f32 4.0, %v767_v2  ;;  %v1464_v2 = vld [vmem:[%s6925_s19 + $0x38] sm:$0xff] }
 0x4be   :  { %v870_v4 = vpop.f32.mrb[8].mxu0 }
 0x4bf   :  { %v4226_v5 = vpop.f32.mrb[9].mxu0  ;;  %4244 = vmatmul.mubr.msk.f32.gmra.mrb[8].mxu1 %vm770_vm2, %v870_v4  ;;  %v251_v4 = vld [vmem:[#allocation11] sm:$0xff] }
 0x4c0   :  { %4246 = vmatprep.mubr.msk.f32.mxu1 %vm5372_vm1, %v5373_v32  ;;  %v252_v5 = vld [vmem:[#allocation11 + $0x8] sm:$0xff] }
 0x4c2   :  { %v875_v6 = vpop.f32.mrb[10].mxu0 }
 0x4c3   :  { %v4229_v7 = vpop.f32.mrb[11].mxu0  ;;  %4247 = vmatmul.mubr.msk.f32.gmra.mrb[10].mxu1 %vm770_vm2, %v875_v6  ;;  %v6019_v6 = vpack.c.bf16 %v252_v5, %v251_v4 }
 0x4c4   :  { %4249 = vmatprep.mubr.msk.f32.mxu1 %vm5372_vm1, %v5373_v32  ;;  %v268_v7 = vld [vmem:[#allocation16] sm:$0xff] }
 0x4c6   :  { %v880_v9 = vpop.f32.mrb[12].mxu0 }
 0x4c7   :  { %v4232_v10 = vpop.f32.mrb[13].mxu0  ;;  %4250 = vmatmul.mubr.msk.f32.gmra.mrb[12].mxu1 %vm770_vm2, %v880_v9 }
 0x4c8   :  { %4252 = vmatprep.mubr.msk.f32.mxu1 %vm5372_vm1, %v5373_v32 }
 0x4ca   :  { %v885_v11 = vpop.f32.mrb[14].mxu0 }
 0x4cb   :  { %v4235_v13 = vpop.f32.mrb[15].mxu0  ;;  %4253 = vmatmul.mubr.msk.f32.gmra.mrb[14].mxu1 %vm770_vm2, %v885_v11 }
 0x4cc   :  { %4276 = vmatprep.mubr.msk.f32.mxu1 %vm5372_vm1, %v5373_v32  ;;  %v253_v13 = vld [vmem:[#allocation11 + $0x10] sm:$0xff] }
 0x4ce   :  { %v1075_v14 = vpop.f32.mrb[16].mxu0 }
 0x4cf   :  { %4277 = vmatmul.mubr.msk.f32.vlgmr.msra.gmra.mrb[16].mxu1 %vm770_vm2, %v1075_v14  ;;  %v4259_v16 = vpop.f32.mrb[17].mxu0  ;;  %v254_v14 = vld [vmem:[#allocation11 + $0x18] sm:$0xff] }
 0x4d0   :  { %4279 = vmatprep.mubr.msk.f32.mxu1 %vm5372_vm1, %v5373_v32  ;;  %4700 = vmatpush3.bf16.msra.mxu1 %v6019_v6  ;;  %v6024_v16 = vpack.c.bf16 %v254_v14, %v253_v13 }
 0x4d1   :  { %4701 = vmatprep.subr.bf16.mxu1 %v5371_v12 }
 0x4d2   :  { %v1080_v17 = vpop.f32.mrb[18].mxu0 }
 0x4d3   :  { %v4262_v18 = vpop.f32.mrb[19].mxu0  ;;  %4280 = vmatmul.mubr.msk.f32.gmra.mrb[18].mxu1 %vm770_vm2, %v1080_v17  ;;  %v6028_v17 = vld [vmem:[#allocation11 + $0x20] sm:$0xff] }
 0x4d4   :  { %4282 = vmatprep.mubr.msk.f32.mxu1 %vm5372_vm1, %v5373_v32  ;;  %4703 = vmatpush3.bf16.msra.mxu1 %v6024_v16  ;;  %v1004_v18 = vld [vmem:[%s6918_s12] sm:$0xff] }
 0x4d5   :  { %4312 = vmatprep.subr.mxu1 %v5373_v32 }
 0x4d6   :  { %v1085_v19 = vpop.f32.mrb[20].mxu0 }
 0x4d7   :  { %v4265_v20 = vpop.f32.mrb[21].mxu0  ;;  %4283 = vmatmul.mubr.msk.f32.gmra.mrb[20].mxu1 %vm770_vm2, %v1085_v19 }
 0x4d8   :  { %4285 = vmatprep.mubr.msk.f32.mxu1 %vm5372_vm1, %v5373_v32  ;;  %4313 = vmatpush3.msra.mxu1 %v6028_v17 }
 0x4d9   :  { %4710 = vmatprep.subr.bf16.mxu1 %v5371_v12 }
 0x4da   :  { %v1090_v21 = vpop.f32.mrb[22].mxu0 }
 0x4db   :  { %v4268_v23 = vpop.f32.mrb[23].mxu0  ;;  %4286 = vmatmul.mubr.msk.f32.gmra.mrb[22].mxu1 %vm770_vm2, %v1090_v21 }
 0x4dc   :  { %4288 = vmatprep.mubr.msk.f32.mxu1 %vm5372_vm1, %v5373_v32  ;;  %v1005_v23 = vld [vmem:[%s6918_s12 + $0x8] sm:$0xff] }
 0x4de   :  { %v1095_v24 = vpop.f32.mrb[24].mxu0 }
 0x4df   :  { %v4271_v26 = vpop.f32.mrb[25].mxu0  ;;  %4289 = vmatmul.mubr.msk.f32.gmra.mrb[24].mxu1 %vm770_vm2, %v1095_v24 }
 0x4e0   :  { %4314 = vmatprep.mubr.msk.f32.mxu1 %vm5372_vm1, %v5373_v32 }
 0x58e   :  { %v970_v28 = vpop.f32.mrb[6].mxu1 }
 0x58f   :  { %v4242_v29 = vpop.f32.mrb[7].mxu1  ;;  %v994_v31 = vmul.f32 %v970_v28, %v5973_v27 }
 0x591   :  { %v999_v40 = vadd.f32 %v994_v31, %v778_v33  ;;  %v1006_v31 = vld [vmem:[%s6918_s12 + $0x10] sm:$0xff] }
 0x592   :  { %v975_v36 = vpop.f32.mrb[8].mxu1 }
 0x593   :  { %v995_v37 = vmul.f32 %v975_v36, %v5975_v30  ;;  %v4245_v38 = vpop.f32.mrb[9].mxu1 }
 0x595   :  { %v1000_v41 = vadd.f32 %v995_v37, %v779_v34 }
 0x596   :  { %v980_v43 = vpop.f32.mrb[10].mxu1 }
 0x597   :  { %v4691_v45 = vpack.c.bf16 %v1000_v41, %v999_v40  ;;  %v4248_v46 = vpop.f32.mrb[11].mxu1  ;;  %v996_v48 = vmul.f32 %v980_v43, %v5986_v42 }
 0x599   :  { %4693 = vmatpush3.bf16.xpose.msk.msra.mxu0 %vm5990_vm4, %v4691_v45  ;;  %v1001_v55 = vadd.f32 %v996_v48, %v780_v49 }
 0x59a   :  { %v985_v51 = vpop.f32.mrb[12].mxu1  ;;  %4694 = vmatprep.subr.bf16.mxu0 %v5371_v12 }
 0x59b   :  { %v997_v53 = vmul.f32 %v985_v51, %v5994_v47  ;;  %v4251_v54 = vpop.f32.mrb[13].mxu1 }
 0x59d   :  { %v1002_v56 = vadd.f32 %v997_v53, %v781_v50 }
 0x59e   :  { %v990_v58 = vpop.f32.mrb[14].mxu1 }
 0x59f   :  { %v4695_v59 = vpack.c.bf16 %v1002_v56, %v1001_v55  ;;  %v4254_v60 = vpop.f32.mrb[15].mxu1  ;;  %v998_v61 = vmul.f32 %v990_v58, %v267_v57  ;;  %v1457_v55 = vld [vmem:[%s6925_s19] sm:$0xff]  ;;  %v1458_v56 = vld [vmem:[%s6925_s19 + $0x8] sm:$0xff] }
 0x5a0   :  { %v4711_v58 = vpack.c.bf16 %v1458_v56, %v1457_v55  ;;  %v1586_v55 = vld [vmem:[%s6928_s22 + $0x28] sm:$0xff]  ;;  %v1588_v56 = vld [vmem:[%s6928_s22 + $0x38] sm:$0xff] }
 0x5a1   :  { %4697 = vmatpush3.bf16.xpose.msk.msra.mxu0 %vm5990_vm4, %v4695_v59  ;;  %v1003_v1 = vadd.f32 %v998_v61, %v782_v62  ;;  %v1460_v59 = vld [vmem:[%s6925_s19 + $0x18] sm:$0xff]  ;;  %v1461_v61 = vld [vmem:[%s6925_s19 + $0x20] sm:$0xff]  ;;  %v1462_v62 = vld [vmem:[%s6925_s19 + $0x28] sm:$0xff] }
 0x5a2   :  { %4299 = vmatprep.subr.mxu0 %v5373_v32  ;;  %v1180_v19 = vpop.f32.mrb[16].mxu1  ;;  %v4717_v63 = vpack.c.bf16 %v1462_v62, %v1461_v61  ;;  %v1587_v61 = vld [vmem:[%s6928_s22 + $0x30] sm:$0xff] }
 0x5a3   :  { %v1204_v20 = vmul.f32 %v1180_v19, %v5973_v27  ;;  %v4278_v21 = vpop.f32.mrb[17].mxu1  ;;  %v1007_v27 = vld [vmem:[%s6918_s12 + $0x18] sm:$0xff] }
 0x5a5   :  { %v1209_v26 = vadd.f32 %v1204_v20, %v1004_v18 }
 0x5a6   :  { %v1185_v24 = vpop.f32.mrb[18].mxu1 }
 0x5a7   :  { %v1205_v28 = vmul.f32 %v1185_v24, %v5975_v30  ;;  %v4281_v29 = vpop.f32.mrb[19].mxu1 }
 0x5a9   :  { %4300 = vmatpush3.xpose.msk.msra.mxu0 %vm270_vm0, %v1003_v1  ;;  %v1210_v34 = vadd.f32 %v1205_v28, %v1005_v23  ;;  %v1463_v1 = vld [vmem:[%s6925_s19 + $0x30] sm:$0xff] }
 0x5aa   :  { %4704 = vmatprep.subr.bf16.mxu0 %v5371_v12  ;;  %v1190_v33 = vpop.f32.mrb[20].mxu1 }
 0x5ab   :  { %v1206_v36 = vmul.f32 %v1190_v33, %v5986_v42  ;;  %v4284_v37 = vpop.f32.mrb[21].mxu1  ;;  %v4705_v39 = vpack.c.bf16 %v1210_v34, %v1209_v26  ;;  %v1008_v42 = vld [vmem:[%s6918_s12 + $0x20] sm:$0xff]  ;;  %v3639_v33 = vld [vmem:[#allocation17] ss:$0 sm:$0xff] }
 0x5ac   :  { %4302 = vmatmul.mubr.msk.f32.vlgmr.msra.gmra.mrb[26].mxu0 %vm270_vm0, %v768_v3  ;;  %v4720_v3 = vpack.c.bf16 %v1464_v2, %v1463_v1  ;;  %v1675_v1 = vld [vmem:[%s6929_s23 + $0x20] sm:$0xff]  ;;  %v1677_v2 = vld [vmem:[%s6929_s23 + $0x30] sm:$0xff] }
 0x5ad   :  { %4327 = vmatprep.mubr.msk.f32.mxu0 %vm5372_vm1, %v5373_v32  ;;  %v1211_v40 = vadd.f32 %v1206_v36, %v1006_v31  ;;  %4706 = vmatpush3.bf16.msra.mxu0 %v4705_v39 }
 0x5ae   :  { %v1195_v38 = vpop.f32.mrb[22].mxu1  ;;  %4707 = vmatprep.subr.bf16.mxu0 %v5371_v12 }
 0x5af   :  { %v1207_v41 = vmul.f32 %v1195_v38, %v5994_v47  ;;  %v4287_v30 = vpop.f32.mrb[23].mxu1 }
 0x5b1   :  { %v1212_v45 = vadd.f32 %v1207_v41, %v1007_v27 }
 0x5b2   :  { %v1200_v43 = vpop.f32.mrb[24].mxu1 }
 0x5b3   :  { %v1208_v46 = vmul.f32 %v1200_v43, %v267_v57  ;;  %v4290_v48 = vpop.f32.mrb[25].mxu1  ;;  %v4708_v49 = vpack.c.bf16 %v1212_v45, %v1211_v40  ;;  %v1459_v57 = vld [vmem:[%s6925_s19 + $0x10] sm:$0xff]  ;;  %v1584_v43 = vld [vmem:[%s6928_s22 + $0x18] sm:$0xff]  ;;  %v1672_v45 = vld [vmem:[%s6929_s23 + $0x8] sm:$0xff] }
 0x5b4   :  { %v4714_v60 = vpack.c.bf16 %v1460_v59, %v1459_v57  ;;  %v1674_v48 = vld [vmem:[%s6929_s23 + $0x18] sm:$0xff]  ;;  %v1676_v57 = vld [vmem:[%s6929_s23 + $0x28] sm:$0xff] }
 0x5b5   :  { %v1213_v50 = vadd.f32 %v1208_v46, %v1008_v42  ;;  %4709 = vmatpush3.bf16.msra.mxu0 %v4708_v49  ;;  %v1581_v42 = vld [vmem:[%s6928_s22] sm:$0xff]  ;;  %v1583_v49 = vld [vmem:[%s6928_s22 + $0x10] sm:$0xff]  ;;  %v1678_v59 = vld [vmem:[%s6929_s23 + $0x38] sm:$0xff] }
 0x5b6   :  { %4325 = vmatprep.subr.mxu0 %v5373_v32  ;;  %v4742_v62 = vpack.c.bf16 %v1678_v59, %v1676_v57  ;;  %v1795_v59 = vld [vmem:[%s6930_s24 + $0xa8] sm:$0xff] }
 0x5b9   :  { %4326 = vmatpush3.msra.mxu0 %v1213_v50  ;;  %v4738_v50 = vpack.c.bf16 %v1674_v48, %v1672_v45  ;;  %v1790_v48 = vld [vmem:[%s6930_s24 + $0x80] sm:$0xff] }
 0x67f   :  { %v1298_v35 = vpop.f32.mrb[26].mxu0 }
 0x680   :  { %v1299_v9 = vadd.f32 %v1298_v35, %v268_v7  ;;  %v4303_v10 = vpop.f32.mrb[27].mxu0 }
 0x682   :  { %v1303_v11 = vsel %vm1302_vm5, %v1299_v9, -inf }
 0x683   :  { %1304 = vmax.xlane.f32.xlu1 %v1303_v11 }
 0x710   :  { %v1305_v51 = vpop.xlane.xlu1 %1304 }
 0x711   :  { %v1306_v47 = vsub.f32 %v1299_v9, %v1305_v51  ;;  %v4724_v51 = vpack.c.bf16 %v1583_v49, %v1581_v42  ;;  %v1791_v42 = vld [vmem:[%s6930_s24 + $0x88] sm:$0xff] }
 0x712   :  { %v4754_v49 = vpack.c.bf16 %v1791_v42, %v1790_v48 }
 0x713   :  { %v1307_v53 = vmul.f32 1.442695, %v1306_v47  ;;  %v1671_v47 = vld [vmem:[%s6929_s23] sm:$0xff] }
 0x715   :  { %4998 = vpow2.f32 %v1307_v53  ;;  %v1673_v53 = vld [vmem:[%s6929_s23 + $0x10] sm:$0xff] }
 0x71f   :  { %v4999_v54 = vpop.eup %4998 }
 0x720   :  { %4315 = vmatmul.mubr.msk.f32.vlgmr.msra.gmra.mrb[26].mxu1 %vm1302_vm5, %v4999_v54 }
 0x721   :  { %4346 = vmatprep.mubr.msk.f32.mxu1 %vm5372_vm1, %v5373_v32  ;;  %4712 = vmatpush3.bf16.msra.mxu1 %v4711_v58  ;;  %v4726_v58 = vpack.c.bf16 %v1588_v56, %v1586_v55  ;;  %v1776_v55 = vld [vmem:[%s6930_s24 + $0x10] sm:$0xff]  ;;  %v1777_v56 = vld [vmem:[%s6930_s24 + $0x18] sm:$0xff] }
 0x722   :  { %4713 = vmatprep.subr.bf16.mxu1 %v5371_v12  ;;  %v4760_v57 = vpack.c.bf16 %v1777_v56, %v1776_v55 }
 0x725   :  { %4715 = vmatpush3.bf16.msra.mxu1 %v4714_v60  ;;  %v1585_v60 = vld [vmem:[%s6928_s22 + $0x20] sm:$0xff] }
 0x726   :  { %4716 = vmatprep.subr.bf16.mxu1 %v5371_v12 }
 0x729   :  { %4718 = vmatpush3.bf16.msra.mxu1 %v4717_v63  ;;  %v4728_v63 = vpack.c.bf16 %v1587_v61, %v1585_v60  ;;  %v1778_v61 = vld [vmem:[%s6930_s24 + $0x20] sm:$0xff] }
 0x72a   :  { %4719 = vmatprep.subr.bf16.mxu1 %v5371_v12 }
 0x72d   :  { %4721 = vmatpush3.bf16.msra.mxu1 %v4720_v3  ;;  %v4744_v3 = vpack.c.bf16 %v1677_v2, %v1675_v1  ;;  %v1796_v1 = vld [vmem:[%s6930_s24 + $0xb0] sm:$0xff]  ;;  %v1797_v2 = vld [vmem:[%s6930_s24 + $0xb8] sm:$0xff] }
 0x72e   :  { %4739 = vmatprep.subr.bf16.mxu1 %v4738_v50  ;;  %v1775_v50 = vld [vmem:[%s6930_s24 + $0x8] sm:$0xff] }
 0x7f3   :  { %v1378_v4 = vpop.f32.mrb[26].mxu1 }
 0x7f4   :  { %v1379_v5 = vadd.f32 1e-30, %v1378_v4  ;;  %v4316_v7 = vpop.f32.mrb[27].mxu1  ;;  %v1590_v4 = vld [vmem:[%s6928_s22 + $0x48] sm:$0xff] }
 0x7f5   :  { %v1680_v7 = vld [vmem:[%s6929_s23 + $0x48] sm:$0xff] }
 0x7f6   :  { %5000 = vrcp.f32 %v1379_v5  ;;  %v1592_v5 = vld [vmem:[%s6928_s22 + $0x58] sm:$0xff] }
 0x800   :  { %v5001_v35 = vpop.eup %5000 }
 0x801   :  { %v1383_v9 = vmul.f32 %v5001_v35, %v4999_v54  ;;  %v4740_v54 = vpack.c.bf16 %v1673_v53, %v1671_v47  ;;  %v4730_v35 = vpack.c.bf16 %v1592_v5, %v1590_v4  ;;  %v1792_v47 = vld [vmem:[%s6930_s24 + $0x90] sm:$0xff]  ;;  %v1793_v53 = vld [vmem:[%s6930_s24 + $0x98] sm:$0xff] }
 0x802   :  { %v1780_v4 = vld [vmem:[%s6930_s24 + $0x30] sm:$0xff]  ;;  %v1781_v5 = vld [vmem:[%s6930_s24 + $0x38] sm:$0xff] }
 0x803   :  { %4328 = vmatmul.mubr.msk.f32.vlgmr.msra.gmra.mrb[28].mxu0 %vm1302_vm5, %v1383_v9  ;;  %v1682_v9 = vld [vmem:[%s6929_s23 + $0x58] sm:$0xff] }
 0x804   :  { %1664 = vmatprep.mubr.f32.mxu0 %v5373_v32 }
 0x8d6   :  { %v1453_v10 = vpop.f32.mrb[28].mxu0 }
 0x8d7   :  { %v4329_v11 = vpop.f32.mrb[29].mxu0  ;;  %4347 = vmatmul.mubr.msk.f32.vlgmr.msra.gmra.mrb[28].mxu1 %vm270_vm0, %v1453_v10  ;;  %v1589_v10 = vld [vmem:[%s6928_s22 + $0x40] sm:$0xff] }
 0x8d8   :  { %1751 = vmatprep.mubr.f32.mxu1 %v5373_v32  ;;  %4741 = vmatpush1.bf16.msra.mxu1 %v4740_v54  ;;  %v1591_v11 = vld [vmem:[%s6928_s22 + $0x50] sm:$0xff]  ;;  %v4758_v54 = vpack.c.bf16 %v1793_v53, %v1792_v47 }
 0x8d9   :  { %4743 = vmatprep.subr.bf16.mxu1 %v4742_v62  ;;  %v1779_v62 = vld [vmem:[%s6930_s24 + $0x28] sm:$0xff] }
 0x8dc   :  { %4745 = vmatpush1.bf16.msra.mxu1 %v4744_v3  ;;  %v4766_v3 = vpack.c.bf16 %v1797_v2, %v1796_v1 }
 0x9aa   :  { %v1534_v13 = vpop.f32.mrb[28].mxu1 }
 0x9ab   :  { %v4348_v14 = vpop.f32.mrb[29].mxu1  ;;  %v1539_v18 = vsel %vm270_vm0, %v1534_v13, 0.0 }
 0x9ac   :  { %1540 = vadd.xlane.f32.xlu0 %v1539_v18  ;;  %v4732_v14 = vpack.c.bf16 %v1591_v11, %v1589_v10  ;;  %v1679_v18 = vld [vmem:[%s6929_s23 + $0x40] sm:$0xff] }
 0x9ad   :  { %v1782_v11 = vld [vmem:[%s6930_s24 + $0x40] sm:$0xff] }
 0xa39   :  { %v1541_v19 = vpop.xlane.xlu0 %1540 }
 0xa3a   :  { %v1542_v20 = vmul.f32 0.015625, %v1541_v19  ;;  %v1681_v19 = vld [vmem:[%s6929_s23 + $0x50] sm:$0xff] }
 0xa3c   :  { %v1543_v21 = vsub.f32 %v1534_v13, %v1542_v20  ;;  %v4746_v13 = vpack.c.bf16 %v1682_v9, %v1680_v7  ;;  %v4748_v20 = vpack.c.bf16 %v1681_v19, %v1679_v18  ;;  %v4768_v7 = vpack.c.bf16 %v1781_v5, %v1780_v4  ;;  %v1799_v9 = vld [vmem:[%s6930_s24 + $0xc8] sm:$0xff]  ;;  %v1800_v18 = vld [vmem:[%s6930_s24 + $0xd0] sm:$0xff]  ;;  %v1801_v19 = vld [vmem:[%s6930_s24 + $0xd8] sm:$0xff] }
 0xa3d   :  { %v3647_v5 = vld [vmem:[%s6920_s14 + $0x40] sm:$0xff] }
 0xa3e   :  { %v1544_v23 = vmul.f32 %v1543_v21, %v1543_v21  ;;  %4747 = vmatprep.subr.bf16.mxu1 %v4746_v13  ;;  %v1783_v13 = vld [vmem:[%s6930_s24 + $0x48] sm:$0xff] }
 0xa3f   :  { %4749 = vmatpush1.bf16.msra.mxu1 %v4748_v20  ;;  %v4774_v20 = vpack.c.bf16 %v1801_v19, %v1800_v18  ;;  %v3668_v19 = vld [vmem:[%s6922_s16 + $0x58] sm:$0xff] }
 0xa40   :  { %v1545_v24 = vsel %vm270_vm0, %v1544_v23, 0.0  ;;  %v1596_v23 = vld [vmem:[%s6928_s22 + $0x78] sm:$0xff] }
 0xa41   :  { %1546 = vadd.xlane.f32.xlu1 %v1545_v24  ;;  %v1684_v24 = vld [vmem:[%s6929_s23 + $0x68] sm:$0xff] }
 0xace   :  { %v1547_v26 = vpop.xlane.xlu1 %1546 }
 0xacf   :  { %v1548_v28 = vmul.f32 0.015625, %v1547_v26 }
 0xad1   :  { %v1549_v29 = vadd.f32 1e-05, %v1548_v28  ;;  %v1686_v28 = vld [vmem:[%s6929_s23 + $0x78] sm:$0xff] }
 0xad3   :  { %5002 = vrsqrt.f32 %v1549_v29  ;;  %v1593_v29 = vld [vmem:[%s6928_s22 + $0x60] sm:$0xff] }
 0xadd   :  { %v5003_v31 = vpop.eup %5002 }
 0xade   :  { %v1551_v34 = vmul.f32 %v5003_v31, %v1543_v21  ;;  %v1594_v21 = vld [vmem:[%s6928_s22 + $0x68] sm:$0xff]  ;;  %v1595_v31 = vld [vmem:[%s6928_s22 + $0x70] sm:$0xff] }
 0xadf   :  { %v4734_v26 = vpack.c.bf16 %v1596_v23, %v1594_v21  ;;  %v1784_v21 = vld [vmem:[%s6930_s24 + $0x50] sm:$0xff]  ;;  %v1785_v23 = vld [vmem:[%s6930_s24 + $0x58] sm:$0xff] }
 0xae0   :  { %v1558_v36 = vmul.f32 %v3639_v33, %v1551_v34  ;;  %v4750_v33 = vpack.c.bf16 %v1686_v28, %v1684_v24  ;;  %v4736_v34 = vpack.c.bf16 %v1595_v31, %v1593_v29  ;;  %v4776_v24 = vpack.c.bf16 %v1785_v23, %v1784_v21  ;;  %v1803_v28 = vld [vmem:[%s6930_s24 + $0xe8] sm:$0xff]  ;;  %v1786_v31 = vld [vmem:[%s6930_s24 + $0x60] sm:$0xff] }
 0xae1   :  { %v3651_v21 = vld [vmem:[%s6920_s14 + $0x60] sm:$0xff]  ;;  %v3652_v23 = vld [vmem:[%s6920_s14 + $0x68] sm:$0xff] }
 0xae2   :  { %v6090_v37 = vadd.f32 %v1558_v36, %v5687_v0  ;;  %v1582_v0 = vld [vmem:[%s6928_s22 + $0x8] sm:$0xff]  ;;  %v1683_v36 = vld [vmem:[%s6929_s23 + $0x60] sm:$0xff]  ;;  %4751 = vmatprep.subr.bf16.mxu1 %v4750_v33 }
 0xae3   :  { %v4722_v46 = vpack.c.bf16 %v1584_v43, %v1582_v0  ;;  %v3640_v43 = vld [vmem:[#allocation19] ss:$0 sm:$0xff] }
 0xae4   :  { %v1561_v27 = vsel %vm270_vm0, %v6090_v37, 0.0  ;;  %v1787_v33 = vld [vmem:[%s6930_s24 + $0x68] sm:$0xff] }
 0xae5   :  { %1562 = vadd.xlane.f32.xlu0 %v1561_v27  ;;  %4723 = vmatprep.subr.bf16.mxu0 %v4722_v46  ;;  %v1685_v27 = vld [vmem:[%s6929_s23 + $0x70] sm:$0xff] }
 0xae6   :  { %4725 = vmatpush1.bf16.msra.mxu0 %v4724_v51 }
 0xae7   :  { %4727 = vmatprep.subr.bf16.mxu0 %v4726_v58  ;;  %v1794_v58 = vld [vmem:[%s6930_s24 + $0xa0] sm:$0xff] }
 0xae8   :  { %v4762_v60 = vpack.c.bf16 %v1795_v59, %v1794_v58 }
 0xaea   :  { %4729 = vmatpush1.bf16.msra.mxu0 %v4728_v63  ;;  %v4764_v63 = vpack.c.bf16 %v1779_v62, %v1778_v61 }
 0xaeb   :  { %4731 = vmatprep.subr.bf16.mxu0 %v4730_v35  ;;  %v1798_v35 = vld [vmem:[%s6930_s24 + $0xc0] sm:$0xff] }
 0xaec   :  { %v4770_v10 = vpack.c.bf16 %v1799_v9, %v1798_v35  ;;  %v3666_v9 = vld [vmem:[%s6922_s16 + $0x48] sm:$0xff] }
 0xaee   :  { %4733 = vmatpush1.bf16.msra.mxu0 %v4732_v14  ;;  %v4772_v14 = vpack.c.bf16 %v1783_v13, %v1782_v11  ;;  %v3649_v11 = vld [vmem:[%s6920_s14 + $0x50] sm:$0xff]  ;;  %v3650_v13 = vld [vmem:[%s6920_s14 + $0x58] sm:$0xff] }
 0xaef   :  { %4735 = vmatprep.subr.bf16.mxu0 %v4734_v26  ;;  %v1802_v26 = vld [vmem:[%s6930_s24 + $0xe0] sm:$0xff]  ;;  %v4790_v18 = vpack.c.bf16 %v3650_v13, %v3649_v11  ;;  %v3676_v11 = vld [vmem:[%s6923_s17 + $0x50] sm:$0xff]  ;;  %v3677_v13 = vld [vmem:[%s6923_s17 + $0x58] sm:$0xff] }
 0xaf0   :  { %v4778_v29 = vpack.c.bf16 %v1803_v28, %v1802_v26  ;;  %v4793_v26 = vpack.c.bf16 %v3652_v23, %v3651_v21  ;;  %v3670_v28 = vld [vmem:[%s6922_s16 + $0x68] sm:$0xff]  ;;  %v3680_v21 = vld [vmem:[%s6923_s17 + $0x70] sm:$0xff]  ;;  %v3681_v23 = vld [vmem:[%s6923_s17 + $0x78] sm:$0xff] }
 0xaf2   :  { %4737 = vmatpush1.bf16.msra.mxu0 %v4736_v34  ;;  %v4780_v34 = vpack.c.bf16 %v1787_v33, %v1786_v31  ;;  %v3653_v31 = vld [vmem:[%s6920_s14 + $0x70] sm:$0xff]  ;;  %v3654_v33 = vld [vmem:[%s6920_s14 + $0x78] sm:$0xff] }
 0xaf3   :  { %4755 = vmatprep.subr.bf16.mxu0 %v4754_v49 }
 0xb72   :  { %v1563_v38 = vpop.xlane.xlu0 %1562 }
 0xb73   :  { %v1564_v39 = vmul.f32 0.015625, %v1563_v38  ;;  %v4752_v38 = vpack.c.bf16 %v1685_v27, %v1683_v36  ;;  %v1804_v36 = vld [vmem:[%s6930_s24 + $0xf0] sm:$0xff]  ;;  %v1805_v27 = vld [vmem:[%s6930_s24 + $0xf8] sm:$0xff] }
 0xb75   :  { %v6095_v40 = vsub.f32 %v6090_v37, %v1564_v39  ;;  %4753 = vmatpush1.bf16.msra.mxu1 %v4752_v38  ;;  %v4782_v38 = vpack.c.bf16 %v1805_v27, %v1804_v36  ;;  %v4796_v36 = vpack.c.bf16 %v3654_v33, %v3653_v31  ;;  %v3672_v27 = vld [vmem:[%s6922_s16 + $0x78] sm:$0xff] }
 0xb76   :  { %4786 = vmatprep.subr.bf16.mxu1 %v5371_v12 }
 0xb77   :  { %v1566_v41 = vmul.f32 %v6095_v40, %v6095_v40 }
 0xb79   :  { %v1567_v30 = vsel %vm270_vm0, %v1566_v41, 0.0 }
 0xb7a   :  { %1568 = vadd.xlane.f32.xlu1 %v1567_v30 }
 0xc07   :  { %v1569_v39 = vpop.xlane.xlu1 %1568 }
 0xc08   :  { %v1570_v41 = vmul.f32 0.015625, %v1569_v39  ;;  %v1788_v39 = vld [vmem:[%s6930_s24 + $0x70] sm:$0xff] }
 0xc0a   :  { %v1571_v30 = vadd.f32 1e-05, %v1570_v41  ;;  %v1789_v41 = vld [vmem:[%s6930_s24 + $0x78] sm:$0xff] }
 0xc0c   :  { %5004 = vrsqrt.f32 %v1571_v30  ;;  %v4784_v30 = vpack.c.bf16 %v1789_v41, %v1788_v39 }
 0xc16   :  { %v5005_v0 = vpop.eup %5004 }
 0xc17   :  { %v1573_v45 = vmul.f32 %v5005_v0, %v6095_v40  ;;  %v1774_v40 = vld [vmem:[%s6930_s24] sm:$0xff] }
 0xc18   :  { %v4756_v51 = vpack.c.bf16 %v1775_v50, %v1774_v40 }
 0xc19   :  { %v1580_v46 = vmul.f32 %v3640_v43, %v1573_v45 }
 0xc1b   :  { %3641 = vmatmul.mubr.msk.f32.vlgmr.msra.gmra.mrb[30].mxu0 %vm270_vm0, %v1580_v46  ;;  %3642 = vmatmul.mubr.msk.f32.vlgmr.msra.gmra.mrb[30].mxu1 %vm270_vm0, %v1580_v46 }
 0xc1c   :  { %4365 = vmatprep.mubr.msk.f32.mxu1 %vm5372_vm1, %v5373_v32  ;;  %4757 = vmatpush3.bf16.msra.mxu0 %v4756_v51 }
 0xc1d   :  { %4759 = vmatprep.subr.bf16.mxu0 %v4758_v54 }
 0xc20   :  { %4761 = vmatpush3.bf16.msra.mxu0 %v4760_v57 }
 0xc21   :  { %4763 = vmatprep.subr.bf16.mxu0 %v4762_v60 }
 0xc24   :  { %4765 = vmatpush3.bf16.msra.mxu0 %v4764_v63 }
 0xc25   :  { %4767 = vmatprep.subr.bf16.mxu0 %v4766_v3 }
 0xc28   :  { %4769 = vmatpush3.bf16.msra.mxu0 %v4768_v7  ;;  %v3665_v7 = vld [vmem:[%s6922_s16 + $0x40] sm:$0xff] }
 0xc29   :  { %4771 = vmatprep.subr.bf16.mxu0 %v4770_v10  ;;  %v4811_v10 = vpack.c.bf16 %v3666_v9, %v3665_v7  ;;  %v3675_v9 = vld [vmem:[%s6923_s17 + $0x48] sm:$0xff] }
 0xc2c   :  { %4773 = vmatpush3.bf16.msra.mxu0 %v4772_v14  ;;  %v3667_v14 = vld [vmem:[%s6922_s16 + $0x50] sm:$0xff] }
 0xc2d   :  { %4775 = vmatprep.subr.bf16.mxu0 %v4774_v20  ;;  %v4814_v20 = vpack.c.bf16 %v3668_v19, %v3667_v14  ;;  %v4826_v14 = vpack.c.bf16 %v3677_v13, %v3676_v11  ;;  %v3679_v19 = vld [vmem:[%s6923_s17 + $0x68] sm:$0xff] }
 0xc30   :  { %4777 = vmatpush3.bf16.msra.mxu0 %v4776_v24  ;;  %v3669_v24 = vld [vmem:[%s6922_s16 + $0x60] sm:$0xff] }
 0xc31   :  { %4779 = vmatprep.subr.bf16.mxu0 %v4778_v29  ;;  %v4817_v29 = vpack.c.bf16 %v3670_v28, %v3669_v24  ;;  %v4832_v24 = vpack.c.bf16 %v3681_v23, %v3680_v21  ;;  %v5047_v23 = vld [vmem:[#allocation14] sm:$0xff] }
 0xc34   :  { %4781 = vmatpush3.bf16.msra.mxu0 %v4780_v34  ;;  %v3671_v34 = vld [vmem:[%s6922_s16 + $0x70] sm:$0xff] }
 0xc35   :  { %4783 = vmatprep.subr.bf16.mxu0 %v4782_v38  ;;  %v4820_v38 = vpack.c.bf16 %v3672_v27, %v3671_v34  ;;  %v5038_v34 = vld [vmem:[#allocation2] sm:$0xff]  ;;  %v5039_v27 = vld [vmem:[#allocation5] sm:$0xff] }
 0xc38   :  { %4785 = vmatpush3.bf16.msra.mxu0 %v4784_v30 }
 0xc39   :  { %4810 = vmatprep.subr.bf16.mxu0 %v5371_v12 }
 0xcee   :  { %v1666_v0 = vpop.f32.mrb[30].mxu0  ;;  %v1753_v43 = vpop.f32.mrb[30].mxu1 }
 0xcef   :  { %v3643_v45 = vmul.f32 -1.442695, %v1753_v43  ;;  %v1668_v46 = vpop.f32.mrb[31].mxu0  ;;  %v1755_v48 = vpop.f32.mrb[31].mxu1 }
 0xcf0   :  { %v3644_v42 = vmul.f32 -1.442695, %v1755_v48 }
 0xcf1   :  { %5006 = vpow2.f32 %v3643_v45  ;;  %v3683_v45 = vld [vmem:[%s6924_s18 + $0x40] sm:$0xff] }
 0xcf2   :  { %5008 = vpow2.f32 %v3644_v42  ;;  %v3646_v42 = vld [vmem:[%s6919_s13 + $0x1] ss:$0 sm:$0xff] }
 0xcfb   :  { %v5007_v49 = vpop.eup %5006 }
 0xcfc   :  { %v5009_v40 = vpop.eup %5008  ;;  %v1764_v50 = vadd.f32 1.0, %v5007_v49 }
 0xcfd   :  { %v1765_v51 = vadd.f32 1.0, %v5009_v40 }
 0xcfe   :  { %5010 = vrcp.f32 %v1764_v50 }
 0xcff   :  { %5012 = vrcp.f32 %v1765_v51  ;;  %v3658_v51 = vld [vmem:[%s6921_s15 + $0x50] sm:$0xff] }
 0xd08   :  { %v5011_v47 = vpop.eup %5010 }
 0xd09   :  { %v5013_v53 = vpop.eup %5012  ;;  %v1770_v54 = vmul.f32 %v5011_v47, %v1753_v43  ;;  %v3657_v43 = vld [vmem:[%s6921_s15 + $0x48] sm:$0xff] }
 0xd0a   :  { %v1771_v55 = vmul.f32 %v5013_v53, %v1755_v48  ;;  %v3659_v53 = vld [vmem:[%s6921_s15 + $0x58] sm:$0xff] }
 0xd0b   :  { %v1772_v56 = vmul.f32 %v1770_v54, %v1666_v0  ;;  %v3656_v0 = vld [vmem:[%s6921_s15 + $0x40] sm:$0xff]  ;;  %v3685_v54 = vld [vmem:[%s6924_s18 + $0x50] sm:$0xff] }
 0xd0c   :  { %v1773_v57 = vmul.f32 %v1771_v55, %v1668_v46  ;;  %v3684_v46 = vld [vmem:[%s6924_s18 + $0x48] sm:$0xff]  ;;  %v4799_v40 = vpack.c.bf16 %v3657_v43, %v3656_v0  ;;  %v3686_v55 = vld [vmem:[%s6924_s18 + $0x58] sm:$0xff] }
 0xd0d   :  { %v4835_v50 = vpack.c.bf16 %v3684_v46, %v3683_v45  ;;  %v5041_v43 = vld [vmem:[#allocation8] sm:$0xff] }
 0xd0e   :  { %1870 = vmatprep.mubr.f32.mxu0 %v1773_v57  ;;  %v4838_v57 = vpack.c.bf16 %v3686_v55, %v3685_v54  ;;  %v5042_v54 = vld [vmem:[%s6981_s6] sm:$0xff]  ;;  %v5043_v55 = vld [vmem:[%s6981_s6 + $0x8] sm:$0xff] }
 0xd0f   :  { %1871 = vmatmul.mubr.f32.vlgmr.msra.gmra.mrb[32].mxu0 %v1772_v56  ;;  %v4802_v56 = vpack.c.bf16 %v3659_v53, %v3658_v51 }
 0xd10   :  { %4403 = vmatprep.mubr.msk.f32.mxu0 %vm5372_vm1, %v5373_v32  ;;  %4812 = vmatpush3.bf16.msra.mxu0 %v4811_v10 }
 0xd11   :  { %4813 = vmatprep.subr.bf16.mxu0 %v5371_v12 }
 0xd14   :  { %4815 = vmatpush3.bf16.msra.mxu0 %v4814_v20 }
 0xd15   :  { %4816 = vmatprep.subr.bf16.mxu0 %v5371_v12 }
 0xd18   :  { %4818 = vmatpush3.bf16.msra.mxu0 %v4817_v29 }
 0xd19   :  { %4819 = vmatprep.subr.bf16.mxu0 %v5371_v12 }
 0xd1c   :  { %4821 = vmatpush3.bf16.msra.mxu0 %v4820_v38 }
 0xd1d   :  { %4834 = vmatprep.subr.bf16.mxu0 %v5371_v12 }
 0xde2   :  { %v3951_v58 = vpop.f32.mrb[32].mxu0 }
 0xde3   :  { %v3952_v59 = vpop.f32.mrb[33].mxu0 }
 0xde4   :  { %v3953_v60 = vadd.f32 %v3952_v59, %v3951_v58  ;;  %v3660_v58 = vld [vmem:[%s6921_s15 + $0x60] sm:$0xff]  ;;  %v3661_v59 = vld [vmem:[%s6921_s15 + $0x68] sm:$0xff] }
 0xde6   :  { %v6302_v61 = vadd.f32 %v3953_v60, %v6090_v37  ;;  %v3648_v37 = vld [vmem:[%s6920_s14 + $0x48] sm:$0xff]  ;;  %v3687_v60 = vld [vmem:[%s6924_s18 + $0x60] sm:$0xff] }
 0xde7   :  { %v4787_v35 = vpack.c.bf16 %v3648_v37, %v3647_v5  ;;  %v3690_v5 = vld [vmem:[%s6924_s18 + $0x78] sm:$0xff] }
 0xde8   :  { %v1879_v62 = vsel %vm270_vm0, %v6302_v61, 0.0 }
 0xde9   :  { %1880 = vadd.xlane.f32.xlu0 %v1879_v62  ;;  %4788 = vmatpush3.bf16.msra.mxu1 %v4787_v35  ;;  %v3688_v62 = vld [vmem:[%s6924_s18 + $0x68] sm:$0xff]  ;;  %v3674_v35 = vld [vmem:[%s6923_s17 + $0x40] sm:$0xff] }
 0xdea   :  { %4789 = vmatprep.subr.bf16.mxu1 %v5371_v12  ;;  %v4823_v10 = vpack.c.bf16 %v3675_v9, %v3674_v35 }
 0xded   :  { %4791 = vmatpush3.bf16.msra.mxu1 %v4790_v18  ;;  %v3678_v18 = vld [vmem:[%s6923_s17 + $0x60] sm:$0xff] }
 0xdee   :  { %4792 = vmatprep.subr.bf16.mxu1 %v5371_v12  ;;  %v4829_v20 = vpack.c.bf16 %v3679_v19, %v3678_v18 }
 0xdf1   :  { %4794 = vmatpush3.bf16.msra.mxu1 %v4793_v26 }
 0xdf2   :  { %4795 = vmatprep.subr.bf16.mxu1 %v5371_v12 }
 0xdf5   :  { %4797 = vmatpush3.bf16.msra.mxu1 %v4796_v36 }
 0xdf6   :  { %4798 = vmatprep.subr.bf16.mxu1 %v5371_v12 }
 0xe76   :  { %v1881_v63 = vpop.xlane.xlu0 %1880 }
 0xe77   :  { %v1882_v1 = vmul.f32 0.015625, %v1881_v63  ;;  %v4805_v63 = vpack.c.bf16 %v3661_v59, %v3660_v58  ;;  %v5046_v58 = vld [vmem:[%s6981_s6 + $0x20] sm:$0xff] }
 0xe79   :  { %v1883_v2 = vsub.f32 %v6302_v61, %v1882_v1  ;;  %v4841_v1 = vpack.c.bf16 %v3688_v62, %v3687_v60 }
 0xe7b   :  { %v1884_v3 = vmul.f32 %v1883_v2, %v1883_v2 }
 0xe7d   :  { %v1885_v4 = vsel %vm270_vm0, %v1884_v3, 0.0  ;;  %v3663_v3 = vld [vmem:[%s6921_s15 + $0x78] sm:$0xff] }
 0xe7e   :  { %1886 = vadd.xlane.f32.xlu1 %v1885_v4  ;;  %v3689_v4 = vld [vmem:[%s6924_s18 + $0x70] sm:$0xff] }
 0xe7f   :  { %v4844_v7 = vpack.c.bf16 %v3690_v5, %v3689_v4 }
 0xf0b   :  { %v1887_v39 = vpop.xlane.xlu1 %1886 }
 0xf0c   :  { %v1888_v41 = vmul.f32 0.015625, %v1887_v39 }
 0xf0e   :  { %v1889_v30 = vadd.f32 1e-05, %v1888_v41 }
 0xf10   :  { %5014 = vrsqrt.f32 %v1889_v30  ;;  %v5040_v30 = vld [vmem:[#allocation7] sm:$0xff] }
 0xf1a   :  { %v5015_v48 = vpop.eup %5014 }
 0xf1b   :  { %v1891_v49 = vmul.f32 %v5015_v48, %v1883_v2  ;;  %v3662_v2 = vld [vmem:[%s6921_s15 + $0x70] sm:$0xff] }
 0xf1c   :  { %v4808_v37 = vpack.c.bf16 %v3663_v3, %v3662_v2 }
 0xf1d   :  { %v1898_v47 = vmul.f32 %v3646_v42, %v1891_v49 }
 0xf1f   :  { %4366 = vmatmul.mubr.msk.f32.vlgmr.msra.gmra.mrb[32].mxu1 %vm270_vm0, %v1898_v47  ;;  %4404 = vmatmul.mubr.msk.f32.vlgmr.msra.gmra.mrb[34].mxu0 %vm270_vm0, %v1898_v47 }
 0xf20   :  { %4800 = vmatpush3.bf16.msra.mxu1 %v4799_v40  ;;  %4836 = vmatpush3.bf16.msra.mxu0 %v4835_v50 }
 0xf21   :  { %4801 = vmatprep.subr.bf16.mxu1 %v5371_v12  ;;  %4837 = vmatprep.subr.bf16.mxu0 %v5371_v12 }
 0xf22   :  { %4384 = vmatprep.mubr.msk.f32.mxu1 %vm5372_vm1, %v5373_v32  ;;  %4441 = vmatprep.mubr.msk.f32.mxu0 %vm5372_vm1, %v5373_v32 }
 0xf24   :  { %4803 = vmatpush3.bf16.msra.mxu1 %v4802_v56  ;;  %4839 = vmatpush3.bf16.msra.mxu0 %v4838_v57  ;;  %v5044_v56 = vld [vmem:[%s6981_s6 + $0x10] sm:$0xff]  ;;  %v5045_v57 = vld [vmem:[%s6981_s6 + $0x18] sm:$0xff] }
 0xf25   :  { %4804 = vmatprep.subr.bf16.mxu1 %v5371_v12  ;;  %4840 = vmatprep.subr.bf16.mxu0 %v5371_v12 }
 0xf28   :  { %4806 = vmatpush3.bf16.msra.mxu1 %v4805_v63  ;;  %4842 = vmatpush3.bf16.msra.mxu0 %v4841_v1 }
 0xf29   :  { %4807 = vmatprep.subr.bf16.mxu1 %v5371_v12  ;;  %4843 = vmatprep.subr.bf16.mxu0 %v5371_v12 }
 0xf2c   :  { %4809 = vmatpush3.bf16.msra.mxu1 %v4808_v37  ;;  %4845 = vmatpush3.bf16.msra.mxu0 %v4844_v7 }
 0xf2d   :  { %4822 = vmatprep.subr.bf16.mxu1 %v5371_v12  ;;  %4463 = vmatprep.subr.mxu0 %v5373_v32 }
 0xf2f   :  { %4385 = vmatmul.mubr.msk.f32.vlgmr.msra.gmra.mrb[34].mxu1 %vm270_vm0, %v1898_v47  ;;  %4442 = vmatmul.mubr.msk.f32.vlgmr.msra.gmra.mrb[36].mxu0 %vm270_vm0, %v1898_v47 }
 0xf30   :  { %4824 = vmatpush3.bf16.msra.mxu1 %v4823_v10  ;;  %4422 = vmatprep.mubr.msk.f32.mxu1 %vm5372_vm1, %v5373_v32 }
 0xf31   :  { %4825 = vmatprep.subr.bf16.mxu1 %v5371_v12  ;;  %4465 = vmatprep.mubr.msk.f32.mxu0 %vm5372_vm1, %v5373_v32 }
 0xf34   :  { %4827 = vmatpush3.bf16.msra.mxu1 %v4826_v14 }
 0xf35   :  { %4828 = vmatprep.subr.bf16.mxu1 %v5371_v12 }
 0xf38   :  { %4830 = vmatpush3.bf16.msra.mxu1 %v4829_v20 }
 0xf39   :  { %4831 = vmatprep.subr.bf16.mxu1 %v5371_v12 }
 0xf3c   :  { %4833 = vmatpush3.bf16.msra.mxu1 %v4832_v24 }
 0xf3d   :  { %4846 = vmatprep.subr.bf16.mxu1 %v5371_v12 }
 0xf3f   :  { %4423 = vmatmul.mubr.msk.f32.vlgmr.msra.gmra.mrb[36].mxu1 %vm270_vm0, %v1898_v47 }
 0xf40   :  { %4848 = vmatpush3.bf16.msra.mxu1 %v5836_v8  ;;  %4460 = vmatprep.mubr.msk.f32.mxu1 %vm5372_vm1, %v5373_v32 }
 0xf41   :  { %4849 = vmatprep.subr.bf16.mxu1 %v5371_v12 }
 0xf44   :  { %4851 = vmatpush3.bf16.msra.mxu1 %v5852_v15 }
 0xf45   :  { %4852 = vmatprep.subr.bf16.mxu1 %v5371_v12 }
 0xf48   :  { %4854 = vmatpush3.bf16.msra.mxu1 %v5872_v22 }
 0xf49   :  { %4855 = vmatprep.subr.bf16.mxu1 %v5371_v12 }
 0xf4c   :  { %4857 = vmatpush3.bf16.msra.mxu1 %v5876_v25 }
 0xf4d   :  { %4858 = vmatprep.subr.bf16.mxu1 %v5371_v12 }
 0xff2   :  { %v1977_v26 = vpop.f32.mrb[32].mxu1  ;;  %v2138_v28 = vpop.f32.mrb[34].mxu0 }
 0xff3   :  { %v4367_v8 = vpop.f32.mrb[33].mxu1  ;;  %v4405_v29 = vpop.f32.mrb[35].mxu0  ;;  %v1981_v36 = vmul.f32 %v5038_v34, %v1977_v26  ;;  %v2142_v0 = vmul.f32 %v5040_v30, %v2138_v28  ;;  %v3694_v26 = vld [vmem:[%s6982_s9 + $0x30] sm:$0xff]  ;;  %v3696_v30 = vld [vmem:[%s6982_s9 + $0x40] sm:$0xff] }
 0xff4   :  { %v5048_v8 = vld [vmem:[#allocation14 + $0x8] sm:$0xff] }
0x1002   :  { %v2057_v31 = vpop.f32.mrb[34].mxu1  ;;  %v2299_v33 = vpop.f32.mrb[36].mxu0 }
0x1003   :  { %v2061_v15 = vmul.f32 %v5039_v27, %v2057_v31  ;;  %v4386_v38 = vpop.f32.mrb[35].mxu1  ;;  %v4443_v39 = vpop.f32.mrb[37].mxu0 }
0x1004   :  { %v5049_v39 = vld [vmem:[#allocation14 + $0x10] sm:$0xff] }
0x1005   :  { %v6474_v41 = vadd.f32 %v2061_v15, %v1981_v36 }
0x1007   :  { %v2303_v22 = vmul.f32 %v6474_v41, %v6474_v41 }
0x1009   :  { %4461 = vmatmul.mubr.msk.f32.vlgmr.msra.gmra.mrb[38].mxu1 %vm270_vm0, %v2303_v22 }
0x100a   :  { %4860 = vmatpush3.bf16.msra.mxu1 %v5888_v52  ;;  %4484 = vmatprep.mubr.msk.f32.mxu1 %vm5372_vm1, %v5373_v32 }
0x100b   :  { %4861 = vmatprep.subr.bf16.mxu1 %v5371_v12 }
0x1012   :  { %v2218_v25 = vpop.f32.mrb[36].mxu1 }
0x1013   :  { %v2222_v45 = vmul.f32 %v5041_v43, %v2218_v25  ;;  %v4424_v46 = vpop.f32.mrb[37].mxu1  ;;  %v3695_v25 = vld [vmem:[%s6982_s9 + $0x38] sm:$0xff]  ;;  %v5050_v43 = vld [vmem:[#allocation14 + $0x18] sm:$0xff] }
0x1015   :  { %v2223_v48 = vadd.f32 %v2222_v45, %v2142_v0 }
0x1017   :  { %v2381_v42 = vmul.f32 %v2223_v48, %v2223_v48 }
0x1019   :  { %v2382_v49 = vsel %vm770_vm2, %v2381_v42, 0.0 }
0x101a   :  { %2383 = vadd.xlane.f32.xlu0 %v2382_v49 }
0x10a7   :  { %v2384_v40 = vpop.xlane.xlu0 %2383 }
0x10a8   :  { %v2385_v50 = vmax.f32 %v2384_v40, 1e-24 }
0x10aa   :  { %5016 = vrsqrt.f32 %v2385_v50 }
0x10b4   :  { %v5017_v51 = vpop.eup %5016 }
0x10b5   :  { %v2387_v47 = vmul.f32 %v5017_v51, %v2223_v48  ;;  %v5051_v51 = vld [vmem:[#allocation14 + $0x20] sm:$0xff] }
0x10b7   :  { %v2388_v53 = vmul.f32 4.0, %v2387_v47 }
0x10b9   :  { %4464 = vmatpush3.msra.mxu0 %v2388_v53  ;;  %v3697_v53 = vld [vmem:[%s6982_s9 + $0x48] sm:$0xff] }
0x10ba   :  { %4466 = vmatmul.mubr.msk.f32.vlgmr.msra.gmra.mrb[38].mxu0 %vm783_vm3, %v5042_v54  ;;  %4499 = vmatprep.subr.mxu0 %v5373_v32 }
0x10bb   :  { %4500 = vmatpush3.msra.mxu0 %v2299_v33  ;;  %4468 = vmatprep.mubr.msk.f32.mxu0 %vm5372_vm1, %v5373_v32 }
0x10bc   :  { %4864 = vmatprep.subr.bf16.mxu0 %v5371_v12 }
0x10be   :  { %4469 = vmatmul.mubr.msk.f32.gmra.mrb[40].mxu0 %vm783_vm3, %v5043_v55 }
0x10bf   :  { %4471 = vmatprep.mubr.msk.f32.mxu0 %vm5372_vm1, %v5373_v32 }
0x10c2   :  { %4472 = vmatmul.mubr.msk.f32.gmra.mrb[42].mxu0 %vm783_vm3, %v5044_v56 }
0x10c3   :  { %4474 = vmatprep.mubr.msk.f32.mxu0 %vm5372_vm1, %v5373_v32 }
0x10c6   :  { %4475 = vmatmul.mubr.msk.f32.gmra.mrb[44].mxu0 %vm783_vm3, %v5045_v57 }
0x10c7   :  { %4477 = vmatprep.mubr.msk.f32.mxu0 %vm5372_vm1, %v5373_v32 }
0x10ca   :  { %4478 = vmatmul.mubr.msk.f32.gmra.mrb[46].mxu0 %vm783_vm3, %v5046_v58 }
0x10cb   :  { %4501 = vmatprep.mubr.msk.f32.mxu0 %vm5372_vm1, %v5373_v32 }
0x10ce   :  { %4502 = vmatmul.mubr.msk.f32.vlgmr.msra.gmra.mrb[48].mxu0 %vm783_vm3, %v5042_v54 }
0x10cf   :  { %4504 = vmatprep.mubr.msk.f32.mxu0 %vm5372_vm1, %v5373_v32 }
0x10d2   :  { %4505 = vmatmul.mubr.msk.f32.gmra.mrb[50].mxu0 %vm783_vm3, %v5043_v55 }
0x10d3   :  { %4507 = vmatprep.mubr.msk.f32.mxu0 %vm5372_vm1, %v5373_v32 }
0x10d6   :  { %4508 = vmatmul.mubr.msk.f32.gmra.mrb[52].mxu0 %vm783_vm3, %v5044_v56 }
0x10d7   :  { %4510 = vmatprep.mubr.msk.f32.mxu0 %vm5372_vm1, %v5373_v32 }
0x10da   :  { %4511 = vmatmul.mubr.msk.f32.gmra.mrb[54].mxu0 %vm783_vm3, %v5045_v57 }
0x10db   :  { %4513 = vmatprep.mubr.msk.f32.mxu0 %vm5372_vm1, %v5373_v32 }
0x10dc   :  { %v6528_v59 = vpop.f32.mrb[38].mxu1 }
0x10dd   :  { %v4462_v60 = vpop.f32.mrb[39].mxu1  ;;  %v2377_v33 = vmax.f32 %v6528_v59, 1e-24 }
0x10de   :  { %4514 = vmatmul.mubr.msk.f32.gmra.mrb[56].mxu0 %vm783_vm3, %v5046_v58  ;;  %v5052_v58 = vld [vmem:[#allocation16] sm:$0xff] }
0x10df   :  { %4545 = vmatprep.mubr.msk.f32.mxu0 %vm5372_vm1, %v5373_v32  ;;  %5018 = vrsqrt.f32 %v2377_v33 }
0x10e9   :  { %v5019_v54 = vpop.eup %5018 }
0x10ea   :  { %v2379_v56 = vmul.f32 %v5019_v54, %v6474_v41  ;;  %v3708_v41 = vld [vmem:[%s6918_s12 + $0x28] sm:$0xff] }
0x10ec   :  { %v2380_v57 = vmul.f32 4.0, %v2379_v56 }
0x118d   :  { %v2461_v62 = vpop.f32.mrb[38].mxu0 }
0x118e   :  { %v4467_v63 = vpop.f32.mrb[39].mxu0  ;;  %4485 = vmatmul.mubr.msk.f32.vlgmr.msra.gmra.mrb[40].mxu1 %vm770_vm2, %v2461_v62 }
0x118f   :  { %4487 = vmatprep.mubr.msk.f32.mxu1 %vm5372_vm1, %v5373_v32  ;;  %4863 = vmatpush3.bf16.msra.mxu1 %v5888_v52 }
0x1190   :  { %4872 = vmatprep.subr.bf16.mxu1 %v5371_v12 }
0x1191   :  { %v2466_v1 = vpop.f32.mrb[40].mxu0 }
0x1192   :  { %v4470_v2 = vpop.f32.mrb[41].mxu0  ;;  %4488 = vmatmul.mubr.msk.f32.gmra.mrb[42].mxu1 %vm770_vm2, %v2466_v1 }
0x1193   :  { %4490 = vmatprep.mubr.msk.f32.mxu1 %vm5372_vm1, %v5373_v32 }
0x1195   :  { %v2471_v3 = vpop.f32.mrb[42].mxu0 }
0x1196   :  { %v4473_v4 = vpop.f32.mrb[43].mxu0  ;;  %4491 = vmatmul.mubr.msk.f32.gmra.mrb[44].mxu1 %vm770_vm2, %v2471_v3  ;;  %v3709_v3 = vld [vmem:[%s6918_s12 + $0x30] sm:$0xff] }
0x1197   :  { %4493 = vmatprep.mubr.msk.f32.mxu1 %vm5372_vm1, %v5373_v32 }
0x1199   :  { %v2476_v5 = vpop.f32.mrb[44].mxu0 }
0x119a   :  { %v4476_v37 = vpop.f32.mrb[45].mxu0  ;;  %4494 = vmatmul.mubr.msk.f32.gmra.mrb[46].mxu1 %vm770_vm2, %v2476_v5 }
0x119b   :  { %4496 = vmatprep.mubr.msk.f32.mxu1 %vm5372_vm1, %v5373_v32 }
0x119d   :  { %v2481_v52 = vpop.f32.mrb[46].mxu0 }
0x119e   :  { %v4479_v7 = vpop.f32.mrb[47].mxu0  ;;  %4497 = vmatmul.mubr.msk.f32.gmra.mrb[48].mxu1 %vm770_vm2, %v2481_v52 }
0x119f   :  { %4520 = vmatprep.mubr.msk.f32.mxu1 %vm5372_vm1, %v5373_v32  ;;  %v3710_v7 = vld [vmem:[%s6918_s12 + $0x38] sm:$0xff] }
0x11a1   :  { %v2672_v35 = vpop.f32.mrb[48].mxu0 }
0x11a2   :  { %4521 = vmatmul.mubr.msk.f32.vlgmr.msra.gmra.mrb[50].mxu1 %vm770_vm2, %v2672_v35  ;;  %v4503_v9 = vpop.f32.mrb[49].mxu0 }
0x11a3   :  { %4523 = vmatprep.mubr.msk.f32.mxu1 %vm5372_vm1, %v5373_v32  ;;  %4874 = vmatpush3.bf16.msra.mxu1 %v6019_v6 }
0x11a4   :  { %4875 = vmatprep.subr.bf16.mxu1 %v5371_v12 }
0x11a5   :  { %v2677_v10 = vpop.f32.mrb[50].mxu0 }
0x11a6   :  { %v4506_v11 = vpop.f32.mrb[51].mxu0  ;;  %4524 = vmatmul.mubr.msk.f32.gmra.mrb[52].mxu1 %vm770_vm2, %v2677_v10 }
0x11a7   :  { %4526 = vmatprep.mubr.msk.f32.mxu1 %vm5372_vm1, %v5373_v32  ;;  %4877 = vmatpush3.bf16.msra.mxu1 %v6024_v16 }
0x11a8   :  { %4556 = vmatprep.subr.mxu1 %v5373_v32 }
0x11a9   :  { %v2682_v13 = vpop.f32.mrb[52].mxu0 }
0x11aa   :  { %v4509_v14 = vpop.f32.mrb[53].mxu0  ;;  %4527 = vmatmul.mubr.msk.f32.gmra.mrb[54].mxu1 %vm770_vm2, %v2682_v13  ;;  %v3711_v13 = vld [vmem:[%s6918_s12 + $0x40] sm:$0xff] }
0x11ab   :  { %4529 = vmatprep.mubr.msk.f32.mxu1 %vm5372_vm1, %v5373_v32  ;;  %4557 = vmatpush3.msra.mxu1 %v6028_v17  ;;  %v3693_v17 = vld [vmem:[%s6982_s9 + $0x28] sm:$0xff] }
0x11ac   :  { %4884 = vmatprep.subr.bf16.mxu1 %v5371_v12 }
0x11ad   :  { %v2687_v18 = vpop.f32.mrb[54].mxu0 }
0x11ae   :  { %v4512_v19 = vpop.f32.mrb[55].mxu0  ;;  %4530 = vmatmul.mubr.msk.f32.gmra.mrb[56].mxu1 %vm770_vm2, %v2687_v18 }
0x11af   :  { %4532 = vmatprep.mubr.msk.f32.mxu1 %vm5372_vm1, %v5373_v32 }
0x11b1   :  { %v2692_v20 = vpop.f32.mrb[56].mxu0 }
0x11b2   :  { %v4515_v6 = vpop.f32.mrb[57].mxu0  ;;  %4533 = vmatmul.mubr.msk.f32.gmra.mrb[58].mxu1 %vm770_vm2, %v2692_v20 }
0x11b3   :  { %4558 = vmatprep.mubr.msk.f32.mxu1 %vm5372_vm1, %v5373_v32 }
0x1261   :  { %v2566_v16 = vpop.f32.mrb[40].mxu1 }
0x1262   :  { %v4486_v21 = vpop.f32.mrb[41].mxu1  ;;  %v2590_v24 = vmul.f32 %v5047_v23, %v2566_v16 }
0x1264   :  { %v2595_v34 = vadd.f32 %v3693_v17, %v2590_v24  ;;  %v3712_v17 = vld [vmem:[%s6918_s12 + $0x48] sm:$0xff] }
0x1265   :  { %v2571_v28 = vpop.f32.mrb[42].mxu1 }
0x1266   :  { %v2591_v29 = vmul.f32 %v5048_v8, %v2571_v28  ;;  %v4489_v31 = vpop.f32.mrb[43].mxu1 }
0x1268   :  { %v2596_v36 = vadd.f32 %v3694_v26, %v2591_v29 }
0x1269   :  { %v2576_v27 = vpop.f32.mrb[44].mxu1 }
0x126a   :  { %v4865_v15 = vpack.c.bf16 %v2596_v36, %v2595_v34  ;;  %v4492_v38 = vpop.f32.mrb[45].mxu1  ;;  %v2592_v22 = vmul.f32 %v5049_v39, %v2576_v27  ;;  %v3731_v34 = vld [vmem:[%s6925_s19 + $0x40] sm:$0xff]  ;;  %v3732_v36 = vld [vmem:[%s6925_s19 + $0x48] sm:$0xff]  ;;  %v3733_v27 = vld [vmem:[%s6925_s19 + $0x50] sm:$0xff] }
0x126b   :  { %v3734_v38 = vld [vmem:[%s6925_s19 + $0x58] sm:$0xff] }
0x126c   :  { %4867 = vmatpush3.bf16.xpose.msk.msra.mxu0 %vm5990_vm4, %v4865_v15  ;;  %v2597_v48 = vadd.f32 %v3695_v25, %v2592_v22  ;;  %v4885_v15 = vpack.c.bf16 %v3732_v36, %v3731_v34  ;;  %v3735_v22 = vld [vmem:[%s6925_s19 + $0x60] sm:$0xff]  ;;  %v3736_v25 = vld [vmem:[%s6925_s19 + $0x68] sm:$0xff]  ;;  %v3765_v36 = vld [vmem:[%s6929_s23 + $0xb0] sm:$0xff] }
0x126d   :  { %v2581_v0 = vpop.f32.mrb[46].mxu1  ;;  %4868 = vmatprep.subr.bf16.mxu0 %v5371_v12  ;;  %v3763_v34 = vld [vmem:[%s6929_s23 + $0xa0] sm:$0xff] }
0x126e   :  { %v2593_v45 = vmul.f32 %v5050_v43, %v2581_v0  ;;  %v4495_v46 = vpop.f32.mrb[47].mxu1  ;;  %v3737_v0 = vld [vmem:[%s6925_s19 + $0x70] sm:$0xff] }
0x1270   :  { %v2598_v42 = vadd.f32 %v3696_v30, %v2593_v45  ;;  %v4891_v30 = vpack.c.bf16 %v3736_v25, %v3735_v22  ;;  %v3770_v25 = vld [vmem:[%s6929_s23 + $0xd8] sm:$0xff] }
0x1271   :  { %v2586_v49 = vpop.f32.mrb[48].mxu1 }
0x1272   :  { %v4869_v40 = vpack.c.bf16 %v2598_v42, %v2597_v48  ;;  %v4498_v50 = vpop.f32.mrb[49].mxu1  ;;  %v2594_v47 = vmul.f32 %v5051_v51, %v2586_v49 }
0x1274   :  { %4871 = vmatpush3.bf16.xpose.msk.msra.mxu0 %vm5990_vm4, %v4869_v40  ;;  %v2599_v55 = vadd.f32 %v3697_v53, %v2594_v47 }
0x1275   :  { %4543 = vmatprep.subr.mxu0 %v5373_v32  ;;  %v2777_v63 = vpop.f32.mrb[50].mxu1 }
0x1276   :  { %v2801_v1 = vmul.f32 %v5047_v23, %v2777_v63  ;;  %v4522_v2 = vpop.f32.mrb[51].mxu1  ;;  %v3740_v63 = vld [vmem:[#allocation17 + $0x1] ss:$0 sm:$0xff] }
0x1278   :  { %v2806_v5 = vadd.f32 %v3708_v41, %v2801_v1 }
0x1279   :  { %v2782_v4 = vpop.f32.mrb[52].mxu1 }
0x127a   :  { %v2802_v37 = vmul.f32 %v5048_v8, %v2782_v4  ;;  %v4525_v52 = vpop.f32.mrb[53].mxu1 }
0x127c   :  { %4544 = vmatpush3.xpose.msk.msra.mxu0 %vm270_vm0, %v2599_v55  ;;  %v2807_v9 = vadd.f32 %v3709_v3, %v2802_v37 }
0x127d   :  { %4878 = vmatprep.subr.bf16.mxu0 %v5371_v12  ;;  %v2787_v35 = vpop.f32.mrb[54].mxu1 }
0x127e   :  { %v2803_v10 = vmul.f32 %v5049_v39, %v2787_v35  ;;  %v4528_v11 = vpop.f32.mrb[55].mxu1  ;;  %v4879_v18 = vpack.c.bf16 %v2807_v9, %v2806_v5  ;;  %v4888_v39 = vpack.c.bf16 %v3734_v38, %v3733_v27  ;;  %v3745_v9 = vld [vmem:[%s6928_s22 + $0x98] sm:$0xff]  ;;  %v4918_v27 = vpack.c.bf16 %v3765_v36, %v3763_v34  ;;  %v3787_v34 = vld [vmem:[%s6930_s24 + $0x148] sm:$0xff] }
0x127f   :  { %4546 = vmatmul.mubr.msk.f32.vlgmr.msra.gmra.mrb[58].mxu0 %vm270_vm0, %v2380_v57  ;;  %v3753_v38 = vld [vmem:[%s6928_s22 + $0xd8] sm:$0xff] }
0x1280   :  { %4571 = vmatprep.mubr.msk.f32.mxu0 %vm5372_vm1, %v5373_v32  ;;  %v2808_v19 = vadd.f32 %v3710_v7, %v2803_v10  ;;  %4880 = vmatpush3.bf16.msra.mxu0 %v4879_v18  ;;  %v3760_v10 = vld [vmem:[%s6929_s23 + $0x88] sm:$0xff]  ;;  %v3744_v18 = vld [vmem:[%s6928_s22 + $0x90] sm:$0xff] }
0x1281   :  { %v2792_v14 = vpop.f32.mrb[56].mxu1  ;;  %4881 = vmatprep.subr.bf16.mxu0 %v5371_v12 }
0x1282   :  { %v2804_v20 = vmul.f32 %v5050_v43, %v2792_v14  ;;  %v4531_v6 = vpop.f32.mrb[57].mxu1  ;;  %v3738_v43 = vld [vmem:[%s6925_s19 + $0x78] sm:$0xff]  ;;  %v3742_v14 = vld [vmem:[%s6928_s22 + $0x80] sm:$0xff]  ;;  %s5317_s19 = scalar_lea.vmem %s3589_s20, 128 }
0x1283   :  { %v4894_v45 = vpack.c.bf16 %v3738_v43, %v3737_v0  ;;  %v3759_v6 = vld [vmem:[%s6929_s23 + $0x80] sm:$0xff]  ;;  %v3752_v0 = vld [vmem:[%s6928_s22 + $0xd0] sm:$0xff]  ;;  %p5318_p12 = scmp.ne.s32.totalorder %s3589_s20, %s5317_s19  ;;  %p5323_p0 = scmp.lt.s32.totalorder %s5317_s19, %s5317_s19 }
0x1284   :  { %v2809_v21 = vadd.f32 %v3711_v13, %v2804_v20  ;;  %v3762_v13 = vld [vmem:[%s6929_s23 + $0x98] sm:$0xff]  ;;  %v4898_v20 = vpack.c.bf16 %v3744_v18, %v3742_v14  ;;  %v3798_v14 = vld [vmem:[%s6930_s24 + $0x1a0] sm:$0xff]  ;;  %v3799_v18 = vld [vmem:[%s6930_s24 + $0x1a8] sm:$0xff] }
0x1285   :  { %v2797_v16 = vpop.f32.mrb[58].mxu1  ;;  %p5324_p1 = por %p5323_p0, %p5322_p13 }
0x1286   :  { %v2805_v23 = vmul.f32 %v5051_v51, %v2797_v16  ;;  %v4534_v24 = vpop.f32.mrb[59].mxu1  ;;  %v4882_v26 = vpack.c.bf16 %v2809_v21, %v2808_v19  ;;  %v4912_v19 = vpack.c.bf16 %v3762_v13, %v3760_v10  ;;  %v3761_v16 = vld [vmem:[%s6929_s23 + $0x90] sm:$0xff] }
0x1287   :  { %v4914_v21 = vpack.c.bf16 %v3761_v16, %v3759_v6  ;;  %v3749_v24 = vld [vmem:[%s6928_s22 + $0xb8] sm:$0xff]  ;;  %v3780_v10 = vld [vmem:[%s6930_s24 + $0x110] sm:$0xff]  ;;  %v3783_v6 = vld [vmem:[%s6930_s24 + $0x128] sm:$0xff]  ;;  %p5325_p2 = pnand %p5324_p1, %p5318_p12 }
0x1288   :  { %v2810_v28 = vadd.f32 %v3712_v17, %v2805_v23  ;;  %4883 = vmatpush3.bf16.msra.mxu0 %v4882_v26  ;;  %v3747_v23 = vld [vmem:[%s6928_s22 + $0xa8] sm:$0xff] }
0x1289   :  { %4569 = vmatprep.subr.mxu0 %v5373_v32  ;;  %v3764_v17 = vld [vmem:[%s6929_s23 + $0xa8] sm:$0xff]  ;;  %v4900_v26 = vpack.c.bf16 %v3749_v24, %v3747_v23  ;;  %v3801_v23 = vld [vmem:[%s6930_s24 + $0x1b8] sm:$0xff] }
0x128c   :  { %4570 = vmatpush3.msra.mxu0 %v2810_v28  ;;  %v3766_v28 = vld [vmem:[%s6929_s23 + $0xb8] sm:$0xff] }
0x1352   :  { %v2895_v44 = vpop.f32.mrb[58].mxu0 }
0x1353   :  { %v2896_v59 = vadd.f32 %v5052_v58, %v2895_v44  ;;  %v4547_v60 = vpop.f32.mrb[59].mxu0 }
0x1355   :  { %v2899_v62 = vsel %vm1302_vm5, %v2896_v59, -inf }
0x1356   :  { %2900 = vmax.xlane.f32.xlu1 %v2899_v62 }
0x13e3   :  { %v2901_v8 = vpop.xlane.xlu1 %2900 }
0x13e4   :  { %v2902_v29 = vsub.f32 %v2896_v59, %v2901_v8  ;;  %v3746_v8 = vld [vmem:[%s6928_s22 + $0xa0] sm:$0xff] }
0x13e6   :  { %v2903_v31 = vmul.f32 1.442695, %v2902_v29  ;;  %v3748_v29 = vld [vmem:[%s6928_s22 + $0xb0] sm:$0xff] }
0x13e8   :  { %5020 = vpow2.f32 %v2903_v31  ;;  %v4916_v31 = vpack.c.bf16 %v3766_v28, %v3764_v17  ;;  %v3784_v17 = vld [vmem:[%s6930_s24 + $0x130] sm:$0xff] }
0x13f2   :  { %v5021_v33 = vpop.eup %5020 }
0x13f3   :  { %4559 = vmatmul.mubr.msk.f32.vlgmr.msra.gmra.mrb[60].mxu1 %vm1302_vm5, %v5021_v33 }
0x13f4   :  { %4590 = vmatprep.mubr.msk.f32.mxu1 %vm5372_vm1, %v5373_v32  ;;  %4886 = vmatpush3.bf16.msra.mxu1 %v4885_v15  ;;  %v3751_v15 = vld [vmem:[%s6928_s22 + $0xc8] sm:$0xff] }
0x13f5   :  { %4887 = vmatprep.subr.bf16.mxu1 %v5371_v12  ;;  %v4904_v22 = vpack.c.bf16 %v3753_v38, %v3751_v15  ;;  %v3805_v15 = vld [vmem:[%s6930_s24 + $0x1d8] sm:$0xff] }
0x13f8   :  { %4889 = vmatpush3.bf16.msra.mxu1 %v4888_v39  ;;  %v3768_v39 = vld [vmem:[%s6929_s23 + $0xc8] sm:$0xff] }
0x13f9   :  { %4890 = vmatprep.subr.bf16.mxu1 %v5371_v12  ;;  %v4920_v43 = vpack.c.bf16 %v3770_v25, %v3768_v39  ;;  %v3788_v39 = vld [vmem:[%s6930_s24 + $0x150] sm:$0xff] }
0x13fc   :  { %4892 = vmatpush3.bf16.msra.mxu1 %v4891_v30  ;;  %v3750_v30 = vld [vmem:[%s6928_s22 + $0xc0] sm:$0xff] }
0x13fd   :  { %4893 = vmatprep.subr.bf16.mxu1 %v5371_v12 }
0x1400   :  { %4895 = vmatpush3.bf16.msra.mxu1 %v4894_v45  ;;  %v4906_v45 = vpack.c.bf16 %v3752_v0, %v3750_v30  ;;  %v3806_v30 = vld [vmem:[%s6930_s24 + $0x1e0] sm:$0xff]  ;;  %v3807_v0 = vld [vmem:[%s6930_s24 + $0x1e8] sm:$0xff] }
0x1401   :  { %4913 = vmatprep.subr.bf16.mxu1 %v4912_v19  ;;  %v4936_v19 = vpack.c.bf16 %v3799_v18, %v3798_v14  ;;  %v3500_v14 = vld [vmem:[%s6985_s26] sm:$0xff]  ;;  %v3501_v18 = vld [vmem:[%s6985_s26 + $0x8] sm:$0xff] }
0x14c6   :  { %v2974_v46 = vpop.f32.mrb[60].mxu1 }
0x14c7   :  { %v2975_v48 = vadd.f32 1e-30, %v2974_v46  ;;  %v4560_v42 = vpop.f32.mrb[61].mxu1  ;;  %v3767_v46 = vld [vmem:[%s6929_s23 + $0xc0] sm:$0xff] }
0x14c9   :  { %5022 = vrcp.f32 %v2975_v48  ;;  %v3769_v48 = vld [vmem:[%s6929_s23 + $0xd0] sm:$0xff] }
0x14ca   :  { %v4922_v42 = vpack.c.bf16 %v3769_v48, %v3767_v46  ;;  %v3791_v46 = vld [vmem:[%s6930_s24 + $0x168] sm:$0xff] }
0x14d3   :  { %v5023_v49 = vpop.eup %5022 }
0x14d4   :  { %v2979_v40 = vmul.f32 %v5023_v49, %v5021_v33  ;;  %v4902_v33 = vpack.c.bf16 %v3748_v29, %v3746_v8  ;;  %v3755_v49 = vld [vmem:[%s6928_s22 + $0xe8] sm:$0xff]  ;;  %v3802_v8 = vld [vmem:[%s6930_s24 + $0x1c0] sm:$0xff] }
0x14d5   :  { %v3803_v29 = vld [vmem:[%s6930_s24 + $0x1c8] sm:$0xff] }
0x14d6   :  { %4572 = vmatmul.mubr.msk.f32.vlgmr.msra.gmra.mrb[60].mxu0 %vm1302_vm5, %v2979_v40  ;;  %v3757_v40 = vld [vmem:[%s6928_s22 + $0xf8] sm:$0xff] }
0x14d7   :  { %3264 = vmatprep.mubr.f32.mxu0 %v5373_v32 }
0x15a9   :  { %v3049_v50 = vpop.f32.mrb[60].mxu0 }
0x15aa   :  { %v4573_v51 = vpop.f32.mrb[61].mxu0  ;;  %4591 = vmatmul.mubr.msk.f32.vlgmr.msra.gmra.mrb[62].mxu1 %vm270_vm0, %v3049_v50  ;;  %v3772_v50 = vld [vmem:[%s6929_s23 + $0xe8] sm:$0xff] }
0x15ab   :  { %3352 = vmatprep.mubr.f32.mxu1 %v5373_v32  ;;  %4915 = vmatpush1.bf16.msra.mxu1 %v4914_v21  ;;  %v4908_v51 = vpack.c.bf16 %v3757_v40, %v3755_v49  ;;  %v3800_v21 = vld [vmem:[%s6930_s24 + $0x1b0] sm:$0xff]  ;;  %v3809_v49 = vld [vmem:[%s6930_s24 + $0x1f8] sm:$0xff] }
0x15ac   :  { %4917 = vmatprep.subr.bf16.mxu1 %v4916_v31  ;;  %v4940_v24 = vpack.c.bf16 %v3801_v23, %v3800_v21  ;;  %v4944_v31 = vpack.c.bf16 %v3803_v29, %v3802_v8  ;;  %v3505_v21 = vld [vmem:[%s6985_s26 + $0x28] sm:$0xff] }
0x15af   :  { %4919 = vmatpush1.bf16.msra.mxu1 %v4918_v27  ;;  %v3804_v27 = vld [vmem:[%s6930_s24 + $0x1d0] sm:$0xff] }
0x15b0   :  { %4921 = vmatprep.subr.bf16.mxu1 %v4920_v43  ;;  %v4948_v38 = vpack.c.bf16 %v3805_v15, %v3804_v27  ;;  %v4952_v43 = vpack.c.bf16 %v3807_v0, %v3806_v30 }
0x15b3   :  { %4923 = vmatpush1.bf16.msra.mxu1 %v4922_v42  ;;  %v3808_v42 = vld [vmem:[%s6930_s24 + $0x1f0] sm:$0xff] }
0x15b4   :  { %v4956_v40 = vpack.c.bf16 %v3809_v49, %v3808_v42 }
0x167d   :  { %v3131_v47 = vpop.f32.mrb[62].mxu1 }
0x167e   :  { %v4592_v53 = vpop.f32.mrb[63].mxu1  ;;  %v3137_v54 = vsel %vm270_vm0, %v3131_v47, 0.0 }
0x167f   :  { %3138 = vadd.xlane.f32.xlu0 %v3137_v54  ;;  %v3754_v53 = vld [vmem:[%s6928_s22 + $0xe0] sm:$0xff]  ;;  %v3756_v54 = vld [vmem:[%s6928_s22 + $0xf0] sm:$0xff] }
0x170c   :  { %v3139_v55 = vpop.xlane.xlu0 %3138 }
0x170d   :  { %v3140_v56 = vmul.f32 0.015625, %v3139_v55 }
0x170f   :  { %v3141_v57 = vsub.f32 %v3131_v47, %v3140_v56  ;;  %v3774_v47 = vld [vmem:[%s6929_s23 + $0xf8] sm:$0xff]  ;;  %v4910_v56 = vpack.c.bf16 %v3756_v54, %v3754_v53 }
0x1710   :  { %v4924_v55 = vpack.c.bf16 %v3774_v47, %v3772_v50  ;;  %v3792_v50 = vld [vmem:[%s6930_s24 + $0x170] sm:$0xff] }
0x1711   :  { %v3142_v44 = vmul.f32 %v3141_v57, %v3141_v57 }
0x1712   :  { %4925 = vmatprep.subr.bf16.mxu1 %v4924_v55 }
0x1713   :  { %v3143_v58 = vsel %vm270_vm0, %v3142_v44, 0.0  ;;  %v3773_v44 = vld [vmem:[%s6929_s23 + $0xf0] sm:$0xff] }
0x1714   :  { %3144 = vadd.xlane.f32.xlu1 %v3143_v58 }
0x17a1   :  { %v3145_v59 = vpop.xlane.xlu1 %3144 }
0x17a2   :  { %v3146_v60 = vmul.f32 0.015625, %v3145_v59 }
0x17a4   :  { %v3147_v62 = vadd.f32 1e-05, %v3146_v60 }
0x17a6   :  { %5024 = vrsqrt.f32 %v3147_v62 }
0x17b0   :  { %v5025_v41 = vpop.eup %5024 }
0x17b1   :  { %v3149_v1 = vmul.f32 %v5025_v41, %v3141_v57  ;;  %v3771_v57 = vld [vmem:[%s6929_s23 + $0xe0] sm:$0xff] }
0x17b2   :  { %v4926_v58 = vpack.c.bf16 %v3773_v44, %v3771_v57 }
0x17b3   :  { %v3156_v2 = vmul.f32 %v3740_v63, %v3149_v1  ;;  %v3741_v63 = vld [vmem:[#allocation19 + $0x1] ss:$0 sm:$0xff] }
0x17b4   :  { %4927 = vmatpush1.bf16.msra.mxu1 %v4926_v58 }
0x17b5   :  { %v6654_v3 = vadd.f32 %v3156_v2, %v6302_v61  ;;  %v3743_v61 = vld [vmem:[%s6928_s22 + $0x88] sm:$0xff]  ;;  %4960 = vmatprep.subr.bf16.mxu1 %v5371_v12 }
0x17b6   :  { %v4896_v11 = vpack.c.bf16 %v3745_v9, %v3743_v61  ;;  %v3797_v61 = vld [vmem:[%s6930_s24 + $0x198] sm:$0xff] }
0x17b7   :  { %v3160_v4 = vsel %vm270_vm0, %v6654_v3, 0.0 }
0x17b8   :  { %3161 = vadd.xlane.f32.xlu0 %v3160_v4  ;;  %4897 = vmatprep.subr.bf16.mxu0 %v4896_v11  ;;  %v3794_v4 = vld [vmem:[%s6930_s24 + $0x180] sm:$0xff]  ;;  %v3781_v11 = vld [vmem:[%s6930_s24 + $0x118] sm:$0xff] }
0x17b9   :  { %4899 = vmatpush1.bf16.msra.mxu0 %v4898_v20  ;;  %v4934_v13 = vpack.c.bf16 %v3781_v11, %v3780_v10  ;;  %v3782_v20 = vld [vmem:[%s6930_s24 + $0x120] sm:$0xff] }
0x17ba   :  { %4901 = vmatprep.subr.bf16.mxu0 %v4900_v26  ;;  %v4938_v16 = vpack.c.bf16 %v3783_v6, %v3782_v20  ;;  %v3785_v26 = vld [vmem:[%s6930_s24 + $0x138] sm:$0xff] }
0x17bb   :  { %v4942_v28 = vpack.c.bf16 %v3785_v26, %v3784_v17  ;;  %v3503_v20 = vld [vmem:[%s6985_s26 + $0x18] sm:$0xff] }
0x17bc   :  { %v3507_v17 = vld [vmem:[%s6985_s26 + $0x38] sm:$0xff] }
0x17bd   :  { %4903 = vmatpush1.bf16.msra.mxu0 %v4902_v33  ;;  %v3786_v33 = vld [vmem:[%s6930_s24 + $0x140] sm:$0xff] }
0x17be   :  { %4905 = vmatprep.subr.bf16.mxu0 %v4904_v22  ;;  %v4946_v36 = vpack.c.bf16 %v3787_v34, %v3786_v33  ;;  %v3789_v22 = vld [vmem:[%s6930_s24 + $0x158] sm:$0xff]  ;;  %v3810_v33 = vld [vmem:[#allocation20] ss:$0 sm:$0xff] }
0x17bf   :  { %v4950_v25 = vpack.c.bf16 %v3789_v22, %v3788_v39 }
0x17c1   :  { %4907 = vmatpush1.bf16.msra.mxu0 %v4906_v45  ;;  %v3790_v45 = vld [vmem:[%s6930_s24 + $0x160] sm:$0xff] }
0x17c2   :  { %4909 = vmatprep.subr.bf16.mxu0 %v4908_v51  ;;  %v4954_v48 = vpack.c.bf16 %v3791_v46, %v3790_v45  ;;  %v3793_v51 = vld [vmem:[%s6930_s24 + $0x178] sm:$0xff] }
0x17c3   :  { %v4958_v47 = vpack.c.bf16 %v3793_v51, %v3792_v50 }
0x17c5   :  { %4911 = vmatpush1.bf16.msra.mxu0 %v4910_v56 }
0x1845   :  { %v3162_v5 = vpop.xlane.xlu0 %3161 }
0x1846   :  { %v3163_v37 = vmul.f32 0.015625, %v3162_v5  ;;  %v3795_v5 = vld [vmem:[%s6930_s24 + $0x188] sm:$0xff] }
0x1848   :  { %v6659_v52 = vsub.f32 %v6654_v3, %v3163_v37  ;;  %v4928_v37 = vpack.c.bf16 %v3795_v5, %v3794_v4 }
0x184a   :  { %v3165_v7 = vmul.f32 %v6659_v52, %v6659_v52  ;;  %4929 = vmatprep.subr.bf16.mxu0 %v4928_v37 }
0x184c   :  { %v3166_v35 = vsel %vm270_vm0, %v3165_v7, 0.0  ;;  %v3779_v7 = vld [vmem:[%s6930_s24 + $0x108] sm:$0xff] }
0x184d   :  { %3167 = vadd.xlane.f32.xlu1 %v3166_v35 }
0x18da   :  { %v3168_v59 = vpop.xlane.xlu1 %3167 }
0x18db   :  { %v3169_v60 = vmul.f32 0.015625, %v3168_v59 }
0x18dd   :  { %v3170_v62 = vadd.f32 1e-05, %v3169_v60 }
0x18df   :  { %5026 = vrsqrt.f32 %v3170_v62 }
0x18e9   :  { %v5027_v41 = vpop.eup %5026 }
0x18ea   :  { %v3172_v1 = vmul.f32 %v5027_v41, %v6659_v52  ;;  %v3778_v52 = vld [vmem:[%s6930_s24 + $0x100] sm:$0xff] }
0x18eb   :  { %v4930_v35 = vpack.c.bf16 %v3779_v7, %v3778_v52 }
0x18ec   :  { %v3179_v2 = vmul.f32 %v3741_v63, %v3172_v1 }
0x18ee   :  { %3758 = vmatmul.mubr.msk.f32.vlgmr.msra.gmra.mrb[62].mxu0 %vm270_vm0, %v3179_v2  ;;  %3775 = vmatmul.mubr.msk.f32.vlgmr.msra.gmra.mrb[64].mxu1 %vm270_vm0, %v3179_v2 }
0x18ef   :  { %4609 = vmatprep.mubr.msk.f32.mxu1 %vm5372_vm1, %v5373_v32  ;;  %4931 = vmatpush3.bf16.msra.mxu0 %v4930_v35  ;;  %v3796_v32 = vld [vmem:[%s6930_s24 + $0x190] sm:$0xff] }
0x18f0   :  { %v4932_v9 = vpack.c.bf16 %v3797_v61, %v3796_v32 }
0x18f2   :  { %4933 = vmatprep.subr.bf16.mxu0 %v4932_v9 }
0x18f3   :  { %4935 = vmatpush3.bf16.msra.mxu0 %v4934_v13 }
0x18f4   :  { %4937 = vmatprep.subr.bf16.mxu0 %v4936_v19  ;;  %v4961_v19 = vpack.c.bf16 %v3501_v18, %v3500_v14 }
0x18f6   :  { %4962 = vmatpush3.bf16.msra.mxu1 %v4961_v19 }
0x18f7   :  { %4939 = vmatpush3.bf16.msra.mxu0 %v4938_v16  ;;  %4963 = vmatprep.subr.bf16.mxu1 %v5371_v12  ;;  %v3504_v16 = vld [vmem:[%s6985_s26 + $0x20] sm:$0xff] }
0x18f8   :  { %4941 = vmatprep.subr.bf16.mxu0 %v4940_v24  ;;  %v4967_v23 = vpack.c.bf16 %v3505_v21, %v3504_v16  ;;  %v3506_v24 = vld [vmem:[%s6985_s26 + $0x30] sm:$0xff] }
0x18f9   :  { %v4970_v26 = vpack.c.bf16 %v3507_v17, %v3506_v24 }
0x18fb   :  { %4943 = vmatpush3.bf16.msra.mxu0 %v4942_v28 }
0x18fc   :  { %4945 = vmatprep.subr.bf16.mxu0 %v4944_v31 }
0x18ff   :  { %4947 = vmatpush3.bf16.msra.mxu0 %v4946_v36 }
0x1900   :  { %4949 = vmatprep.subr.bf16.mxu0 %v4948_v38 }
0x1903   :  { %4951 = vmatpush3.bf16.msra.mxu0 %v4950_v25 }
0x1904   :  { %4953 = vmatprep.subr.bf16.mxu0 %v4952_v43 }
0x1907   :  { %4955 = vmatpush3.bf16.msra.mxu0 %v4954_v48 }
0x1908   :  { %4957 = vmatprep.subr.bf16.mxu0 %v4956_v40 }
0x190b   :  { %4959 = vmatpush3.bf16.msra.mxu0 %v4958_v47 }
0x19c1   :  { %v3266_v53 = vpop.f32.mrb[62].mxu0  ;;  %v3354_v54 = vpop.f32.mrb[64].mxu1 }
0x19c2   :  { %v3776_v55 = vmul.f32 -1.442695, %v3354_v54  ;;  %v3268_v56 = vpop.f32.mrb[63].mxu0  ;;  %v3356_v57 = vpop.f32.mrb[65].mxu1 }
0x19c3   :  { %v3777_v44 = vmul.f32 -1.442695, %v3356_v57 }
0x19c4   :  { %5028 = vpow2.f32 %v3776_v55 }
0x19c5   :  { %5030 = vpow2.f32 %v3777_v44 }
0x19ce   :  { %v5029_v58 = vpop.eup %5028 }
0x19cf   :  { %v5031_v59 = vpop.eup %5030  ;;  %v3365_v60 = vadd.f32 1.0, %v5029_v58 }
0x19d0   :  { %v3366_v62 = vadd.f32 1.0, %v5031_v59 }
0x19d1   :  { %5032 = vrcp.f32 %v3365_v60 }
0x19d2   :  { %5034 = vrcp.f32 %v3366_v62 }
0x19db   :  { %v5033_v41 = vpop.eup %5032 }
0x19dc   :  { %v5035_v63 = vpop.eup %5034  ;;  %v3371_v1 = vmul.f32 %v5033_v41, %v3354_v54 }
0x19dd   :  { %v3372_v2 = vmul.f32 %v5035_v63, %v3356_v57 }
0x19de   :  { %v3373_v4 = vmul.f32 %v3371_v1, %v3266_v53 }
0x19df   :  { %v3374_v5 = vmul.f32 %v3372_v2, %v3268_v56 }
0x19e1   :  { %3472 = vmatprep.mubr.f32.mxu0 %v3374_v5 }
0x19e2   :  { %3473 = vmatmul.mubr.f32.vlgmr.msra.gmra.mrb[64].mxu0 %v3373_v4 }
0x1ab5   :  { %v4093_v37 = vpop.f32.mrb[64].mxu0 }
0x1ab6   :  { %v4094_v52 = vpop.f32.mrb[65].mxu0 }
0x1ab7   :  { %v4095_v7 = vadd.f32 %v4094_v52, %v4093_v37 }
0x1ab9   :  { %v3478_v35 = vadd.f32 %v4095_v7, %v6654_v3  ;;  %v3502_v3 = vld [vmem:[%s6985_s26 + $0x10] sm:$0xff] }
0x1aba   :  { %v4964_v6 = vpack.c.bf16 %v3503_v20, %v3502_v3 }
0x1abb   :  { %v3480_v32 = vsel %vm270_vm0, %v3478_v35, 0.0 }
0x1abc   :  { %3481 = vadd.xlane.f32.xlu0 %v3480_v32  ;;  %4965 = vmatpush3.bf16.msra.mxu1 %v4964_v6 }
0x1abd   :  { %4966 = vmatprep.subr.bf16.mxu1 %v5371_v12 }
0x1ac0   :  { %4968 = vmatpush3.bf16.msra.mxu1 %v4967_v23 }
0x1ac1   :  { %4969 = vmatprep.subr.bf16.mxu1 %v5371_v12 }
0x1ac4   :  { %4971 = vmatpush3.bf16.msra.mxu1 %v4970_v26 }
0x1b49   :  { %v3482_v61 = vpop.xlane.xlu0 %3481 }
0x1b4a   :  { %v3483_v9 = vmul.f32 0.015625, %v3482_v61 }
0x1b4c   :  { %v3484_v10 = vsub.f32 %v3478_v35, %v3483_v9 }
0x1b4e   :  { %v3485_v11 = vmul.f32 %v3484_v10, %v3484_v10 }
0x1b50   :  { %v3486_v13 = vsel %vm270_vm0, %v3485_v11, 0.0 }
0x1b51   :  { %3487 = vadd.xlane.f32.xlu1 %v3486_v13 }
0x1bde   :  { %v3488_v28 = vpop.xlane.xlu1 %3487 }
0x1bdf   :  { %v3489_v8 = vmul.f32 0.015625, %v3488_v28 }
0x1be1   :  { %v3490_v29 = vadd.f32 1e-05, %v3489_v8 }
0x1be3   :  { %5036 = vrsqrt.f32 %v3490_v29 }
0x1bed   :  { %v5037_v31 = vpop.eup %5036 }
0x1bee   :  { %v3492_v34 = vmul.f32 %v5037_v31, %v3484_v10 }
0x1bf0   :  { %v3499_v36 = vmul.f32 %v3810_v33, %v3492_v34 }
0x1bf2   :  { %4610 = vmatmul.mubr.msk.f32.vlgmr.msra.gmra.mrb[66].mxu1 %vm270_vm0, %v3499_v36 }
0x1cc5   :  { %v3577_v12 = vpop.f32.mrb[66].mxu1 }
0x1cc6   :  { %3581 = vst.msk [vmem:[#allocation22] sm:$0xff] %vm270_vm0, %v3577_v12  ;;  %v4611_v27 = vpop.f32.mrb[67].mxu1 }
0x1cc7   :  { %5328 = shalt.err (!%p5325_p2)
}
0x1cc8   :  { %s6986_s3 = sld [smem:[#allocation44_spill]] }
0x1cce   :  { %s5329_s7 = scalar_lea.hbm %s6986_s3, 128 }
0x1ccf   :  { %p5330_p3 = scmp.ne.s32.totalorder %s6986_s3, %s5329_s7  ;;  %p5333_p4 = scmp.lt.u32.totalorder %s5329_s7, %s6986_s3 }
0x1cd1   :  { %p5335_p5 = pnand %p5333_p4, %p5330_p3 }
0x1cd3   :  { %5338 = shalt.err (!%p5335_p5)
}
0x1cd4   :  { %3591 = dma.vmem_to_hbm [thread:$0]  %s3589_s20, 128, %s6986_s3, [#allocation4]  }
0x1cd5   :  { %5353 = dma.done.wait [#allocation4], 128  }
0x1cd6   :  { %5354 = vsyncadd [#allocation4], 4294967168 }
0x1cd7   :  { %3595 = vsyncpa [#allocation3], 1 }
0x1cd8   :  { %3596 = vsyncpa [#allocation6], 1 }
0x1cd9   :  { %3597 = vsyncpa [#allocation9], 1 }
0x1cda   :  { %3598 = vsyncpa [#allocation12], 1 }
0x1cdb   :  { %3599 = vsyncpa [#allocation15], 1 }
0x1cdc   :  { %3600 = vsyncpa [#allocation18], 1 }
0x1cdd   :  { %3601 = vsyncpa [#allocation21], 1 }
0x1cde   :  { %3602 = vsyncpa [#allocation4], 1 }

</bundles_post_ra>
